<compile_context>
chip_gen: v5e
topology: v5e:2x2
jax: 0.10.0
libtpu: 0.0.40
codegen_flags: <defaults>
</compile_context>

<pallas_src>
import jax
import jax.numpy as jnp
from jax.experimental import pallas as pl
from jax.experimental.pallas import tpu as pltpu

# ---- model hyper-parameters (concrete encoder/decoder instantiation) -------
ENC_VOCAB = 16
DEC_VOCAB = 16
EMBED = 8
HIDDEN = 32
NUM_LAYERS = 2
BATCH = 2
T_ENC = 8
T_DEC = 8

B_PAD = 8        # batch padded to one full sublane group
GATES = 128      # 3*HIDDEN = 96 gate columns padded to a full 128-lane vreg
V_PAD = 128      # DEC_VOCAB padded so logits rows are lane-dense (unmasked vst)


# --------------------------- in-kernel GRU recurrence ------------------------
def _gru_recurrence(gi_all, h0, wh, bh_n, n_steps, emit, gi_const=None):
    """Statically-unrolled GRU recurrence (PyTorch gate order r, z, n).

    gi_all  : (n_steps*B_PAD, GATES) hoisted input gates  x @ Wi_cat + bias,
              with b_hr / b_hz already folded in.
    h0      : (B_PAD, HIDDEN) initial hidden state.
    wh      : (HIDDEN, GATES) concatenated hidden-to-gate weights (r|z|n).
    bh_n    : (1, GATES) with only the n-columns nonzero (b_hn; scaled by r).
    emit    : callback(t, h_new) for per-step side outputs.
    gi_const: optional (B_PAD, GATES) added to every step's input gates
              (decoder layer 0 uses this for the constant encoder context).
    """
    h = h0
    for t in range(n_steps):
        gi = gi_all[t * B_PAD:(t + 1) * B_PAD, :]
        if gi_const is not None:
            gi = gi + gi_const
        gh = jnp.dot(h, wh, preferred_element_type=jnp.float32) + bh_n
        r = jax.nn.sigmoid(gi[:, 0:HIDDEN] + gh[:, 0:HIDDEN])
        z = jax.nn.sigmoid(gi[:, HIDDEN:2 * HIDDEN] + gh[:, HIDDEN:2 * HIDDEN])
        n = jnp.tanh(gi[:, 2 * HIDDEN:3 * HIDDEN]
                     + r * gh[:, 2 * HIDDEN:3 * HIDDEN])
        h = (1.0 - z) * n + z * h
        emit(t, h)
    return h


# ------------------------------ fused kernel ---------------------------------
def seq2seq_kernel(enc_ids_ref, dec_ids_ref,
                   wi_e0_ref, wi_e1_ref, wi_d0x_ref, wi_d0c_ref, wi_d1_ref,
                   wh_ref, bi_ref, bh_ref, wout_ref, bout_ref,
                   logits_ref, state_ref, enc_buf, dec_buf, d1_buf):
    f32 = jnp.float32

    # --- embedding lookup fused with layer-0 input projection: exact one-hot
    #     matmul against embedding-folded gate weights (pre-multiplied host-side)
    iota_e = jax.lax.broadcasted_iota(jnp.int32, (T_ENC * B_PAD, ENC_VOCAB), 1)
    onehot_e = (enc_ids_ref[...] == iota_e).astype(f32)          # (Te*BP, Venc)
    iota_d = jax.lax.broadcasted_iota(jnp.int32, (T_DEC * B_PAD, DEC_VOCAB), 1)
    onehot_d = (dec_ids_ref[...] == iota_d).astype(f32)          # (Td*BP, Vdec)

    h0 = jnp.zeros((B_PAD, HIDDEN), f32)

    # --- encoder layer 0: hoisted input projection, keep per-step hiddens ---
    gi = jnp.dot(onehot_e, wi_e0_ref[...], preferred_element_type=f32) + bi_ref[0]

    def emit_e0(t, h):
        enc_buf[t * B_PAD:(t + 1) * B_PAD, :] = h

    h_e0 = _gru_recurrence(gi, h0, wh_ref[0], bh_ref[0], T_ENC, emit_e0)

    # --- encoder layer 1: only its final hidden state is needed downstream ---
    gi = jnp.dot(enc_buf[...], wi_e1_ref[...], preferred_element_type=f32) + bi_ref[1]
    h_e1 = _gru_recurrence(gi, h0, wh_ref[1], bh_ref[1], T_ENC, lambda t, h: None)

    # --- decoder layer 0: input [emb_t, context]; context = h_e1 (constant) ---
    ctx_gi = jnp.dot(h_e1, wi_d0c_ref[...], preferred_element_type=f32)  # (BP, G)
    gi = jnp.dot(onehot_d, wi_d0x_ref[...], preferred_element_type=f32) + bi_ref[2]

    def emit_d0(t, h):
        dec_buf[t * B_PAD:(t + 1) * B_PAD, :] = h

    h_d0 = _gru_recurrence(gi, h_e0, wh_ref[2], bh_ref[2], T_DEC, emit_d0,
                           gi_const=ctx_gi)

    # --- decoder layer 1: stash per-step hiddens, project all logits at once ---
    gi = jnp.dot(dec_buf[...], wi_d1_ref[...], preferred_element_type=f32) + bi_ref[3]

    def emit_d1(t, h):
        d1_buf[t * B_PAD:(t + 1) * B_PAD, :] = h

    h_d1 = _gru_recurrence(gi, h_e1, wh_ref[3], bh_ref[3], T_DEC, emit_d1)

    # single (T*B_pad, H) @ (H, 128) matmul + one unmasked lane-dense store
    logits_ref[...] = (jnp.dot(d1_buf[...], wout_ref[...],
                               preferred_element_type=f32) + bout_ref[...])

    # --- final decoder GRU state, written exactly once ---
    state_ref[0] = h_d0
    state_ref[1] = h_d1


# ------------------------------ parameter init -------------------------------
def init_params(key):
    """PyTorch-GRU-style per-gate parameters (gate order r, z, n)."""
    def uni(k, shape, scale=0.1):
        return jax.random.uniform(k, shape, jnp.float32, -scale, scale)

    keys = iter(jax.random.split(key, 64))
    params = {
        "enc_emb": uni(next(keys), (ENC_VOCAB, EMBED)),
        "dec_emb": uni(next(keys), (DEC_VOCAB, EMBED)),
        "dec_w_t": uni(next(keys), (HIDDEN, DEC_VOCAB)),
        "dec_b": uni(next(keys), (1, DEC_VOCAB)),
        "enc_gru": [],
        "dec_gru": [],
    }
    for layer in range(NUM_LAYERS):
        e_in = EMBED if layer == 0 else HIDDEN
        params["enc_gru"].append((
            uni(next(keys), (3, e_in, HIDDEN)),
            uni(next(keys), (3, HIDDEN, HIDDEN)),
            uni(next(keys), (3, 1, HIDDEN)),
            uni(next(keys), (3, 1, HIDDEN)),
        ))
        d_in = (EMBED + HIDDEN) if layer == 0 else HIDDEN
        params["dec_gru"].append((
            uni(next(keys), (3, d_in, HIDDEN)),
            uni(next(keys), (3, HIDDEN, HIDDEN)),
            uni(next(keys), (3, 1, HIDDEN)),
            uni(next(keys), (3, 1, HIDDEN)),
        ))
    return params


# -------------------- pack per-gate params into fused layout -----------------
def _pack_wcat(w):                      # (3, K, H) -> (K, GATES) cols r|z|n
    cat = jnp.concatenate([w[0], w[1], w[2]], axis=1)          # (K, 3H)
    return jnp.zeros((w.shape[1], GATES), jnp.float32).at[:, :3 * HIDDEN].set(cat)


def _pack_bias_i(bi, bh):               # fold b_hr, b_hz into hoisted bias
    row = jnp.concatenate([bi[0] + bh[0], bi[1] + bh[1], bi[2]], axis=1)
    return jnp.zeros((1, GATES), jnp.float32).at[:, :3 * HIDDEN].set(row)


def _pack_bias_h(bh):                   # only b_hn stays on the recurrent path
    return jnp.zeros((1, GATES), jnp.float32).at[:, 2 * HIDDEN:3 * HIDDEN].set(bh[2])


def pack_params(p):
    e0_wi, e0_wh, e0_bi, e0_bh = p["enc_gru"][0]
    e1_wi, e1_wh, e1_bi, e1_bh = p["enc_gru"][1]
    d0_wi, d0_wh, d0_bi, d0_bh = p["dec_gru"][0]
    d1_wi, d1_wh, d1_bi, d1_bh = p["dec_gru"][1]
    return {
        # embedding tables folded into the layer-0 input->gate weights:
        # one-hot @ (emb @ Wi_cat) == (one-hot @ emb) @ Wi_cat
        "wi_e0": jnp.dot(p["enc_emb"], _pack_wcat(e0_wi)),              # (Venc, 128)
        "wi_e1": _pack_wcat(e1_wi),                                     # (H, 128)
        "wi_d0x": jnp.dot(p["dec_emb"],
                          _pack_wcat(d0_wi[:, :EMBED, :])),             # (Vdec, 128)
        "wi_d0c": _pack_wcat(d0_wi[:, EMBED:, :]),                      # (H, 128)
        "wi_d1": _pack_wcat(d1_wi),                                     # (H, 128)
        "wh": jnp.stack([_pack_wcat(e0_wh), _pack_wcat(e1_wh),
                         _pack_wcat(d0_wh), _pack_wcat(d1_wh)], axis=0),
        "bi": jnp.stack([_pack_bias_i(e0_bi, e0_bh), _pack_bias_i(e1_bi, e1_bh),
                         _pack_bias_i(d0_bi, d0_bh), _pack_bias_i(d1_bi, d1_bh)], 0),
        "bh": jnp.stack([_pack_bias_h(e0_bh), _pack_bias_h(e1_bh),
                         _pack_bias_h(d0_bh), _pack_bias_h(d1_bh)], 0),
        "w_out": jnp.zeros((HIDDEN, V_PAD), jnp.float32).at[:, :DEC_VOCAB].set(p["dec_w_t"]),
        "b_out": jnp.zeros((1, V_PAD), jnp.float32).at[:, :DEC_VOCAB].set(p["dec_b"]),
    }


# ------------------------------ forward pass ---------------------------------
def encoder_decoder_forward(params, enc_X, dec_X):
    B = enc_X.shape[0]
    pk = pack_params(params)

    def prep_ids(tok, t_steps):
        ids_tm = jnp.transpose(tok, (1, 0)).astype(jnp.int32)        # (T, B)
        ids_pad = jnp.zeros((t_steps, B_PAD), jnp.int32).at[:, :B].set(ids_tm)
        return ids_pad.reshape(t_steps * B_PAD, 1)                   # time-major

    enc_ids = prep_ids(enc_X, T_ENC)
    dec_ids = prep_ids(dec_X, T_DEC)

    logits_pad, state_pad = pl.pallas_call(
        seq2seq_kernel,
        out_shape=(jax.ShapeDtypeStruct((T_DEC * B_PAD, V_PAD), jnp.float32),
                   jax.ShapeDtypeStruct((NUM_LAYERS, B_PAD, HIDDEN), jnp.float32)),
        scratch_shapes=[pltpu.VMEM((T_ENC * B_PAD, HIDDEN), jnp.float32),
                        pltpu.VMEM((T_DEC * B_PAD, HIDDEN), jnp.float32),
                        pltpu.VMEM((T_DEC * B_PAD, HIDDEN), jnp.float32)],
    )(enc_ids, dec_ids,
      pk["wi_e0"], pk["wi_e1"], pk["wi_d0x"], pk["wi_d0c"], pk["wi_d1"],
      pk["wh"], pk["bi"], pk["bh"], pk["w_out"], pk["b_out"])

    logits = (logits_pad.reshape(T_DEC, B_PAD, V_PAD)[:, :B, :DEC_VOCAB]
              .transpose(1, 0, 2))                                   # (B, T, V)
    dec_state = state_pad[:, :B, :]                                  # (L, B, H)
    return logits, dec_state


# ------------------------- pure-JAX reference (checking) ---------------------
def _gru_layer_ref(x_tbe, h0, wi, wh, bi, bh):
    def step(h, x_t):
        i_r = x_t @ wi[0] + bi[0]; i_z = x_t @ wi[1] + bi[1]; i_n = x_t @ wi[2] + bi[2]
        h_r = h @ wh[0] + bh[0];   h_z = h @ wh[1] + bh[1];   h_n = h @ wh[2] + bh[2]
        r = jax.nn.sigmoid(i_r + h_r)
        z = jax.nn.sigmoid(i_z + h_z)
        n = jnp.tanh(i_n + r * h_n)
        h_new = (1.0 - z) * n + z * h
        return h_new, h_new
    h_last, ys = jax.lax.scan(step, h0, x_tbe)
    return ys, h_last


def reference_forward(params, enc_X, dec_X):
    B = enc_X.shape[0]
    x = jnp.transpose(jnp.take(params["enc_emb"], enc_X, axis=0), (1, 0, 2))
    enc_finals, inp = [], x
    for l in range(NUM_LAYERS):
        inp, h_n = _gru_layer_ref(inp, jnp.zeros((B, HIDDEN), jnp.float32),
                                  *params["enc_gru"][l])
        enc_finals.append(h_n)
    enc_state = jnp.stack(enc_finals, 0)

    dx = jnp.transpose(jnp.take(params["dec_emb"], dec_X, axis=0), (1, 0, 2))
    ctx = jnp.broadcast_to(enc_state[-1][None], (T_DEC, B, HIDDEN))
    out = jnp.concatenate([dx, ctx], axis=2)
    dec_finals = []
    for l in range(NUM_LAYERS):
        out, h_n = _gru_layer_ref(out, enc_state[l], *params["dec_gru"][l])
        dec_finals.append(h_n)
    logits = out.reshape(T_DEC * B, HIDDEN) @ params["dec_w_t"] + params["dec_b"]
    logits = logits.reshape(T_DEC, B, DEC_VOCAB).transpose(1, 0, 2)
    return logits, jnp.stack(dec_finals, 0)


if __name__ == "__main__":
    key = jax.random.PRNGKey(0)
    kp, ke, kd = jax.random.split(key, 3)
    params = init_params(kp)
    enc_X = jax.random.randint(ke, (BATCH, T_ENC), 0, ENC_VOCAB, jnp.int32)
    dec_X = jax.random.randint(kd, (BATCH, T_DEC), 0, DEC_VOCAB, jnp.int32)

    logits, dec_state = jax.jit(encoder_decoder_forward)(params, enc_X, dec_X)
    jax.block_until_ready((logits, dec_state))

    assert logits.shape == (BATCH, T_DEC, DEC_VOCAB)
    assert dec_state.shape == (NUM_LAYERS, BATCH, HIDDEN)

    ref_logits, ref_state = jax.jit(reference_forward)(params, enc_X, dec_X)
    assert jnp.allclose(logits, ref_logits, atol=1e-4, rtol=1e-4)
    assert jnp.allclose(dec_state, ref_state, atol=1e-4, rtol=1e-4)

    print("KERNEL_OK")
</pallas_src>

<mosaic_0001>
module attributes {stable_mosaic.version = 11 : i64} {
  func.func @seq2seq_kernel(%arg0: memref<64x1xi32, #tpu.memory_space<vmem>>, %arg1: memref<64x1xi32, #tpu.memory_space<vmem>>, %arg2: memref<16x128xf32, #tpu.memory_space<vmem>>, %arg3: memref<32x128xf32, #tpu.memory_space<vmem>>, %arg4: memref<16x128xf32, #tpu.memory_space<vmem>>, %arg5: memref<32x128xf32, #tpu.memory_space<vmem>>, %arg6: memref<32x128xf32, #tpu.memory_space<vmem>>, %arg7: memref<4x32x128xf32, #tpu.memory_space<vmem>>, %arg8: memref<4x1x128xf32, #tpu.memory_space<vmem>>, %arg9: memref<4x1x128xf32, #tpu.memory_space<vmem>>, %arg10: memref<32x128xf32, #tpu.memory_space<vmem>>, %arg11: memref<1x128xf32, #tpu.memory_space<vmem>>, %arg12: memref<64x128xf32, #tpu.memory_space<vmem>>, %arg13: memref<2x8x32xf32, #tpu.memory_space<vmem>>, %arg14: memref<64x32xf32, #tpu.memory_space<vmem>>, %arg15: memref<64x32xf32, #tpu.memory_space<vmem>>, %arg16: memref<64x32xf32, #tpu.memory_space<vmem>>) attributes {dimension_semantics = [], scalar_prefetch = 0 : i64, scratch_operands = 3 : i64, tpu.core_type = #tpu.core_type<tc>} {
    %0 = tpu.iota {dimensions = array<i32: 1>} : vector<64x16xi32>
    %c0 = arith.constant 0 : index
    %c0_0 = arith.constant 0 : index
    %1 = vector.load %arg0[%c0, %c0_0] : memref<64x1xi32, #tpu.memory_space<vmem>>, vector<64x1xi32>
    %2 = vector.broadcast %1 : vector<64x1xi32> to vector<64x16xi32>
    %3 = arith.cmpi eq, %2, %0 : vector<64x16xi32>
    %4 = arith.extui %3 : vector<64x16xi1> to vector<64x16xi32>
    %5 = arith.sitofp %4 : vector<64x16xi32> to vector<64x16xf32>
    %6 = tpu.iota {dimensions = array<i32: 1>} : vector<64x16xi32>
    %c0_1 = arith.constant 0 : index
    %c0_2 = arith.constant 0 : index
    %7 = vector.load %arg1[%c0_1, %c0_2] : memref<64x1xi32, #tpu.memory_space<vmem>>, vector<64x1xi32>
    %8 = vector.broadcast %7 : vector<64x1xi32> to vector<64x16xi32>
    %9 = arith.cmpi eq, %8, %6 : vector<64x16xi32>
    %10 = arith.extui %9 : vector<64x16xi1> to vector<64x16xi32>
    %11 = arith.sitofp %10 : vector<64x16xi32> to vector<64x16xf32>
    %cst = arith.constant 0.000000e+00 : f32
    %12 = vector.broadcast %cst : f32 to vector<8x32xf32>
    %c0_3 = arith.constant 0 : index
    %c0_4 = arith.constant 0 : index
    %13 = vector.load %arg2[%c0_3, %c0_4] : memref<16x128xf32, #tpu.memory_space<vmem>>, vector<16x128xf32>
    %cst_5 = arith.constant dense<0.000000e+00> : vector<64x128xf32>
    %14 = tpu.matmul %5, %13, %cst_5 {dimension_numbers = #tpu.dot_dimension_numbers<[1], [0], [0], [1], [0, 0, 1, 1], [], []>} : vector<64x16xf32>, vector<16x128xf32>, vector<64x128xf32> -> vector<64x128xf32>
    %c0_6 = arith.constant 0 : index
    %c0_7 = arith.constant 0 : index
    %c0_8 = arith.constant 0 : index
    %15 = vector.load %arg8[%c0_6, %c0_7, %c0_8] : memref<4x1x128xf32, #tpu.memory_space<vmem>>, vector<1x1x128xf32>
    %16 = vector.shape_cast %15 : vector<1x1x128xf32> to vector<1x128xf32>
    %17 = vector.broadcast %16 : vector<1x128xf32> to vector<64x128xf32>
    %18 = arith.addf %14, %17 : vector<64x128xf32>
    %c0_9 = arith.constant 0 : index
    %c0_10 = arith.constant 0 : index
    %c0_11 = arith.constant 0 : index
    %19 = vector.load %arg7[%c0_9, %c0_10, %c0_11] : memref<4x32x128xf32, #tpu.memory_space<vmem>>, vector<1x32x128xf32>
    %20 = vector.shape_cast %19 : vector<1x32x128xf32> to vector<32x128xf32>
    %c0_12 = arith.constant 0 : index
    %c0_13 = arith.constant 0 : index
    %c0_14 = arith.constant 0 : index
    %21 = vector.load %arg9[%c0_12, %c0_13, %c0_14] : memref<4x1x128xf32, #tpu.memory_space<vmem>>, vector<1x1x128xf32>
    %22 = vector.shape_cast %21 : vector<1x1x128xf32> to vector<1x128xf32>
    %23 = vector.extract_strided_slice %18 {offsets = [0, 0], sizes = [8, 128], strides = [1, 1]} : vector<64x128xf32> to vector<8x128xf32>
    %cst_15 = arith.constant dense<0.000000e+00> : vector<8x128xf32>
    %24 = tpu.matmul %12, %20, %cst_15 {dimension_numbers = #tpu.dot_dimension_numbers<[1], [0], [0], [1], [0, 0, 1, 1], [], []>} : vector<8x32xf32>, vector<32x128xf32>, vector<8x128xf32> -> vector<8x128xf32>
    %25 = vector.broadcast %22 : vector<1x128xf32> to vector<8x128xf32>
    %26 = arith.addf %24, %25 : vector<8x128xf32>
    %27 = vector.extract_strided_slice %23 {offsets = [0, 0], sizes = [8, 32], strides = [1, 1]} : vector<8x128xf32> to vector<8x32xf32>
    %28 = vector.extract_strided_slice %26 {offsets = [0, 0], sizes = [8, 32], strides = [1, 1]} : vector<8x128xf32> to vector<8x32xf32>
    %29 = arith.addf %27, %28 : vector<8x32xf32>
    %30 = arith.negf %29 : vector<8x32xf32>
    %31 = math.exp %30 : vector<8x32xf32>
    %cst_16 = arith.constant 1.000000e+00 : f32
    %32 = vector.broadcast %cst_16 : f32 to vector<8x32xf32>
    %33 = arith.addf %32, %31 : vector<8x32xf32>
    %34 = arith.divf %32, %33 : vector<8x32xf32>
    %35 = vector.extract_strided_slice %23 {offsets = [0, 32], sizes = [8, 32], strides = [1, 1]} : vector<8x128xf32> to vector<8x32xf32>
    %36 = vector.extract_strided_slice %26 {offsets = [0, 32], sizes = [8, 32], strides = [1, 1]} : vector<8x128xf32> to vector<8x32xf32>
    %37 = arith.addf %35, %36 : vector<8x32xf32>
    %38 = arith.negf %37 : vector<8x32xf32>
    %39 = math.exp %38 : vector<8x32xf32>
    %cst_17 = arith.constant 1.000000e+00 : f32
    %40 = vector.broadcast %cst_17 : f32 to vector<8x32xf32>
    %41 = arith.addf %40, %39 : vector<8x32xf32>
    %42 = arith.divf %40, %41 : vector<8x32xf32>
    %43 = vector.extract_strided_slice %23 {offsets = [0, 64], sizes = [8, 32], strides = [1, 1]} : vector<8x128xf32> to vector<8x32xf32>
    %44 = vector.extract_strided_slice %26 {offsets = [0, 64], sizes = [8, 32], strides = [1, 1]} : vector<8x128xf32> to vector<8x32xf32>
    %45 = arith.mulf %34, %44 : vector<8x32xf32>
    %46 = arith.addf %43, %45 : vector<8x32xf32>
    %47 = math.tanh %46 : vector<8x32xf32>
    %cst_18 = arith.constant 1.000000e+00 : f32
    %48 = vector.broadcast %cst_18 : f32 to vector<8x32xf32>
    %49 = arith.subf %48, %42 : vector<8x32xf32>
    %50 = arith.mulf %49, %47 : vector<8x32xf32>
    %51 = arith.mulf %42, %12 : vector<8x32xf32>
    %52 = arith.addf %50, %51 : vector<8x32xf32>
    %c0_19 = arith.constant 0 : index
    %c0_20 = arith.constant 0 : index
    %53 = vector.load %arg14[%c0_19, %c0_20] : memref<64x32xf32, #tpu.memory_space<vmem>>, vector<8x32xf32>
    tpu.vector_store %arg14[%c0_19, %c0_20], %52 {strides = array<i32>} : memref<64x32xf32, #tpu.memory_space<vmem>>, vector<8x32xf32>,
    %54 = vector.extract_strided_slice %18 {offsets = [8, 0], sizes = [8, 128], strides = [1, 1]} : vector<64x128xf32> to vector<8x128xf32>
    %cst_21 = arith.constant dense<0.000000e+00> : vector<8x128xf32>
    %55 = tpu.matmul %52, %20, %cst_21 {dimension_numbers = #tpu.dot_dimension_numbers<[1], [0], [0], [1], [0, 0, 1, 1], [], []>} : vector<8x32xf32>, vector<32x128xf32>, vector<8x128xf32> -> vector<8x128xf32>
    %56 = vector.broadcast %22 : vector<1x128xf32> to vector<8x128xf32>
    %57 = arith.addf %55, %56 : vector<8x128xf32>
    %58 = vector.extract_strided_slice %54 {offsets = [0, 0], sizes = [8, 32], strides = [1, 1]} : vector<8x128xf32> to vector<8x32xf32>
    %59 = vector.extract_strided_slice %57 {offsets = [0, 0], sizes = [8, 32], strides = [1, 1]} : vector<8x128xf32> to vector<8x32xf32>
    %60 = arith.addf %58, %59 : vector<8x32xf32>
    %61 = arith.negf %60 : vector<8x32xf32>
    %62 = math.exp %61 : vector<8x32xf32>
    %cst_22 = arith.constant 1.000000e+00 : f32
    %63 = vector.broadcast %cst_22 : f32 to vector<8x32xf32>
    %64 = arith.addf %63, %62 : vector<8x32xf32>
    %65 = arith.divf %63, %64 : vector<8x32xf32>
    %66 = vector.extract_strided_slice %54 {offsets = [0, 32], sizes = [8, 32], strides = [1, 1]} : vector<8x128xf32> to vector<8x32xf32>
    %67 = vector.extract_strided_slice %57 {offsets = [0, 32], sizes = [8, 32], strides = [1, 1]} : vector<8x128xf32> to vector<8x32xf32>
    %68 = arith.addf %66, %67 : vector<8x32xf32>
    %69 = arith.negf %68 : vector<8x32xf32>
    %70 = math.exp %69 : vector<8x32xf32>
    %cst_23 = arith.constant 1.000000e+00 : f32
    %71 = vector.broadcast %cst_23 : f32 to vector<8x32xf32>
    %72 = arith.addf %71, %70 : vector<8x32xf32>
    %73 = arith.divf %71, %72 : vector<8x32xf32>
    %74 = vector.extract_strided_slice %54 {offsets = [0, 64], sizes = [8, 32], strides = [1, 1]} : vector<8x128xf32> to vector<8x32xf32>
    %75 = vector.extract_strided_slice %57 {offsets = [0, 64], sizes = [8, 32], strides = [1, 1]} : vector<8x128xf32> to vector<8x32xf32>
    %76 = arith.mulf %65, %75 : vector<8x32xf32>
    %77 = arith.addf %74, %76 : vector<8x32xf32>
    %78 = math.tanh %77 : vector<8x32xf32>
    %cst_24 = arith.constant 1.000000e+00 : f32
    %79 = vector.broadcast %cst_24 : f32 to vector<8x32xf32>
    %80 = arith.subf %79, %73 : vector<8x32xf32>
    %81 = arith.mulf %80, %78 : vector<8x32xf32>
    %82 = arith.mulf %73, %52 : vector<8x32xf32>
    %83 = arith.addf %81, %82 : vector<8x32xf32>
    %c8 = arith.constant 8 : index
    %c0_25 = arith.constant 0 : index
    %84 = vector.load %arg14[%c8, %c0_25] : memref<64x32xf32, #tpu.memory_space<vmem>>, vector<8x32xf32>
    tpu.vector_store %arg14[%c8, %c0_25], %83 {strides = array<i32>} : memref<64x32xf32, #tpu.memory_space<vmem>>, vector<8x32xf32>,
    %85 = vector.extract_strided_slice %18 {offsets = [16, 0], sizes = [8, 128], strides = [1, 1]} : vector<64x128xf32> to vector<8x128xf32>
    %cst_26 = arith.constant dense<0.000000e+00> : vector<8x128xf32>
    %86 = tpu.matmul %83, %20, %cst_26 {dimension_numbers = #tpu.dot_dimension_numbers<[1], [0], [0], [1], [0, 0, 1, 1], [], []>} : vector<8x32xf32>, vector<32x128xf32>, vector<8x128xf32> -> vector<8x128xf32>
    %87 = vector.broadcast %22 : vector<1x128xf32> to vector<8x128xf32>
    %88 = arith.addf %86, %87 : vector<8x128xf32>
    %89 = vector.extract_strided_slice %85 {offsets = [0, 0], sizes = [8, 32], strides = [1, 1]} : vector<8x128xf32> to vector<8x32xf32>
    %90 = vector.extract_strided_slice %88 {offsets = [0, 0], sizes = [8, 32], strides = [1, 1]} : vector<8x128xf32> to vector<8x32xf32>
    %91 = arith.addf %89, %90 : vector<8x32xf32>
    %92 = arith.negf %91 : vector<8x32xf32>
    %93 = math.exp %92 : vector<8x32xf32>
    %cst_27 = arith.constant 1.000000e+00 : f32
    %94 = vector.broadcast %cst_27 : f32 to vector<8x32xf32>
    %95 = arith.addf %94, %93 : vector<8x32xf32>
    %96 = arith.divf %94, %95 : vector<8x32xf32>
    %97 = vector.extract_strided_slice %85 {offsets = [0, 32], sizes = [8, 32], strides = [1, 1]} : vector<8x128xf32> to vector<8x32xf32>
    %98 = vector.extract_strided_slice %88 {offsets = [0, 32], sizes = [8, 32], strides = [1, 1]} : vector<8x128xf32> to vector<8x32xf32>
    %99 = arith.addf %97, %98 : vector<8x32xf32>
    %100 = arith.negf %99 : vector<8x32xf32>
    %101 = math.exp %100 : vector<8x32xf32>
    %cst_28 = arith.constant 1.000000e+00 : f32
    %102 = vector.broadcast %cst_28 : f32 to vector<8x32xf32>
    %103 = arith.addf %102, %101 : vector<8x32xf32>
    %104 = arith.divf %102, %103 : vector<8x32xf32>
    %105 = vector.extract_strided_slice %85 {offsets = [0, 64], sizes = [8, 32], strides = [1, 1]} : vector<8x128xf32> to vector<8x32xf32>
    %106 = vector.extract_strided_slice %88 {offsets = [0, 64], sizes = [8, 32], strides = [1, 1]} : vector<8x128xf32> to vector<8x32xf32>
    %107 = arith.mulf %96, %106 : vector<8x32xf32>
    %108 = arith.addf %105, %107 : vector<8x32xf32>
    %109 = math.tanh %108 : vector<8x32xf32>
    %cst_29 = arith.constant 1.000000e+00 : f32
    %110 = vector.broadcast %cst_29 : f32 to vector<8x32xf32>
    %111 = arith.subf %110, %104 : vector<8x32xf32>
    %112 = arith.mulf %111, %109 : vector<8x32xf32>
    %113 = arith.mulf %104, %83 : vector<8x32xf32>
    %114 = arith.addf %112, %113 : vector<8x32xf32>
    %c16 = arith.constant 16 : index
    %c0_30 = arith.constant 0 : index
    %115 = vector.load %arg14[%c16, %c0_30] : memref<64x32xf32, #tpu.memory_space<vmem>>, vector<8x32xf32>
    tpu.vector_store %arg14[%c16, %c0_30], %114 {strides = array<i32>} : memref<64x32xf32, #tpu.memory_space<vmem>>, vector<8x32xf32>,
    %116 = vector.extract_strided_slice %18 {offsets = [24, 0], sizes = [8, 128], strides = [1, 1]} : vector<64x128xf32> to vector<8x128xf32>
    %cst_31 = arith.constant dense<0.000000e+00> : vector<8x128xf32>
    %117 = tpu.matmul %114, %20, %cst_31 {dimension_numbers = #tpu.dot_dimension_numbers<[1], [0], [0], [1], [0, 0, 1, 1], [], []>} : vector<8x32xf32>, vector<32x128xf32>, vector<8x128xf32> -> vector<8x128xf32>
    %118 = vector.broadcast %22 : vector<1x128xf32> to vector<8x128xf32>
    %119 = arith.addf %117, %118 : vector<8x128xf32>
    %120 = vector.extract_strided_slice %116 {offsets = [0, 0], sizes = [8, 32], strides = [1, 1]} : vector<8x128xf32> to vector<8x32xf32>
    %121 = vector.extract_strided_slice %119 {offsets = [0, 0], sizes = [8, 32], strides = [1, 1]} : vector<8x128xf32> to vector<8x32xf32>
    %122 = arith.addf %120, %121 : vector<8x32xf32>
    %123 = arith.negf %122 : vector<8x32xf32>
    %124 = math.exp %123 : vector<8x32xf32>
    %cst_32 = arith.constant 1.000000e+00 : f32
    %125 = vector.broadcast %cst_32 : f32 to vector<8x32xf32>
    %126 = arith.addf %125, %124 : vector<8x32xf32>
    %127 = arith.divf %125, %126 : vector<8x32xf32>
    %128 = vector.extract_strided_slice %116 {offsets = [0, 32], sizes = [8, 32], strides = [1, 1]} : vector<8x128xf32> to vector<8x32xf32>
    %129 = vector.extract_strided_slice %119 {offsets = [0, 32], sizes = [8, 32], strides = [1, 1]} : vector<8x128xf32> to vector<8x32xf32>
    %130 = arith.addf %128, %129 : vector<8x32xf32>
    %131 = arith.negf %130 : vector<8x32xf32>
    %132 = math.exp %131 : vector<8x32xf32>
    %cst_33 = arith.constant 1.000000e+00 : f32
    %133 = vector.broadcast %cst_33 : f32 to vector<8x32xf32>
    %134 = arith.addf %133, %132 : vector<8x32xf32>
    %135 = arith.divf %133, %134 : vector<8x32xf32>
    %136 = vector.extract_strided_slice %116 {offsets = [0, 64], sizes = [8, 32], strides = [1, 1]} : vector<8x128xf32> to vector<8x32xf32>
    %137 = vector.extract_strided_slice %119 {offsets = [0, 64], sizes = [8, 32], strides = [1, 1]} : vector<8x128xf32> to vector<8x32xf32>
    %138 = arith.mulf %127, %137 : vector<8x32xf32>
    %139 = arith.addf %136, %138 : vector<8x32xf32>
    %140 = math.tanh %139 : vector<8x32xf32>
    %cst_34 = arith.constant 1.000000e+00 : f32
    %141 = vector.broadcast %cst_34 : f32 to vector<8x32xf32>
    %142 = arith.subf %141, %135 : vector<8x32xf32>
    %143 = arith.mulf %142, %140 : vector<8x32xf32>
    %144 = arith.mulf %135, %114 : vector<8x32xf32>
    %145 = arith.addf %143, %144 : vector<8x32xf32>
    %c24 = arith.constant 24 : index
    %c0_35 = arith.constant 0 : index
    %146 = vector.load %arg14[%c24, %c0_35] : memref<64x32xf32, #tpu.memory_space<vmem>>, vector<8x32xf32>
    tpu.vector_store %arg14[%c24, %c0_35], %145 {strides = array<i32>} : memref<64x32xf32, #tpu.memory_space<vmem>>, vector<8x32xf32>,
    %147 = vector.extract_strided_slice %18 {offsets = [32, 0], sizes = [8, 128], strides = [1, 1]} : vector<64x128xf32> to vector<8x128xf32>
    %cst_36 = arith.constant dense<0.000000e+00> : vector<8x128xf32>
    %148 = tpu.matmul %145, %20, %cst_36 {dimension_numbers = #tpu.dot_dimension_numbers<[1], [0], [0], [1], [0, 0, 1, 1], [], []>} : vector<8x32xf32>, vector<32x128xf32>, vector<8x128xf32> -> vector<8x128xf32>
    %149 = vector.broadcast %22 : vector<1x128xf32> to vector<8x128xf32>
    %150 = arith.addf %148, %149 : vector<8x128xf32>
    %151 = vector.extract_strided_slice %147 {offsets = [0, 0], sizes = [8, 32], strides = [1, 1]} : vector<8x128xf32> to vector<8x32xf32>
    %152 = vector.extract_strided_slice %150 {offsets = [0, 0], sizes = [8, 32], strides = [1, 1]} : vector<8x128xf32> to vector<8x32xf32>
    %153 = arith.addf %151, %152 : vector<8x32xf32>
    %154 = arith.negf %153 : vector<8x32xf32>
    %155 = math.exp %154 : vector<8x32xf32>
    %cst_37 = arith.constant 1.000000e+00 : f32
    %156 = vector.broadcast %cst_37 : f32 to vector<8x32xf32>
    %157 = arith.addf %156, %155 : vector<8x32xf32>
    %158 = arith.divf %156, %157 : vector<8x32xf32>
    %159 = vector.extract_strided_slice %147 {offsets = [0, 32], sizes = [8, 32], strides = [1, 1]} : vector<8x128xf32> to vector<8x32xf32>
    %160 = vector.extract_strided_slice %150 {offsets = [0, 32], sizes = [8, 32], strides = [1, 1]} : vector<8x128xf32> to vector<8x32xf32>
    %161 = arith.addf %159, %160 : vector<8x32xf32>
    %162 = arith.negf %161 : vector<8x32xf32>
    %163 = math.exp %162 : vector<8x32xf32>
    %cst_38 = arith.constant 1.000000e+00 : f32
    %164 = vector.broadcast %cst_38 : f32 to vector<8x32xf32>
    %165 = arith.addf %164, %163 : vector<8x32xf32>
    %166 = arith.divf %164, %165 : vector<8x32xf32>
    %167 = vector.extract_strided_slice %147 {offsets = [0, 64], sizes = [8, 32], strides = [1, 1]} : vector<8x128xf32> to vector<8x32xf32>
    %168 = vector.extract_strided_slice %150 {offsets = [0, 64], sizes = [8, 32], strides = [1, 1]} : vector<8x128xf32> to vector<8x32xf32>
    %169 = arith.mulf %158, %168 : vector<8x32xf32>
    %170 = arith.addf %167, %169 : vector<8x32xf32>
    %171 = math.tanh %170 : vector<8x32xf32>
    %cst_39 = arith.constant 1.000000e+00 : f32
    %172 = vector.broadcast %cst_39 : f32 to vector<8x32xf32>
    %173 = arith.subf %172, %166 : vector<8x32xf32>
    %174 = arith.mulf %173, %171 : vector<8x32xf32>
    %175 = arith.mulf %166, %145 : vector<8x32xf32>
    %176 = arith.addf %174, %175 : vector<8x32xf32>
    %c32 = arith.constant 32 : index
    %c0_40 = arith.constant 0 : index
    %177 = vector.load %arg14[%c32, %c0_40] : memref<64x32xf32, #tpu.memory_space<vmem>>, vector<8x32xf32>
    tpu.vector_store %arg14[%c32, %c0_40], %176 {strides = array<i32>} : memref<64x32xf32, #tpu.memory_space<vmem>>, vector<8x32xf32>,
    %178 = vector.extract_strided_slice %18 {offsets = [40, 0], sizes = [8, 128], strides = [1, 1]} : vector<64x128xf32> to vector<8x128xf32>
    %cst_41 = arith.constant dense<0.000000e+00> : vector<8x128xf32>
    %179 = tpu.matmul %176, %20, %cst_41 {dimension_numbers = #tpu.dot_dimension_numbers<[1], [0], [0], [1], [0, 0, 1, 1], [], []>} : vector<8x32xf32>, vector<32x128xf32>, vector<8x128xf32> -> vector<8x128xf32>
    %180 = vector.broadcast %22 : vector<1x128xf32> to vector<8x128xf32>
    %181 = arith.addf %179, %180 : vector<8x128xf32>
    %182 = vector.extract_strided_slice %178 {offsets = [0, 0], sizes = [8, 32], strides = [1, 1]} : vector<8x128xf32> to vector<8x32xf32>
    %183 = vector.extract_strided_slice %181 {offsets = [0, 0], sizes = [8, 32], strides = [1, 1]} : vector<8x128xf32> to vector<8x32xf32>
    %184 = arith.addf %182, %183 : vector<8x32xf32>
    %185 = arith.negf %184 : vector<8x32xf32>
    %186 = math.exp %185 : vector<8x32xf32>
    %cst_42 = arith.constant 1.000000e+00 : f32
    %187 = vector.broadcast %cst_42 : f32 to vector<8x32xf32>
    %188 = arith.addf %187, %186 : vector<8x32xf32>
    %189 = arith.divf %187, %188 : vector<8x32xf32>
    %190 = vector.extract_strided_slice %178 {offsets = [0, 32], sizes = [8, 32], strides = [1, 1]} : vector<8x128xf32> to vector<8x32xf32>
    %191 = vector.extract_strided_slice %181 {offsets = [0, 32], sizes = [8, 32], strides = [1, 1]} : vector<8x128xf32> to vector<8x32xf32>
    %192 = arith.addf %190, %191 : vector<8x32xf32>
    %193 = arith.negf %192 : vector<8x32xf32>
    %194 = math.exp %193 : vector<8x32xf32>
    %cst_43 = arith.constant 1.000000e+00 : f32
    %195 = vector.broadcast %cst_43 : f32 to vector<8x32xf32>
    %196 = arith.addf %195, %194 : vector<8x32xf32>
    %197 = arith.divf %195, %196 : vector<8x32xf32>
    %198 = vector.extract_strided_slice %178 {offsets = [0, 64], sizes = [8, 32], strides = [1, 1]} : vector<8x128xf32> to vector<8x32xf32>
    %199 = vector.extract_strided_slice %181 {offsets = [0, 64], sizes = [8, 32], strides = [1, 1]} : vector<8x128xf32> to vector<8x32xf32>
    %200 = arith.mulf %189, %199 : vector<8x32xf32>
    %201 = arith.addf %198, %200 : vector<8x32xf32>
    %202 = math.tanh %201 : vector<8x32xf32>
    %cst_44 = arith.constant 1.000000e+00 : f32
    %203 = vector.broadcast %cst_44 : f32 to vector<8x32xf32>
    %204 = arith.subf %203, %197 : vector<8x32xf32>
    %205 = arith.mulf %204, %202 : vector<8x32xf32>
    %206 = arith.mulf %197, %176 : vector<8x32xf32>
    %207 = arith.addf %205, %206 : vector<8x32xf32>
    %c40 = arith.constant 40 : index
    %c0_45 = arith.constant 0 : index
    %208 = vector.load %arg14[%c40, %c0_45] : memref<64x32xf32, #tpu.memory_space<vmem>>, vector<8x32xf32>
    tpu.vector_store %arg14[%c40, %c0_45], %207 {strides = array<i32>} : memref<64x32xf32, #tpu.memory_space<vmem>>, vector<8x32xf32>,
    %209 = vector.extract_strided_slice %18 {offsets = [48, 0], sizes = [8, 128], strides = [1, 1]} : vector<64x128xf32> to vector<8x128xf32>
    %cst_46 = arith.constant dense<0.000000e+00> : vector<8x128xf32>
    %210 = tpu.matmul %207, %20, %cst_46 {dimension_numbers = #tpu.dot_dimension_numbers<[1], [0], [0], [1], [0, 0, 1, 1], [], []>} : vector<8x32xf32>, vector<32x128xf32>, vector<8x128xf32> -> vector<8x128xf32>
    %211 = vector.broadcast %22 : vector<1x128xf32> to vector<8x128xf32>
    %212 = arith.addf %210, %211 : vector<8x128xf32>
    %213 = vector.extract_strided_slice %209 {offsets = [0, 0], sizes = [8, 32], strides = [1, 1]} : vector<8x128xf32> to vector<8x32xf32>
    %214 = vector.extract_strided_slice %212 {offsets = [0, 0], sizes = [8, 32], strides = [1, 1]} : vector<8x128xf32> to vector<8x32xf32>
    %215 = arith.addf %213, %214 : vector<8x32xf32>
    %216 = arith.negf %215 : vector<8x32xf32>
    %217 = math.exp %216 : vector<8x32xf32>
    %cst_47 = arith.constant 1.000000e+00 : f32
    %218 = vector.broadcast %cst_47 : f32 to vector<8x32xf32>
    %219 = arith.addf %218, %217 : vector<8x32xf32>
    %220 = arith.divf %218, %219 : vector<8x32xf32>
    %221 = vector.extract_strided_slice %209 {offsets = [0, 32], sizes = [8, 32], strides = [1, 1]} : vector<8x128xf32> to vector<8x32xf32>
    %222 = vector.extract_strided_slice %212 {offsets = [0, 32], sizes = [8, 32], strides = [1, 1]} : vector<8x128xf32> to vector<8x32xf32>
    %223 = arith.addf %221, %222 : vector<8x32xf32>
    %224 = arith.negf %223 : vector<8x32xf32>
    %225 = math.exp %224 : vector<8x32xf32>
    %cst_48 = arith.constant 1.000000e+00 : f32
    %226 = vector.broadcast %cst_48 : f32 to vector<8x32xf32>
    %227 = arith.addf %226, %225 : vector<8x32xf32>
    %228 = arith.divf %226, %227 : vector<8x32xf32>
    %229 = vector.extract_strided_slice %209 {offsets = [0, 64], sizes = [8, 32], strides = [1, 1]} : vector<8x128xf32> to vector<8x32xf32>
    %230 = vector.extract_strided_slice %212 {offsets = [0, 64], sizes = [8, 32], strides = [1, 1]} : vector<8x128xf32> to vector<8x32xf32>
    %231 = arith.mulf %220, %230 : vector<8x32xf32>
    %232 = arith.addf %229, %231 : vector<8x32xf32>
    %233 = math.tanh %232 : vector<8x32xf32>
    %cst_49 = arith.constant 1.000000e+00 : f32
    %234 = vector.broadcast %cst_49 : f32 to vector<8x32xf32>
    %235 = arith.subf %234, %228 : vector<8x32xf32>
    %236 = arith.mulf %235, %233 : vector<8x32xf32>
    %237 = arith.mulf %228, %207 : vector<8x32xf32>
    %238 = arith.addf %236, %237 : vector<8x32xf32>
    %c48 = arith.constant 48 : index
    %c0_50 = arith.constant 0 : index
    %239 = vector.load %arg14[%c48, %c0_50] : memref<64x32xf32, #tpu.memory_space<vmem>>, vector<8x32xf32>
    tpu.vector_store %arg14[%c48, %c0_50], %238 {strides = array<i32>} : memref<64x32xf32, #tpu.memory_space<vmem>>, vector<8x32xf32>,
    %240 = vector.extract_strided_slice %18 {offsets = [56, 0], sizes = [8, 128], strides = [1, 1]} : vector<64x128xf32> to vector<8x128xf32>
    %cst_51 = arith.constant dense<0.000000e+00> : vector<8x128xf32>
    %241 = tpu.matmul %238, %20, %cst_51 {dimension_numbers = #tpu.dot_dimension_numbers<[1], [0], [0], [1], [0, 0, 1, 1], [], []>} : vector<8x32xf32>, vector<32x128xf32>, vector<8x128xf32> -> vector<8x128xf32>
    %242 = vector.broadcast %22 : vector<1x128xf32> to vector<8x128xf32>
    %243 = arith.addf %241, %242 : vector<8x128xf32>
    %244 = vector.extract_strided_slice %240 {offsets = [0, 0], sizes = [8, 32], strides = [1, 1]} : vector<8x128xf32> to vector<8x32xf32>
    %245 = vector.extract_strided_slice %243 {offsets = [0, 0], sizes = [8, 32], strides = [1, 1]} : vector<8x128xf32> to vector<8x32xf32>
    %246 = arith.addf %244, %245 : vector<8x32xf32>
    %247 = arith.negf %246 : vector<8x32xf32>
    %248 = math.exp %247 : vector<8x32xf32>
    %cst_52 = arith.constant 1.000000e+00 : f32
    %249 = vector.broadcast %cst_52 : f32 to vector<8x32xf32>
    %250 = arith.addf %249, %248 : vector<8x32xf32>
    %251 = arith.divf %249, %250 : vector<8x32xf32>
    %252 = vector.extract_strided_slice %240 {offsets = [0, 32], sizes = [8, 32], strides = [1, 1]} : vector<8x128xf32> to vector<8x32xf32>
    %253 = vector.extract_strided_slice %243 {offsets = [0, 32], sizes = [8, 32], strides = [1, 1]} : vector<8x128xf32> to vector<8x32xf32>
    %254 = arith.addf %252, %253 : vector<8x32xf32>
    %255 = arith.negf %254 : vector<8x32xf32>
    %256 = math.exp %255 : vector<8x32xf32>
    %cst_53 = arith.constant 1.000000e+00 : f32
    %257 = vector.broadcast %cst_53 : f32 to vector<8x32xf32>
    %258 = arith.addf %257, %256 : vector<8x32xf32>
    %259 = arith.divf %257, %258 : vector<8x32xf32>
    %260 = vector.extract_strided_slice %240 {offsets = [0, 64], sizes = [8, 32], strides = [1, 1]} : vector<8x128xf32> to vector<8x32xf32>
    %261 = vector.extract_strided_slice %243 {offsets = [0, 64], sizes = [8, 32], strides = [1, 1]} : vector<8x128xf32> to vector<8x32xf32>
    %262 = arith.mulf %251, %261 : vector<8x32xf32>
    %263 = arith.addf %260, %262 : vector<8x32xf32>
    %264 = math.tanh %263 : vector<8x32xf32>
    %cst_54 = arith.constant 1.000000e+00 : f32
    %265 = vector.broadcast %cst_54 : f32 to vector<8x32xf32>
    %266 = arith.subf %265, %259 : vector<8x32xf32>
    %267 = arith.mulf %266, %264 : vector<8x32xf32>
    %268 = arith.mulf %259, %238 : vector<8x32xf32>
    %269 = arith.addf %267, %268 : vector<8x32xf32>
    %c56 = arith.constant 56 : index
    %c0_55 = arith.constant 0 : index
    %270 = vector.load %arg14[%c56, %c0_55] : memref<64x32xf32, #tpu.memory_space<vmem>>, vector<8x32xf32>
    tpu.vector_store %arg14[%c56, %c0_55], %269 {strides = array<i32>} : memref<64x32xf32, #tpu.memory_space<vmem>>, vector<8x32xf32>,
    %c0_56 = arith.constant 0 : index
    %c0_57 = arith.constant 0 : index
    %271 = vector.load %arg14[%c0_56, %c0_57] : memref<64x32xf32, #tpu.memory_space<vmem>>, vector<64x32xf32>
    %c0_58 = arith.constant 0 : index
    %c0_59 = arith.constant 0 : index
    %272 = vector.load %arg3[%c0_58, %c0_59] : memref<32x128xf32, #tpu.memory_space<vmem>>, vector<32x128xf32>
    %cst_60 = arith.constant dense<0.000000e+00> : vector<64x128xf32>
    %273 = tpu.matmul %271, %272, %cst_60 {dimension_numbers = #tpu.dot_dimension_numbers<[1], [0], [0], [1], [0, 0, 1, 1], [], []>} : vector<64x32xf32>, vector<32x128xf32>, vector<64x128xf32> -> vector<64x128xf32>
    %c1 = arith.constant 1 : index
    %c0_61 = arith.constant 0 : index
    %c0_62 = arith.constant 0 : index
    %274 = vector.load %arg8[%c1, %c0_61, %c0_62] : memref<4x1x128xf32, #tpu.memory_space<vmem>>, vector<1x1x128xf32>
    %275 = vector.shape_cast %274 : vector<1x1x128xf32> to vector<1x128xf32>
    %276 = vector.broadcast %275 : vector<1x128xf32> to vector<64x128xf32>
    %277 = arith.addf %273, %276 : vector<64x128xf32>
    %c1_63 = arith.constant 1 : index
    %c0_64 = arith.constant 0 : index
    %c0_65 = arith.constant 0 : index
    %278 = vector.load %arg7[%c1_63, %c0_64, %c0_65] : memref<4x32x128xf32, #tpu.memory_space<vmem>>, vector<1x32x128xf32>
    %279 = vector.shape_cast %278 : vector<1x32x128xf32> to vector<32x128xf32>
    %c1_66 = arith.constant 1 : index
    %c0_67 = arith.constant 0 : index
    %c0_68 = arith.constant 0 : index
    %280 = vector.load %arg9[%c1_66, %c0_67, %c0_68] : memref<4x1x128xf32, #tpu.memory_space<vmem>>, vector<1x1x128xf32>
    %281 = vector.shape_cast %280 : vector<1x1x128xf32> to vector<1x128xf32>
    %282 = vector.extract_strided_slice %277 {offsets = [0, 0], sizes = [8, 128], strides = [1, 1]} : vector<64x128xf32> to vector<8x128xf32>
    %cst_69 = arith.constant dense<0.000000e+00> : vector<8x128xf32>
    %283 = tpu.matmul %12, %279, %cst_69 {dimension_numbers = #tpu.dot_dimension_numbers<[1], [0], [0], [1], [0, 0, 1, 1], [], []>} : vector<8x32xf32>, vector<32x128xf32>, vector<8x128xf32> -> vector<8x128xf32>
    %284 = vector.broadcast %281 : vector<1x128xf32> to vector<8x128xf32>
    %285 = arith.addf %283, %284 : vector<8x128xf32>
    %286 = vector.extract_strided_slice %282 {offsets = [0, 0], sizes = [8, 32], strides = [1, 1]} : vector<8x128xf32> to vector<8x32xf32>
    %287 = vector.extract_strided_slice %285 {offsets = [0, 0], sizes = [8, 32], strides = [1, 1]} : vector<8x128xf32> to vector<8x32xf32>
    %288 = arith.addf %286, %287 : vector<8x32xf32>
    %289 = arith.negf %288 : vector<8x32xf32>
    %290 = math.exp %289 : vector<8x32xf32>
    %cst_70 = arith.constant 1.000000e+00 : f32
    %291 = vector.broadcast %cst_70 : f32 to vector<8x32xf32>
    %292 = arith.addf %291, %290 : vector<8x32xf32>
    %293 = arith.divf %291, %292 : vector<8x32xf32>
    %294 = vector.extract_strided_slice %282 {offsets = [0, 32], sizes = [8, 32], strides = [1, 1]} : vector<8x128xf32> to vector<8x32xf32>
    %295 = vector.extract_strided_slice %285 {offsets = [0, 32], sizes = [8, 32], strides = [1, 1]} : vector<8x128xf32> to vector<8x32xf32>
    %296 = arith.addf %294, %295 : vector<8x32xf32>
    %297 = arith.negf %296 : vector<8x32xf32>
    %298 = math.exp %297 : vector<8x32xf32>
    %cst_71 = arith.constant 1.000000e+00 : f32
    %299 = vector.broadcast %cst_71 : f32 to vector<8x32xf32>
    %300 = arith.addf %299, %298 : vector<8x32xf32>
    %301 = arith.divf %299, %300 : vector<8x32xf32>
    %302 = vector.extract_strided_slice %282 {offsets = [0, 64], sizes = [8, 32], strides = [1, 1]} : vector<8x128xf32> to vector<8x32xf32>
    %303 = vector.extract_strided_slice %285 {offsets = [0, 64], sizes = [8, 32], strides = [1, 1]} : vector<8x128xf32> to vector<8x32xf32>
    %304 = arith.mulf %293, %303 : vector<8x32xf32>
    %305 = arith.addf %302, %304 : vector<8x32xf32>
    %306 = math.tanh %305 : vector<8x32xf32>
    %cst_72 = arith.constant 1.000000e+00 : f32
    %307 = vector.broadcast %cst_72 : f32 to vector<8x32xf32>
    %308 = arith.subf %307, %301 : vector<8x32xf32>
    %309 = arith.mulf %308, %306 : vector<8x32xf32>
    %310 = arith.mulf %301, %12 : vector<8x32xf32>
    %311 = arith.addf %309, %310 : vector<8x32xf32>
    %312 = vector.extract_strided_slice %277 {offsets = [8, 0], sizes = [8, 128], strides = [1, 1]} : vector<64x128xf32> to vector<8x128xf32>
    %cst_73 = arith.constant dense<0.000000e+00> : vector<8x128xf32>
    %313 = tpu.matmul %311, %279, %cst_73 {dimension_numbers = #tpu.dot_dimension_numbers<[1], [0], [0], [1], [0, 0, 1, 1], [], []>} : vector<8x32xf32>, vector<32x128xf32>, vector<8x128xf32> -> vector<8x128xf32>
    %314 = vector.broadcast %281 : vector<1x128xf32> to vector<8x128xf32>
    %315 = arith.addf %313, %314 : vector<8x128xf32>
    %316 = vector.extract_strided_slice %312 {offsets = [0, 0], sizes = [8, 32], strides = [1, 1]} : vector<8x128xf32> to vector<8x32xf32>
    %317 = vector.extract_strided_slice %315 {offsets = [0, 0], sizes = [8, 32], strides = [1, 1]} : vector<8x128xf32> to vector<8x32xf32>
    %318 = arith.addf %316, %317 : vector<8x32xf32>
    %319 = arith.negf %318 : vector<8x32xf32>
    %320 = math.exp %319 : vector<8x32xf32>
    %cst_74 = arith.constant 1.000000e+00 : f32
    %321 = vector.broadcast %cst_74 : f32 to vector<8x32xf32>
    %322 = arith.addf %321, %320 : vector<8x32xf32>
    %323 = arith.divf %321, %322 : vector<8x32xf32>
    %324 = vector.extract_strided_slice %312 {offsets = [0, 32], sizes = [8, 32], strides = [1, 1]} : vector<8x128xf32> to vector<8x32xf32>
    %325 = vector.extract_strided_slice %315 {offsets = [0, 32], sizes = [8, 32], strides = [1, 1]} : vector<8x128xf32> to vector<8x32xf32>
    %326 = arith.addf %324, %325 : vector<8x32xf32>
    %327 = arith.negf %326 : vector<8x32xf32>
    %328 = math.exp %327 : vector<8x32xf32>
    %cst_75 = arith.constant 1.000000e+00 : f32
    %329 = vector.broadcast %cst_75 : f32 to vector<8x32xf32>
    %330 = arith.addf %329, %328 : vector<8x32xf32>
    %331 = arith.divf %329, %330 : vector<8x32xf32>
    %332 = vector.extract_strided_slice %312 {offsets = [0, 64], sizes = [8, 32], strides = [1, 1]} : vector<8x128xf32> to vector<8x32xf32>
    %333 = vector.extract_strided_slice %315 {offsets = [0, 64], sizes = [8, 32], strides = [1, 1]} : vector<8x128xf32> to vector<8x32xf32>
    %334 = arith.mulf %323, %333 : vector<8x32xf32>
    %335 = arith.addf %332, %334 : vector<8x32xf32>
    %336 = math.tanh %335 : vector<8x32xf32>
    %cst_76 = arith.constant 1.000000e+00 : f32
    %337 = vector.broadcast %cst_76 : f32 to vector<8x32xf32>
    %338 = arith.subf %337, %331 : vector<8x32xf32>
    %339 = arith.mulf %338, %336 : vector<8x32xf32>
    %340 = arith.mulf %331, %311 : vector<8x32xf32>
    %341 = arith.addf %339, %340 : vector<8x32xf32>
    %342 = vector.extract_strided_slice %277 {offsets = [16, 0], sizes = [8, 128], strides = [1, 1]} : vector<64x128xf32> to vector<8x128xf32>
    %cst_77 = arith.constant dense<0.000000e+00> : vector<8x128xf32>
    %343 = tpu.matmul %341, %279, %cst_77 {dimension_numbers = #tpu.dot_dimension_numbers<[1], [0], [0], [1], [0, 0, 1, 1], [], []>} : vector<8x32xf32>, vector<32x128xf32>, vector<8x128xf32> -> vector<8x128xf32>
    %344 = vector.broadcast %281 : vector<1x128xf32> to vector<8x128xf32>
    %345 = arith.addf %343, %344 : vector<8x128xf32>
    %346 = vector.extract_strided_slice %342 {offsets = [0, 0], sizes = [8, 32], strides = [1, 1]} : vector<8x128xf32> to vector<8x32xf32>
    %347 = vector.extract_strided_slice %345 {offsets = [0, 0], sizes = [8, 32], strides = [1, 1]} : vector<8x128xf32> to vector<8x32xf32>
    %348 = arith.addf %346, %347 : vector<8x32xf32>
    %349 = arith.negf %348 : vector<8x32xf32>
    %350 = math.exp %349 : vector<8x32xf32>
    %cst_78 = arith.constant 1.000000e+00 : f32
    %351 = vector.broadcast %cst_78 : f32 to vector<8x32xf32>
    %352 = arith.addf %351, %350 : vector<8x32xf32>
    %353 = arith.divf %351, %352 : vector<8x32xf32>
    %354 = vector.extract_strided_slice %342 {offsets = [0, 32], sizes = [8, 32], strides = [1, 1]} : vector<8x128xf32> to vector<8x32xf32>
    %355 = vector.extract_strided_slice %345 {offsets = [0, 32], sizes = [8, 32], strides = [1, 1]} : vector<8x128xf32> to vector<8x32xf32>
    %356 = arith.addf %354, %355 : vector<8x32xf32>
    %357 = arith.negf %356 : vector<8x32xf32>
    %358 = math.exp %357 : vector<8x32xf32>
    %cst_79 = arith.constant 1.000000e+00 : f32
    %359 = vector.broadcast %cst_79 : f32 to vector<8x32xf32>
    %360 = arith.addf %359, %358 : vector<8x32xf32>
    %361 = arith.divf %359, %360 : vector<8x32xf32>
    %362 = vector.extract_strided_slice %342 {offsets = [0, 64], sizes = [8, 32], strides = [1, 1]} : vector<8x128xf32> to vector<8x32xf32>
    %363 = vector.extract_strided_slice %345 {offsets = [0, 64], sizes = [8, 32], strides = [1, 1]} : vector<8x128xf32> to vector<8x32xf32>
    %364 = arith.mulf %353, %363 : vector<8x32xf32>
    %365 = arith.addf %362, %364 : vector<8x32xf32>
    %366 = math.tanh %365 : vector<8x32xf32>
    %cst_80 = arith.constant 1.000000e+00 : f32
    %367 = vector.broadcast %cst_80 : f32 to vector<8x32xf32>
    %368 = arith.subf %367, %361 : vector<8x32xf32>
    %369 = arith.mulf %368, %366 : vector<8x32xf32>
    %370 = arith.mulf %361, %341 : vector<8x32xf32>
    %371 = arith.addf %369, %370 : vector<8x32xf32>
    %372 = vector.extract_strided_slice %277 {offsets = [24, 0], sizes = [8, 128], strides = [1, 1]} : vector<64x128xf32> to vector<8x128xf32>
    %cst_81 = arith.constant dense<0.000000e+00> : vector<8x128xf32>
    %373 = tpu.matmul %371, %279, %cst_81 {dimension_numbers = #tpu.dot_dimension_numbers<[1], [0], [0], [1], [0, 0, 1, 1], [], []>} : vector<8x32xf32>, vector<32x128xf32>, vector<8x128xf32> -> vector<8x128xf32>
    %374 = vector.broadcast %281 : vector<1x128xf32> to vector<8x128xf32>
    %375 = arith.addf %373, %374 : vector<8x128xf32>
    %376 = vector.extract_strided_slice %372 {offsets = [0, 0], sizes = [8, 32], strides = [1, 1]} : vector<8x128xf32> to vector<8x32xf32>
    %377 = vector.extract_strided_slice %375 {offsets = [0, 0], sizes = [8, 32], strides = [1, 1]} : vector<8x128xf32> to vector<8x32xf32>
    %378 = arith.addf %376, %377 : vector<8x32xf32>
    %379 = arith.negf %378 : vector<8x32xf32>
    %380 = math.exp %379 : vector<8x32xf32>
    %cst_82 = arith.constant 1.000000e+00 : f32
    %381 = vector.broadcast %cst_82 : f32 to vector<8x32xf32>
    %382 = arith.addf %381, %380 : vector<8x32xf32>
    %383 = arith.divf %381, %382 : vector<8x32xf32>
    %384 = vector.extract_strided_slice %372 {offsets = [0, 32], sizes = [8, 32], strides = [1, 1]} : vector<8x128xf32> to vector<8x32xf32>
    %385 = vector.extract_strided_slice %375 {offsets = [0, 32], sizes = [8, 32], strides = [1, 1]} : vector<8x128xf32> to vector<8x32xf32>
    %386 = arith.addf %384, %385 : vector<8x32xf32>
    %387 = arith.negf %386 : vector<8x32xf32>
    %388 = math.exp %387 : vector<8x32xf32>
    %cst_83 = arith.constant 1.000000e+00 : f32
    %389 = vector.broadcast %cst_83 : f32 to vector<8x32xf32>
    %390 = arith.addf %389, %388 : vector<8x32xf32>
    %391 = arith.divf %389, %390 : vector<8x32xf32>
    %392 = vector.extract_strided_slice %372 {offsets = [0, 64], sizes = [8, 32], strides = [1, 1]} : vector<8x128xf32> to vector<8x32xf32>
    %393 = vector.extract_strided_slice %375 {offsets = [0, 64], sizes = [8, 32], strides = [1, 1]} : vector<8x128xf32> to vector<8x32xf32>
    %394 = arith.mulf %383, %393 : vector<8x32xf32>
    %395 = arith.addf %392, %394 : vector<8x32xf32>
    %396 = math.tanh %395 : vector<8x32xf32>
    %cst_84 = arith.constant 1.000000e+00 : f32
    %397 = vector.broadcast %cst_84 : f32 to vector<8x32xf32>
    %398 = arith.subf %397, %391 : vector<8x32xf32>
    %399 = arith.mulf %398, %396 : vector<8x32xf32>
    %400 = arith.mulf %391, %371 : vector<8x32xf32>
    %401 = arith.addf %399, %400 : vector<8x32xf32>
    %402 = vector.extract_strided_slice %277 {offsets = [32, 0], sizes = [8, 128], strides = [1, 1]} : vector<64x128xf32> to vector<8x128xf32>
    %cst_85 = arith.constant dense<0.000000e+00> : vector<8x128xf32>
    %403 = tpu.matmul %401, %279, %cst_85 {dimension_numbers = #tpu.dot_dimension_numbers<[1], [0], [0], [1], [0, 0, 1, 1], [], []>} : vector<8x32xf32>, vector<32x128xf32>, vector<8x128xf32> -> vector<8x128xf32>
    %404 = vector.broadcast %281 : vector<1x128xf32> to vector<8x128xf32>
    %405 = arith.addf %403, %404 : vector<8x128xf32>
    %406 = vector.extract_strided_slice %402 {offsets = [0, 0], sizes = [8, 32], strides = [1, 1]} : vector<8x128xf32> to vector<8x32xf32>
    %407 = vector.extract_strided_slice %405 {offsets = [0, 0], sizes = [8, 32], strides = [1, 1]} : vector<8x128xf32> to vector<8x32xf32>
    %408 = arith.addf %406, %407 : vector<8x32xf32>
    %409 = arith.negf %408 : vector<8x32xf32>
    %410 = math.exp %409 : vector<8x32xf32>
    %cst_86 = arith.constant 1.000000e+00 : f32
    %411 = vector.broadcast %cst_86 : f32 to vector<8x32xf32>
    %412 = arith.addf %411, %410 : vector<8x32xf32>
    %413 = arith.divf %411, %412 : vector<8x32xf32>
    %414 = vector.extract_strided_slice %402 {offsets = [0, 32], sizes = [8, 32], strides = [1, 1]} : vector<8x128xf32> to vector<8x32xf32>
    %415 = vector.extract_strided_slice %405 {offsets = [0, 32], sizes = [8, 32], strides = [1, 1]} : vector<8x128xf32> to vector<8x32xf32>
    %416 = arith.addf %414, %415 : vector<8x32xf32>
    %417 = arith.negf %416 : vector<8x32xf32>
    %418 = math.exp %417 : vector<8x32xf32>
    %cst_87 = arith.constant 1.000000e+00 : f32
    %419 = vector.broadcast %cst_87 : f32 to vector<8x32xf32>
    %420 = arith.addf %419, %418 : vector<8x32xf32>
    %421 = arith.divf %419, %420 : vector<8x32xf32>
    %422 = vector.extract_strided_slice %402 {offsets = [0, 64], sizes = [8, 32], strides = [1, 1]} : vector<8x128xf32> to vector<8x32xf32>
    %423 = vector.extract_strided_slice %405 {offsets = [0, 64], sizes = [8, 32], strides = [1, 1]} : vector<8x128xf32> to vector<8x32xf32>
    %424 = arith.mulf %413, %423 : vector<8x32xf32>
    %425 = arith.addf %422, %424 : vector<8x32xf32>
    %426 = math.tanh %425 : vector<8x32xf32>
    %cst_88 = arith.constant 1.000000e+00 : f32
    %427 = vector.broadcast %cst_88 : f32 to vector<8x32xf32>
    %428 = arith.subf %427, %421 : vector<8x32xf32>
    %429 = arith.mulf %428, %426 : vector<8x32xf32>
    %430 = arith.mulf %421, %401 : vector<8x32xf32>
    %431 = arith.addf %429, %430 : vector<8x32xf32>
    %432 = vector.extract_strided_slice %277 {offsets = [40, 0], sizes = [8, 128], strides = [1, 1]} : vector<64x128xf32> to vector<8x128xf32>
    %cst_89 = arith.constant dense<0.000000e+00> : vector<8x128xf32>
    %433 = tpu.matmul %431, %279, %cst_89 {dimension_numbers = #tpu.dot_dimension_numbers<[1], [0], [0], [1], [0, 0, 1, 1], [], []>} : vector<8x32xf32>, vector<32x128xf32>, vector<8x128xf32> -> vector<8x128xf32>
    %434 = vector.broadcast %281 : vector<1x128xf32> to vector<8x128xf32>
    %435 = arith.addf %433, %434 : vector<8x128xf32>
    %436 = vector.extract_strided_slice %432 {offsets = [0, 0], sizes = [8, 32], strides = [1, 1]} : vector<8x128xf32> to vector<8x32xf32>
    %437 = vector.extract_strided_slice %435 {offsets = [0, 0], sizes = [8, 32], strides = [1, 1]} : vector<8x128xf32> to vector<8x32xf32>
    %438 = arith.addf %436, %437 : vector<8x32xf32>
    %439 = arith.negf %438 : vector<8x32xf32>
    %440 = math.exp %439 : vector<8x32xf32>
    %cst_90 = arith.constant 1.000000e+00 : f32
    %441 = vector.broadcast %cst_90 : f32 to vector<8x32xf32>
    %442 = arith.addf %441, %440 : vector<8x32xf32>
    %443 = arith.divf %441, %442 : vector<8x32xf32>
    %444 = vector.extract_strided_slice %432 {offsets = [0, 32], sizes = [8, 32], strides = [1, 1]} : vector<8x128xf32> to vector<8x32xf32>
    %445 = vector.extract_strided_slice %435 {offsets = [0, 32], sizes = [8, 32], strides = [1, 1]} : vector<8x128xf32> to vector<8x32xf32>
    %446 = arith.addf %444, %445 : vector<8x32xf32>
    %447 = arith.negf %446 : vector<8x32xf32>
    %448 = math.exp %447 : vector<8x32xf32>
    %cst_91 = arith.constant 1.000000e+00 : f32
    %449 = vector.broadcast %cst_91 : f32 to vector<8x32xf32>
    %450 = arith.addf %449, %448 : vector<8x32xf32>
    %451 = arith.divf %449, %450 : vector<8x32xf32>
    %452 = vector.extract_strided_slice %432 {offsets = [0, 64], sizes = [8, 32], strides = [1, 1]} : vector<8x128xf32> to vector<8x32xf32>
    %453 = vector.extract_strided_slice %435 {offsets = [0, 64], sizes = [8, 32], strides = [1, 1]} : vector<8x128xf32> to vector<8x32xf32>
    %454 = arith.mulf %443, %453 : vector<8x32xf32>
    %455 = arith.addf %452, %454 : vector<8x32xf32>
    %456 = math.tanh %455 : vector<8x32xf32>
    %cst_92 = arith.constant 1.000000e+00 : f32
    %457 = vector.broadcast %cst_92 : f32 to vector<8x32xf32>
    %458 = arith.subf %457, %451 : vector<8x32xf32>
    %459 = arith.mulf %458, %456 : vector<8x32xf32>
    %460 = arith.mulf %451, %431 : vector<8x32xf32>
    %461 = arith.addf %459, %460 : vector<8x32xf32>
    %462 = vector.extract_strided_slice %277 {offsets = [48, 0], sizes = [8, 128], strides = [1, 1]} : vector<64x128xf32> to vector<8x128xf32>
    %cst_93 = arith.constant dense<0.000000e+00> : vector<8x128xf32>
    %463 = tpu.matmul %461, %279, %cst_93 {dimension_numbers = #tpu.dot_dimension_numbers<[1], [0], [0], [1], [0, 0, 1, 1], [], []>} : vector<8x32xf32>, vector<32x128xf32>, vector<8x128xf32> -> vector<8x128xf32>
    %464 = vector.broadcast %281 : vector<1x128xf32> to vector<8x128xf32>
    %465 = arith.addf %463, %464 : vector<8x128xf32>
    %466 = vector.extract_strided_slice %462 {offsets = [0, 0], sizes = [8, 32], strides = [1, 1]} : vector<8x128xf32> to vector<8x32xf32>
    %467 = vector.extract_strided_slice %465 {offsets = [0, 0], sizes = [8, 32], strides = [1, 1]} : vector<8x128xf32> to vector<8x32xf32>
    %468 = arith.addf %466, %467 : vector<8x32xf32>
    %469 = arith.negf %468 : vector<8x32xf32>
    %470 = math.exp %469 : vector<8x32xf32>
    %cst_94 = arith.constant 1.000000e+00 : f32
    %471 = vector.broadcast %cst_94 : f32 to vector<8x32xf32>
    %472 = arith.addf %471, %470 : vector<8x32xf32>
    %473 = arith.divf %471, %472 : vector<8x32xf32>
    %474 = vector.extract_strided_slice %462 {offsets = [0, 32], sizes = [8, 32], strides = [1, 1]} : vector<8x128xf32> to vector<8x32xf32>
    %475 = vector.extract_strided_slice %465 {offsets = [0, 32], sizes = [8, 32], strides = [1, 1]} : vector<8x128xf32> to vector<8x32xf32>
    %476 = arith.addf %474, %475 : vector<8x32xf32>
    %477 = arith.negf %476 : vector<8x32xf32>
    %478 = math.exp %477 : vector<8x32xf32>
    %cst_95 = arith.constant 1.000000e+00 : f32
    %479 = vector.broadcast %cst_95 : f32 to vector<8x32xf32>
    %480 = arith.addf %479, %478 : vector<8x32xf32>
    %481 = arith.divf %479, %480 : vector<8x32xf32>
    %482 = vector.extract_strided_slice %462 {offsets = [0, 64], sizes = [8, 32], strides = [1, 1]} : vector<8x128xf32> to vector<8x32xf32>
    %483 = vector.extract_strided_slice %465 {offsets = [0, 64], sizes = [8, 32], strides = [1, 1]} : vector<8x128xf32> to vector<8x32xf32>
    %484 = arith.mulf %473, %483 : vector<8x32xf32>
    %485 = arith.addf %482, %484 : vector<8x32xf32>
    %486 = math.tanh %485 : vector<8x32xf32>
    %cst_96 = arith.constant 1.000000e+00 : f32
    %487 = vector.broadcast %cst_96 : f32 to vector<8x32xf32>
    %488 = arith.subf %487, %481 : vector<8x32xf32>
    %489 = arith.mulf %488, %486 : vector<8x32xf32>
    %490 = arith.mulf %481, %461 : vector<8x32xf32>
    %491 = arith.addf %489, %490 : vector<8x32xf32>
    %492 = vector.extract_strided_slice %277 {offsets = [56, 0], sizes = [8, 128], strides = [1, 1]} : vector<64x128xf32> to vector<8x128xf32>
    %cst_97 = arith.constant dense<0.000000e+00> : vector<8x128xf32>
    %493 = tpu.matmul %491, %279, %cst_97 {dimension_numbers = #tpu.dot_dimension_numbers<[1], [0], [0], [1], [0, 0, 1, 1], [], []>} : vector<8x32xf32>, vector<32x128xf32>, vector<8x128xf32> -> vector<8x128xf32>
    %494 = vector.broadcast %281 : vector<1x128xf32> to vector<8x128xf32>
    %495 = arith.addf %493, %494 : vector<8x128xf32>
    %496 = vector.extract_strided_slice %492 {offsets = [0, 0], sizes = [8, 32], strides = [1, 1]} : vector<8x128xf32> to vector<8x32xf32>
    %497 = vector.extract_strided_slice %495 {offsets = [0, 0], sizes = [8, 32], strides = [1, 1]} : vector<8x128xf32> to vector<8x32xf32>
    %498 = arith.addf %496, %497 : vector<8x32xf32>
    %499 = arith.negf %498 : vector<8x32xf32>
    %500 = math.exp %499 : vector<8x32xf32>
    %cst_98 = arith.constant 1.000000e+00 : f32
    %501 = vector.broadcast %cst_98 : f32 to vector<8x32xf32>
    %502 = arith.addf %501, %500 : vector<8x32xf32>
    %503 = arith.divf %501, %502 : vector<8x32xf32>
    %504 = vector.extract_strided_slice %492 {offsets = [0, 32], sizes = [8, 32], strides = [1, 1]} : vector<8x128xf32> to vector<8x32xf32>
    %505 = vector.extract_strided_slice %495 {offsets = [0, 32], sizes = [8, 32], strides = [1, 1]} : vector<8x128xf32> to vector<8x32xf32>
    %506 = arith.addf %504, %505 : vector<8x32xf32>
    %507 = arith.negf %506 : vector<8x32xf32>
    %508 = math.exp %507 : vector<8x32xf32>
    %cst_99 = arith.constant 1.000000e+00 : f32
    %509 = vector.broadcast %cst_99 : f32 to vector<8x32xf32>
    %510 = arith.addf %509, %508 : vector<8x32xf32>
    %511 = arith.divf %509, %510 : vector<8x32xf32>
    %512 = vector.extract_strided_slice %492 {offsets = [0, 64], sizes = [8, 32], strides = [1, 1]} : vector<8x128xf32> to vector<8x32xf32>
    %513 = vector.extract_strided_slice %495 {offsets = [0, 64], sizes = [8, 32], strides = [1, 1]} : vector<8x128xf32> to vector<8x32xf32>
    %514 = arith.mulf %503, %513 : vector<8x32xf32>
    %515 = arith.addf %512, %514 : vector<8x32xf32>
    %516 = math.tanh %515 : vector<8x32xf32>
    %cst_100 = arith.constant 1.000000e+00 : f32
    %517 = vector.broadcast %cst_100 : f32 to vector<8x32xf32>
    %518 = arith.subf %517, %511 : vector<8x32xf32>
    %519 = arith.mulf %518, %516 : vector<8x32xf32>
    %520 = arith.mulf %511, %491 : vector<8x32xf32>
    %521 = arith.addf %519, %520 : vector<8x32xf32>
    %c0_101 = arith.constant 0 : index
    %c0_102 = arith.constant 0 : index
    %522 = vector.load %arg5[%c0_101, %c0_102] : memref<32x128xf32, #tpu.memory_space<vmem>>, vector<32x128xf32>
    %cst_103 = arith.constant dense<0.000000e+00> : vector<8x128xf32>
    %523 = tpu.matmul %521, %522, %cst_103 {dimension_numbers = #tpu.dot_dimension_numbers<[1], [0], [0], [1], [0, 0, 1, 1], [], []>} : vector<8x32xf32>, vector<32x128xf32>, vector<8x128xf32> -> vector<8x128xf32>
    %c0_104 = arith.constant 0 : index
    %c0_105 = arith.constant 0 : index
    %524 = vector.load %arg4[%c0_104, %c0_105] : memref<16x128xf32, #tpu.memory_space<vmem>>, vector<16x128xf32>
    %cst_106 = arith.constant dense<0.000000e+00> : vector<64x128xf32>
    %525 = tpu.matmul %11, %524, %cst_106 {dimension_numbers = #tpu.dot_dimension_numbers<[1], [0], [0], [1], [0, 0, 1, 1], [], []>} : vector<64x16xf32>, vector<16x128xf32>, vector<64x128xf32> -> vector<64x128xf32>
    %c2 = arith.constant 2 : index
    %c0_107 = arith.constant 0 : index
    %c0_108 = arith.constant 0 : index
    %526 = vector.load %arg8[%c2, %c0_107, %c0_108] : memref<4x1x128xf32, #tpu.memory_space<vmem>>, vector<1x1x128xf32>
    %527 = vector.shape_cast %526 : vector<1x1x128xf32> to vector<1x128xf32>
    %528 = vector.broadcast %527 : vector<1x128xf32> to vector<64x128xf32>
    %529 = arith.addf %525, %528 : vector<64x128xf32>
    %c2_109 = arith.constant 2 : index
    %c0_110 = arith.constant 0 : index
    %c0_111 = arith.constant 0 : index
    %530 = vector.load %arg7[%c2_109, %c0_110, %c0_111] : memref<4x32x128xf32, #tpu.memory_space<vmem>>, vector<1x32x128xf32>
    %531 = vector.shape_cast %530 : vector<1x32x128xf32> to vector<32x128xf32>
    %c2_112 = arith.constant 2 : index
    %c0_113 = arith.constant 0 : index
    %c0_114 = arith.constant 0 : index
    %532 = vector.load %arg9[%c2_112, %c0_113, %c0_114] : memref<4x1x128xf32, #tpu.memory_space<vmem>>, vector<1x1x128xf32>
    %533 = vector.shape_cast %532 : vector<1x1x128xf32> to vector<1x128xf32>
    %534 = vector.extract_strided_slice %529 {offsets = [0, 0], sizes = [8, 128], strides = [1, 1]} : vector<64x128xf32> to vector<8x128xf32>
    %535 = arith.addf %534, %523 : vector<8x128xf32>
    %cst_115 = arith.constant dense<0.000000e+00> : vector<8x128xf32>
    %536 = tpu.matmul %269, %531, %cst_115 {dimension_numbers = #tpu.dot_dimension_numbers<[1], [0], [0], [1], [0, 0, 1, 1], [], []>} : vector<8x32xf32>, vector<32x128xf32>, vector<8x128xf32> -> vector<8x128xf32>
    %537 = vector.broadcast %533 : vector<1x128xf32> to vector<8x128xf32>
    %538 = arith.addf %536, %537 : vector<8x128xf32>
    %539 = vector.extract_strided_slice %535 {offsets = [0, 0], sizes = [8, 32], strides = [1, 1]} : vector<8x128xf32> to vector<8x32xf32>
    %540 = vector.extract_strided_slice %538 {offsets = [0, 0], sizes = [8, 32], strides = [1, 1]} : vector<8x128xf32> to vector<8x32xf32>
    %541 = arith.addf %539, %540 : vector<8x32xf32>
    %542 = arith.negf %541 : vector<8x32xf32>
    %543 = math.exp %542 : vector<8x32xf32>
    %cst_116 = arith.constant 1.000000e+00 : f32
    %544 = vector.broadcast %cst_116 : f32 to vector<8x32xf32>
    %545 = arith.addf %544, %543 : vector<8x32xf32>
    %546 = arith.divf %544, %545 : vector<8x32xf32>
    %547 = vector.extract_strided_slice %535 {offsets = [0, 32], sizes = [8, 32], strides = [1, 1]} : vector<8x128xf32> to vector<8x32xf32>
    %548 = vector.extract_strided_slice %538 {offsets = [0, 32], sizes = [8, 32], strides = [1, 1]} : vector<8x128xf32> to vector<8x32xf32>
    %549 = arith.addf %547, %548 : vector<8x32xf32>
    %550 = arith.negf %549 : vector<8x32xf32>
    %551 = math.exp %550 : vector<8x32xf32>
    %cst_117 = arith.constant 1.000000e+00 : f32
    %552 = vector.broadcast %cst_117 : f32 to vector<8x32xf32>
    %553 = arith.addf %552, %551 : vector<8x32xf32>
    %554 = arith.divf %552, %553 : vector<8x32xf32>
    %555 = vector.extract_strided_slice %535 {offsets = [0, 64], sizes = [8, 32], strides = [1, 1]} : vector<8x128xf32> to vector<8x32xf32>
    %556 = vector.extract_strided_slice %538 {offsets = [0, 64], sizes = [8, 32], strides = [1, 1]} : vector<8x128xf32> to vector<8x32xf32>
    %557 = arith.mulf %546, %556 : vector<8x32xf32>
    %558 = arith.addf %555, %557 : vector<8x32xf32>
    %559 = math.tanh %558 : vector<8x32xf32>
    %cst_118 = arith.constant 1.000000e+00 : f32
    %560 = vector.broadcast %cst_118 : f32 to vector<8x32xf32>
    %561 = arith.subf %560, %554 : vector<8x32xf32>
    %562 = arith.mulf %561, %559 : vector<8x32xf32>
    %563 = arith.mulf %554, %269 : vector<8x32xf32>
    %564 = arith.addf %562, %563 : vector<8x32xf32>
    %c0_119 = arith.constant 0 : index
    %c0_120 = arith.constant 0 : index
    %565 = vector.load %arg15[%c0_119, %c0_120] : memref<64x32xf32, #tpu.memory_space<vmem>>, vector<8x32xf32>
    tpu.vector_store %arg15[%c0_119, %c0_120], %564 {strides = array<i32>} : memref<64x32xf32, #tpu.memory_space<vmem>>, vector<8x32xf32>,
    %566 = vector.extract_strided_slice %529 {offsets = [8, 0], sizes = [8, 128], strides = [1, 1]} : vector<64x128xf32> to vector<8x128xf32>
    %567 = arith.addf %566, %523 : vector<8x128xf32>
    %cst_121 = arith.constant dense<0.000000e+00> : vector<8x128xf32>
    %568 = tpu.matmul %564, %531, %cst_121 {dimension_numbers = #tpu.dot_dimension_numbers<[1], [0], [0], [1], [0, 0, 1, 1], [], []>} : vector<8x32xf32>, vector<32x128xf32>, vector<8x128xf32> -> vector<8x128xf32>
    %569 = vector.broadcast %533 : vector<1x128xf32> to vector<8x128xf32>
    %570 = arith.addf %568, %569 : vector<8x128xf32>
    %571 = vector.extract_strided_slice %567 {offsets = [0, 0], sizes = [8, 32], strides = [1, 1]} : vector<8x128xf32> to vector<8x32xf32>
    %572 = vector.extract_strided_slice %570 {offsets = [0, 0], sizes = [8, 32], strides = [1, 1]} : vector<8x128xf32> to vector<8x32xf32>
    %573 = arith.addf %571, %572 : vector<8x32xf32>
    %574 = arith.negf %573 : vector<8x32xf32>
    %575 = math.exp %574 : vector<8x32xf32>
    %cst_122 = arith.constant 1.000000e+00 : f32
    %576 = vector.broadcast %cst_122 : f32 to vector<8x32xf32>
    %577 = arith.addf %576, %575 : vector<8x32xf32>
    %578 = arith.divf %576, %577 : vector<8x32xf32>
    %579 = vector.extract_strided_slice %567 {offsets = [0, 32], sizes = [8, 32], strides = [1, 1]} : vector<8x128xf32> to vector<8x32xf32>
    %580 = vector.extract_strided_slice %570 {offsets = [0, 32], sizes = [8, 32], strides = [1, 1]} : vector<8x128xf32> to vector<8x32xf32>
    %581 = arith.addf %579, %580 : vector<8x32xf32>
    %582 = arith.negf %581 : vector<8x32xf32>
    %583 = math.exp %582 : vector<8x32xf32>
    %cst_123 = arith.constant 1.000000e+00 : f32
    %584 = vector.broadcast %cst_123 : f32 to vector<8x32xf32>
    %585 = arith.addf %584, %583 : vector<8x32xf32>
    %586 = arith.divf %584, %585 : vector<8x32xf32>
    %587 = vector.extract_strided_slice %567 {offsets = [0, 64], sizes = [8, 32], strides = [1, 1]} : vector<8x128xf32> to vector<8x32xf32>
    %588 = vector.extract_strided_slice %570 {offsets = [0, 64], sizes = [8, 32], strides = [1, 1]} : vector<8x128xf32> to vector<8x32xf32>
    %589 = arith.mulf %578, %588 : vector<8x32xf32>
    %590 = arith.addf %587, %589 : vector<8x32xf32>
    %591 = math.tanh %590 : vector<8x32xf32>
    %cst_124 = arith.constant 1.000000e+00 : f32
    %592 = vector.broadcast %cst_124 : f32 to vector<8x32xf32>
    %593 = arith.subf %592, %586 : vector<8x32xf32>
    %594 = arith.mulf %593, %591 : vector<8x32xf32>
    %595 = arith.mulf %586, %564 : vector<8x32xf32>
    %596 = arith.addf %594, %595 : vector<8x32xf32>
    %c8_125 = arith.constant 8 : index
    %c0_126 = arith.constant 0 : index
    %597 = vector.load %arg15[%c8_125, %c0_126] : memref<64x32xf32, #tpu.memory_space<vmem>>, vector<8x32xf32>
    tpu.vector_store %arg15[%c8_125, %c0_126], %596 {strides = array<i32>} : memref<64x32xf32, #tpu.memory_space<vmem>>, vector<8x32xf32>,
    %598 = vector.extract_strided_slice %529 {offsets = [16, 0], sizes = [8, 128], strides = [1, 1]} : vector<64x128xf32> to vector<8x128xf32>
    %599 = arith.addf %598, %523 : vector<8x128xf32>
    %cst_127 = arith.constant dense<0.000000e+00> : vector<8x128xf32>
    %600 = tpu.matmul %596, %531, %cst_127 {dimension_numbers = #tpu.dot_dimension_numbers<[1], [0], [0], [1], [0, 0, 1, 1], [], []>} : vector<8x32xf32>, vector<32x128xf32>, vector<8x128xf32> -> vector<8x128xf32>
    %601 = vector.broadcast %533 : vector<1x128xf32> to vector<8x128xf32>
    %602 = arith.addf %600, %601 : vector<8x128xf32>
    %603 = vector.extract_strided_slice %599 {offsets = [0, 0], sizes = [8, 32], strides = [1, 1]} : vector<8x128xf32> to vector<8x32xf32>
    %604 = vector.extract_strided_slice %602 {offsets = [0, 0], sizes = [8, 32], strides = [1, 1]} : vector<8x128xf32> to vector<8x32xf32>
    %605 = arith.addf %603, %604 : vector<8x32xf32>
    %606 = arith.negf %605 : vector<8x32xf32>
    %607 = math.exp %606 : vector<8x32xf32>
    %cst_128 = arith.constant 1.000000e+00 : f32
    %608 = vector.broadcast %cst_128 : f32 to vector<8x32xf32>
    %609 = arith.addf %608, %607 : vector<8x32xf32>
    %610 = arith.divf %608, %609 : vector<8x32xf32>
    %611 = vector.extract_strided_slice %599 {offsets = [0, 32], sizes = [8, 32], strides = [1, 1]} : vector<8x128xf32> to vector<8x32xf32>
    %612 = vector.extract_strided_slice %602 {offsets = [0, 32], sizes = [8, 32], strides = [1, 1]} : vector<8x128xf32> to vector<8x32xf32>
    %613 = arith.addf %611, %612 : vector<8x32xf32>
    %614 = arith.negf %613 : vector<8x32xf32>
    %615 = math.exp %614 : vector<8x32xf32>
    %cst_129 = arith.constant 1.000000e+00 : f32
    %616 = vector.broadcast %cst_129 : f32 to vector<8x32xf32>
    %617 = arith.addf %616, %615 : vector<8x32xf32>
    %618 = arith.divf %616, %617 : vector<8x32xf32>
    %619 = vector.extract_strided_slice %599 {offsets = [0, 64], sizes = [8, 32], strides = [1, 1]} : vector<8x128xf32> to vector<8x32xf32>
    %620 = vector.extract_strided_slice %602 {offsets = [0, 64], sizes = [8, 32], strides = [1, 1]} : vector<8x128xf32> to vector<8x32xf32>
    %621 = arith.mulf %610, %620 : vector<8x32xf32>
    %622 = arith.addf %619, %621 : vector<8x32xf32>
    %623 = math.tanh %622 : vector<8x32xf32>
    %cst_130 = arith.constant 1.000000e+00 : f32
    %624 = vector.broadcast %cst_130 : f32 to vector<8x32xf32>
    %625 = arith.subf %624, %618 : vector<8x32xf32>
    %626 = arith.mulf %625, %623 : vector<8x32xf32>
    %627 = arith.mulf %618, %596 : vector<8x32xf32>
    %628 = arith.addf %626, %627 : vector<8x32xf32>
    %c16_131 = arith.constant 16 : index
    %c0_132 = arith.constant 0 : index
    %629 = vector.load %arg15[%c16_131, %c0_132] : memref<64x32xf32, #tpu.memory_space<vmem>>, vector<8x32xf32>
    tpu.vector_store %arg15[%c16_131, %c0_132], %628 {strides = array<i32>} : memref<64x32xf32, #tpu.memory_space<vmem>>, vector<8x32xf32>,
    %630 = vector.extract_strided_slice %529 {offsets = [24, 0], sizes = [8, 128], strides = [1, 1]} : vector<64x128xf32> to vector<8x128xf32>
    %631 = arith.addf %630, %523 : vector<8x128xf32>
    %cst_133 = arith.constant dense<0.000000e+00> : vector<8x128xf32>
    %632 = tpu.matmul %628, %531, %cst_133 {dimension_numbers = #tpu.dot_dimension_numbers<[1], [0], [0], [1], [0, 0, 1, 1], [], []>} : vector<8x32xf32>, vector<32x128xf32>, vector<8x128xf32> -> vector<8x128xf32>
    %633 = vector.broadcast %533 : vector<1x128xf32> to vector<8x128xf32>
    %634 = arith.addf %632, %633 : vector<8x128xf32>
    %635 = vector.extract_strided_slice %631 {offsets = [0, 0], sizes = [8, 32], strides = [1, 1]} : vector<8x128xf32> to vector<8x32xf32>
    %636 = vector.extract_strided_slice %634 {offsets = [0, 0], sizes = [8, 32], strides = [1, 1]} : vector<8x128xf32> to vector<8x32xf32>
    %637 = arith.addf %635, %636 : vector<8x32xf32>
    %638 = arith.negf %637 : vector<8x32xf32>
    %639 = math.exp %638 : vector<8x32xf32>
    %cst_134 = arith.constant 1.000000e+00 : f32
    %640 = vector.broadcast %cst_134 : f32 to vector<8x32xf32>
    %641 = arith.addf %640, %639 : vector<8x32xf32>
    %642 = arith.divf %640, %641 : vector<8x32xf32>
    %643 = vector.extract_strided_slice %631 {offsets = [0, 32], sizes = [8, 32], strides = [1, 1]} : vector<8x128xf32> to vector<8x32xf32>
    %644 = vector.extract_strided_slice %634 {offsets = [0, 32], sizes = [8, 32], strides = [1, 1]} : vector<8x128xf32> to vector<8x32xf32>
    %645 = arith.addf %643, %644 : vector<8x32xf32>
    %646 = arith.negf %645 : vector<8x32xf32>
    %647 = math.exp %646 : vector<8x32xf32>
    %cst_135 = arith.constant 1.000000e+00 : f32
    %648 = vector.broadcast %cst_135 : f32 to vector<8x32xf32>
    %649 = arith.addf %648, %647 : vector<8x32xf32>
    %650 = arith.divf %648, %649 : vector<8x32xf32>
    %651 = vector.extract_strided_slice %631 {offsets = [0, 64], sizes = [8, 32], strides = [1, 1]} : vector<8x128xf32> to vector<8x32xf32>
    %652 = vector.extract_strided_slice %634 {offsets = [0, 64], sizes = [8, 32], strides = [1, 1]} : vector<8x128xf32> to vector<8x32xf32>
    %653 = arith.mulf %642, %652 : vector<8x32xf32>
    %654 = arith.addf %651, %653 : vector<8x32xf32>
    %655 = math.tanh %654 : vector<8x32xf32>
    %cst_136 = arith.constant 1.000000e+00 : f32
    %656 = vector.broadcast %cst_136 : f32 to vector<8x32xf32>
    %657 = arith.subf %656, %650 : vector<8x32xf32>
    %658 = arith.mulf %657, %655 : vector<8x32xf32>
    %659 = arith.mulf %650, %628 : vector<8x32xf32>
    %660 = arith.addf %658, %659 : vector<8x32xf32>
    %c24_137 = arith.constant 24 : index
    %c0_138 = arith.constant 0 : index
    %661 = vector.load %arg15[%c24_137, %c0_138] : memref<64x32xf32, #tpu.memory_space<vmem>>, vector<8x32xf32>
    tpu.vector_store %arg15[%c24_137, %c0_138], %660 {strides = array<i32>} : memref<64x32xf32, #tpu.memory_space<vmem>>, vector<8x32xf32>,
    %662 = vector.extract_strided_slice %529 {offsets = [32, 0], sizes = [8, 128], strides = [1, 1]} : vector<64x128xf32> to vector<8x128xf32>
    %663 = arith.addf %662, %523 : vector<8x128xf32>
    %cst_139 = arith.constant dense<0.000000e+00> : vector<8x128xf32>
    %664 = tpu.matmul %660, %531, %cst_139 {dimension_numbers = #tpu.dot_dimension_numbers<[1], [0], [0], [1], [0, 0, 1, 1], [], []>} : vector<8x32xf32>, vector<32x128xf32>, vector<8x128xf32> -> vector<8x128xf32>
    %665 = vector.broadcast %533 : vector<1x128xf32> to vector<8x128xf32>
    %666 = arith.addf %664, %665 : vector<8x128xf32>
    %667 = vector.extract_strided_slice %663 {offsets = [0, 0], sizes = [8, 32], strides = [1, 1]} : vector<8x128xf32> to vector<8x32xf32>
    %668 = vector.extract_strided_slice %666 {offsets = [0, 0], sizes = [8, 32], strides = [1, 1]} : vector<8x128xf32> to vector<8x32xf32>
    %669 = arith.addf %667, %668 : vector<8x32xf32>
    %670 = arith.negf %669 : vector<8x32xf32>
    %671 = math.exp %670 : vector<8x32xf32>
    %cst_140 = arith.constant 1.000000e+00 : f32
    %672 = vector.broadcast %cst_140 : f32 to vector<8x32xf32>
    %673 = arith.addf %672, %671 : vector<8x32xf32>
    %674 = arith.divf %672, %673 : vector<8x32xf32>
    %675 = vector.extract_strided_slice %663 {offsets = [0, 32], sizes = [8, 32], strides = [1, 1]} : vector<8x128xf32> to vector<8x32xf32>
    %676 = vector.extract_strided_slice %666 {offsets = [0, 32], sizes = [8, 32], strides = [1, 1]} : vector<8x128xf32> to vector<8x32xf32>
    %677 = arith.addf %675, %676 : vector<8x32xf32>
    %678 = arith.negf %677 : vector<8x32xf32>
    %679 = math.exp %678 : vector<8x32xf32>
    %cst_141 = arith.constant 1.000000e+00 : f32
    %680 = vector.broadcast %cst_141 : f32 to vector<8x32xf32>
    %681 = arith.addf %680, %679 : vector<8x32xf32>
    %682 = arith.divf %680, %681 : vector<8x32xf32>
    %683 = vector.extract_strided_slice %663 {offsets = [0, 64], sizes = [8, 32], strides = [1, 1]} : vector<8x128xf32> to vector<8x32xf32>
    %684 = vector.extract_strided_slice %666 {offsets = [0, 64], sizes = [8, 32], strides = [1, 1]} : vector<8x128xf32> to vector<8x32xf32>
    %685 = arith.mulf %674, %684 : vector<8x32xf32>
    %686 = arith.addf %683, %685 : vector<8x32xf32>
    %687 = math.tanh %686 : vector<8x32xf32>
    %cst_142 = arith.constant 1.000000e+00 : f32
    %688 = vector.broadcast %cst_142 : f32 to vector<8x32xf32>
    %689 = arith.subf %688, %682 : vector<8x32xf32>
    %690 = arith.mulf %689, %687 : vector<8x32xf32>
    %691 = arith.mulf %682, %660 : vector<8x32xf32>
    %692 = arith.addf %690, %691 : vector<8x32xf32>
    %c32_143 = arith.constant 32 : index
    %c0_144 = arith.constant 0 : index
    %693 = vector.load %arg15[%c32_143, %c0_144] : memref<64x32xf32, #tpu.memory_space<vmem>>, vector<8x32xf32>
    tpu.vector_store %arg15[%c32_143, %c0_144], %692 {strides = array<i32>} : memref<64x32xf32, #tpu.memory_space<vmem>>, vector<8x32xf32>,
    %694 = vector.extract_strided_slice %529 {offsets = [40, 0], sizes = [8, 128], strides = [1, 1]} : vector<64x128xf32> to vector<8x128xf32>
    %695 = arith.addf %694, %523 : vector<8x128xf32>
    %cst_145 = arith.constant dense<0.000000e+00> : vector<8x128xf32>
    %696 = tpu.matmul %692, %531, %cst_145 {dimension_numbers = #tpu.dot_dimension_numbers<[1], [0], [0], [1], [0, 0, 1, 1], [], []>} : vector<8x32xf32>, vector<32x128xf32>, vector<8x128xf32> -> vector<8x128xf32>
    %697 = vector.broadcast %533 : vector<1x128xf32> to vector<8x128xf32>
    %698 = arith.addf %696, %697 : vector<8x128xf32>
    %699 = vector.extract_strided_slice %695 {offsets = [0, 0], sizes = [8, 32], strides = [1, 1]} : vector<8x128xf32> to vector<8x32xf32>
    %700 = vector.extract_strided_slice %698 {offsets = [0, 0], sizes = [8, 32], strides = [1, 1]} : vector<8x128xf32> to vector<8x32xf32>
    %701 = arith.addf %699, %700 : vector<8x32xf32>
    %702 = arith.negf %701 : vector<8x32xf32>
    %703 = math.exp %702 : vector<8x32xf32>
    %cst_146 = arith.constant 1.000000e+00 : f32
    %704 = vector.broadcast %cst_146 : f32 to vector<8x32xf32>
    %705 = arith.addf %704, %703 : vector<8x32xf32>
    %706 = arith.divf %704, %705 : vector<8x32xf32>
    %707 = vector.extract_strided_slice %695 {offsets = [0, 32], sizes = [8, 32], strides = [1, 1]} : vector<8x128xf32> to vector<8x32xf32>
    %708 = vector.extract_strided_slice %698 {offsets = [0, 32], sizes = [8, 32], strides = [1, 1]} : vector<8x128xf32> to vector<8x32xf32>
    %709 = arith.addf %707, %708 : vector<8x32xf32>
    %710 = arith.negf %709 : vector<8x32xf32>
    %711 = math.exp %710 : vector<8x32xf32>
    %cst_147 = arith.constant 1.000000e+00 : f32
    %712 = vector.broadcast %cst_147 : f32 to vector<8x32xf32>
    %713 = arith.addf %712, %711 : vector<8x32xf32>
    %714 = arith.divf %712, %713 : vector<8x32xf32>
    %715 = vector.extract_strided_slice %695 {offsets = [0, 64], sizes = [8, 32], strides = [1, 1]} : vector<8x128xf32> to vector<8x32xf32>
    %716 = vector.extract_strided_slice %698 {offsets = [0, 64], sizes = [8, 32], strides = [1, 1]} : vector<8x128xf32> to vector<8x32xf32>
    %717 = arith.mulf %706, %716 : vector<8x32xf32>
    %718 = arith.addf %715, %717 : vector<8x32xf32>
    %719 = math.tanh %718 : vector<8x32xf32>
    %cst_148 = arith.constant 1.000000e+00 : f32
    %720 = vector.broadcast %cst_148 : f32 to vector<8x32xf32>
    %721 = arith.subf %720, %714 : vector<8x32xf32>
    %722 = arith.mulf %721, %719 : vector<8x32xf32>
    %723 = arith.mulf %714, %692 : vector<8x32xf32>
    %724 = arith.addf %722, %723 : vector<8x32xf32>
    %c40_149 = arith.constant 40 : index
    %c0_150 = arith.constant 0 : index
    %725 = vector.load %arg15[%c40_149, %c0_150] : memref<64x32xf32, #tpu.memory_space<vmem>>, vector<8x32xf32>
    tpu.vector_store %arg15[%c40_149, %c0_150], %724 {strides = array<i32>} : memref<64x32xf32, #tpu.memory_space<vmem>>, vector<8x32xf32>,
    %726 = vector.extract_strided_slice %529 {offsets = [48, 0], sizes = [8, 128], strides = [1, 1]} : vector<64x128xf32> to vector<8x128xf32>
    %727 = arith.addf %726, %523 : vector<8x128xf32>
    %cst_151 = arith.constant dense<0.000000e+00> : vector<8x128xf32>
    %728 = tpu.matmul %724, %531, %cst_151 {dimension_numbers = #tpu.dot_dimension_numbers<[1], [0], [0], [1], [0, 0, 1, 1], [], []>} : vector<8x32xf32>, vector<32x128xf32>, vector<8x128xf32> -> vector<8x128xf32>
    %729 = vector.broadcast %533 : vector<1x128xf32> to vector<8x128xf32>
    %730 = arith.addf %728, %729 : vector<8x128xf32>
    %731 = vector.extract_strided_slice %727 {offsets = [0, 0], sizes = [8, 32], strides = [1, 1]} : vector<8x128xf32> to vector<8x32xf32>
    %732 = vector.extract_strided_slice %730 {offsets = [0, 0], sizes = [8, 32], strides = [1, 1]} : vector<8x128xf32> to vector<8x32xf32>
    %733 = arith.addf %731, %732 : vector<8x32xf32>
    %734 = arith.negf %733 : vector<8x32xf32>
    %735 = math.exp %734 : vector<8x32xf32>
    %cst_152 = arith.constant 1.000000e+00 : f32
    %736 = vector.broadcast %cst_152 : f32 to vector<8x32xf32>
    %737 = arith.addf %736, %735 : vector<8x32xf32>
    %738 = arith.divf %736, %737 : vector<8x32xf32>
    %739 = vector.extract_strided_slice %727 {offsets = [0, 32], sizes = [8, 32], strides = [1, 1]} : vector<8x128xf32> to vector<8x32xf32>
    %740 = vector.extract_strided_slice %730 {offsets = [0, 32], sizes = [8, 32], strides = [1, 1]} : vector<8x128xf32> to vector<8x32xf32>
    %741 = arith.addf %739, %740 : vector<8x32xf32>
    %742 = arith.negf %741 : vector<8x32xf32>
    %743 = math.exp %742 : vector<8x32xf32>
    %cst_153 = arith.constant 1.000000e+00 : f32
    %744 = vector.broadcast %cst_153 : f32 to vector<8x32xf32>
    %745 = arith.addf %744, %743 : vector<8x32xf32>
    %746 = arith.divf %744, %745 : vector<8x32xf32>
    %747 = vector.extract_strided_slice %727 {offsets = [0, 64], sizes = [8, 32], strides = [1, 1]} : vector<8x128xf32> to vector<8x32xf32>
    %748 = vector.extract_strided_slice %730 {offsets = [0, 64], sizes = [8, 32], strides = [1, 1]} : vector<8x128xf32> to vector<8x32xf32>
    %749 = arith.mulf %738, %748 : vector<8x32xf32>
    %750 = arith.addf %747, %749 : vector<8x32xf32>
    %751 = math.tanh %750 : vector<8x32xf32>
    %cst_154 = arith.constant 1.000000e+00 : f32
    %752 = vector.broadcast %cst_154 : f32 to vector<8x32xf32>
    %753 = arith.subf %752, %746 : vector<8x32xf32>
    %754 = arith.mulf %753, %751 : vector<8x32xf32>
    %755 = arith.mulf %746, %724 : vector<8x32xf32>
    %756 = arith.addf %754, %755 : vector<8x32xf32>
    %c48_155 = arith.constant 48 : index
    %c0_156 = arith.constant 0 : index
    %757 = vector.load %arg15[%c48_155, %c0_156] : memref<64x32xf32, #tpu.memory_space<vmem>>, vector<8x32xf32>
    tpu.vector_store %arg15[%c48_155, %c0_156], %756 {strides = array<i32>} : memref<64x32xf32, #tpu.memory_space<vmem>>, vector<8x32xf32>,
    %758 = vector.extract_strided_slice %529 {offsets = [56, 0], sizes = [8, 128], strides = [1, 1]} : vector<64x128xf32> to vector<8x128xf32>
    %759 = arith.addf %758, %523 : vector<8x128xf32>
    %cst_157 = arith.constant dense<0.000000e+00> : vector<8x128xf32>
    %760 = tpu.matmul %756, %531, %cst_157 {dimension_numbers = #tpu.dot_dimension_numbers<[1], [0], [0], [1], [0, 0, 1, 1], [], []>} : vector<8x32xf32>, vector<32x128xf32>, vector<8x128xf32> -> vector<8x128xf32>
    %761 = vector.broadcast %533 : vector<1x128xf32> to vector<8x128xf32>
    %762 = arith.addf %760, %761 : vector<8x128xf32>
    %763 = vector.extract_strided_slice %759 {offsets = [0, 0], sizes = [8, 32], strides = [1, 1]} : vector<8x128xf32> to vector<8x32xf32>
    %764 = vector.extract_strided_slice %762 {offsets = [0, 0], sizes = [8, 32], strides = [1, 1]} : vector<8x128xf32> to vector<8x32xf32>
    %765 = arith.addf %763, %764 : vector<8x32xf32>
    %766 = arith.negf %765 : vector<8x32xf32>
    %767 = math.exp %766 : vector<8x32xf32>
    %cst_158 = arith.constant 1.000000e+00 : f32
    %768 = vector.broadcast %cst_158 : f32 to vector<8x32xf32>
    %769 = arith.addf %768, %767 : vector<8x32xf32>
    %770 = arith.divf %768, %769 : vector<8x32xf32>
    %771 = vector.extract_strided_slice %759 {offsets = [0, 32], sizes = [8, 32], strides = [1, 1]} : vector<8x128xf32> to vector<8x32xf32>
    %772 = vector.extract_strided_slice %762 {offsets = [0, 32], sizes = [8, 32], strides = [1, 1]} : vector<8x128xf32> to vector<8x32xf32>
    %773 = arith.addf %771, %772 : vector<8x32xf32>
    %774 = arith.negf %773 : vector<8x32xf32>
    %775 = math.exp %774 : vector<8x32xf32>
    %cst_159 = arith.constant 1.000000e+00 : f32
    %776 = vector.broadcast %cst_159 : f32 to vector<8x32xf32>
    %777 = arith.addf %776, %775 : vector<8x32xf32>
    %778 = arith.divf %776, %777 : vector<8x32xf32>
    %779 = vector.extract_strided_slice %759 {offsets = [0, 64], sizes = [8, 32], strides = [1, 1]} : vector<8x128xf32> to vector<8x32xf32>
    %780 = vector.extract_strided_slice %762 {offsets = [0, 64], sizes = [8, 32], strides = [1, 1]} : vector<8x128xf32> to vector<8x32xf32>
    %781 = arith.mulf %770, %780 : vector<8x32xf32>
    %782 = arith.addf %779, %781 : vector<8x32xf32>
    %783 = math.tanh %782 : vector<8x32xf32>
    %cst_160 = arith.constant 1.000000e+00 : f32
    %784 = vector.broadcast %cst_160 : f32 to vector<8x32xf32>
    %785 = arith.subf %784, %778 : vector<8x32xf32>
    %786 = arith.mulf %785, %783 : vector<8x32xf32>
    %787 = arith.mulf %778, %756 : vector<8x32xf32>
    %788 = arith.addf %786, %787 : vector<8x32xf32>
    %c56_161 = arith.constant 56 : index
    %c0_162 = arith.constant 0 : index
    %789 = vector.load %arg15[%c56_161, %c0_162] : memref<64x32xf32, #tpu.memory_space<vmem>>, vector<8x32xf32>
    tpu.vector_store %arg15[%c56_161, %c0_162], %788 {strides = array<i32>} : memref<64x32xf32, #tpu.memory_space<vmem>>, vector<8x32xf32>,
    %c0_163 = arith.constant 0 : index
    %c0_164 = arith.constant 0 : index
    %790 = vector.load %arg15[%c0_163, %c0_164] : memref<64x32xf32, #tpu.memory_space<vmem>>, vector<64x32xf32>
    %c0_165 = arith.constant 0 : index
    %c0_166 = arith.constant 0 : index
    %791 = vector.load %arg6[%c0_165, %c0_166] : memref<32x128xf32, #tpu.memory_space<vmem>>, vector<32x128xf32>
    %cst_167 = arith.constant dense<0.000000e+00> : vector<64x128xf32>
    %792 = tpu.matmul %790, %791, %cst_167 {dimension_numbers = #tpu.dot_dimension_numbers<[1], [0], [0], [1], [0, 0, 1, 1], [], []>} : vector<64x32xf32>, vector<32x128xf32>, vector<64x128xf32> -> vector<64x128xf32>
    %c3 = arith.constant 3 : index
    %c0_168 = arith.constant 0 : index
    %c0_169 = arith.constant 0 : index
    %793 = vector.load %arg8[%c3, %c0_168, %c0_169] : memref<4x1x128xf32, #tpu.memory_space<vmem>>, vector<1x1x128xf32>
    %794 = vector.shape_cast %793 : vector<1x1x128xf32> to vector<1x128xf32>
    %795 = vector.broadcast %794 : vector<1x128xf32> to vector<64x128xf32>
    %796 = arith.addf %792, %795 : vector<64x128xf32>
    %c3_170 = arith.constant 3 : index
    %c0_171 = arith.constant 0 : index
    %c0_172 = arith.constant 0 : index
    %797 = vector.load %arg7[%c3_170, %c0_171, %c0_172] : memref<4x32x128xf32, #tpu.memory_space<vmem>>, vector<1x32x128xf32>
    %798 = vector.shape_cast %797 : vector<1x32x128xf32> to vector<32x128xf32>
    %c3_173 = arith.constant 3 : index
    %c0_174 = arith.constant 0 : index
    %c0_175 = arith.constant 0 : index
    %799 = vector.load %arg9[%c3_173, %c0_174, %c0_175] : memref<4x1x128xf32, #tpu.memory_space<vmem>>, vector<1x1x128xf32>
    %800 = vector.shape_cast %799 : vector<1x1x128xf32> to vector<1x128xf32>
    %801 = vector.extract_strided_slice %796 {offsets = [0, 0], sizes = [8, 128], strides = [1, 1]} : vector<64x128xf32> to vector<8x128xf32>
    %cst_176 = arith.constant dense<0.000000e+00> : vector<8x128xf32>
    %802 = tpu.matmul %521, %798, %cst_176 {dimension_numbers = #tpu.dot_dimension_numbers<[1], [0], [0], [1], [0, 0, 1, 1], [], []>} : vector<8x32xf32>, vector<32x128xf32>, vector<8x128xf32> -> vector<8x128xf32>
    %803 = vector.broadcast %800 : vector<1x128xf32> to vector<8x128xf32>
    %804 = arith.addf %802, %803 : vector<8x128xf32>
    %805 = vector.extract_strided_slice %801 {offsets = [0, 0], sizes = [8, 32], strides = [1, 1]} : vector<8x128xf32> to vector<8x32xf32>
    %806 = vector.extract_strided_slice %804 {offsets = [0, 0], sizes = [8, 32], strides = [1, 1]} : vector<8x128xf32> to vector<8x32xf32>
    %807 = arith.addf %805, %806 : vector<8x32xf32>
    %808 = arith.negf %807 : vector<8x32xf32>
    %809 = math.exp %808 : vector<8x32xf32>
    %cst_177 = arith.constant 1.000000e+00 : f32
    %810 = vector.broadcast %cst_177 : f32 to vector<8x32xf32>
    %811 = arith.addf %810, %809 : vector<8x32xf32>
    %812 = arith.divf %810, %811 : vector<8x32xf32>
    %813 = vector.extract_strided_slice %801 {offsets = [0, 32], sizes = [8, 32], strides = [1, 1]} : vector<8x128xf32> to vector<8x32xf32>
    %814 = vector.extract_strided_slice %804 {offsets = [0, 32], sizes = [8, 32], strides = [1, 1]} : vector<8x128xf32> to vector<8x32xf32>
    %815 = arith.addf %813, %814 : vector<8x32xf32>
    %816 = arith.negf %815 : vector<8x32xf32>
    %817 = math.exp %816 : vector<8x32xf32>
    %cst_178 = arith.constant 1.000000e+00 : f32
    %818 = vector.broadcast %cst_178 : f32 to vector<8x32xf32>
    %819 = arith.addf %818, %817 : vector<8x32xf32>
    %820 = arith.divf %818, %819 : vector<8x32xf32>
    %821 = vector.extract_strided_slice %801 {offsets = [0, 64], sizes = [8, 32], strides = [1, 1]} : vector<8x128xf32> to vector<8x32xf32>
    %822 = vector.extract_strided_slice %804 {offsets = [0, 64], sizes = [8, 32], strides = [1, 1]} : vector<8x128xf32> to vector<8x32xf32>
    %823 = arith.mulf %812, %822 : vector<8x32xf32>
    %824 = arith.addf %821, %823 : vector<8x32xf32>
    %825 = math.tanh %824 : vector<8x32xf32>
    %cst_179 = arith.constant 1.000000e+00 : f32
    %826 = vector.broadcast %cst_179 : f32 to vector<8x32xf32>
    %827 = arith.subf %826, %820 : vector<8x32xf32>
    %828 = arith.mulf %827, %825 : vector<8x32xf32>
    %829 = arith.mulf %820, %521 : vector<8x32xf32>
    %830 = arith.addf %828, %829 : vector<8x32xf32>
    %c0_180 = arith.constant 0 : index
    %c0_181 = arith.constant 0 : index
    %831 = vector.load %arg16[%c0_180, %c0_181] : memref<64x32xf32, #tpu.memory_space<vmem>>, vector<8x32xf32>
    tpu.vector_store %arg16[%c0_180, %c0_181], %830 {strides = array<i32>} : memref<64x32xf32, #tpu.memory_space<vmem>>, vector<8x32xf32>,
    %832 = vector.extract_strided_slice %796 {offsets = [8, 0], sizes = [8, 128], strides = [1, 1]} : vector<64x128xf32> to vector<8x128xf32>
    %cst_182 = arith.constant dense<0.000000e+00> : vector<8x128xf32>
    %833 = tpu.matmul %830, %798, %cst_182 {dimension_numbers = #tpu.dot_dimension_numbers<[1], [0], [0], [1], [0, 0, 1, 1], [], []>} : vector<8x32xf32>, vector<32x128xf32>, vector<8x128xf32> -> vector<8x128xf32>
    %834 = vector.broadcast %800 : vector<1x128xf32> to vector<8x128xf32>
    %835 = arith.addf %833, %834 : vector<8x128xf32>
    %836 = vector.extract_strided_slice %832 {offsets = [0, 0], sizes = [8, 32], strides = [1, 1]} : vector<8x128xf32> to vector<8x32xf32>
    %837 = vector.extract_strided_slice %835 {offsets = [0, 0], sizes = [8, 32], strides = [1, 1]} : vector<8x128xf32> to vector<8x32xf32>
    %838 = arith.addf %836, %837 : vector<8x32xf32>
    %839 = arith.negf %838 : vector<8x32xf32>
    %840 = math.exp %839 : vector<8x32xf32>
    %cst_183 = arith.constant 1.000000e+00 : f32
    %841 = vector.broadcast %cst_183 : f32 to vector<8x32xf32>
    %842 = arith.addf %841, %840 : vector<8x32xf32>
    %843 = arith.divf %841, %842 : vector<8x32xf32>
    %844 = vector.extract_strided_slice %832 {offsets = [0, 32], sizes = [8, 32], strides = [1, 1]} : vector<8x128xf32> to vector<8x32xf32>
    %845 = vector.extract_strided_slice %835 {offsets = [0, 32], sizes = [8, 32], strides = [1, 1]} : vector<8x128xf32> to vector<8x32xf32>
    %846 = arith.addf %844, %845 : vector<8x32xf32>
    %847 = arith.negf %846 : vector<8x32xf32>
    %848 = math.exp %847 : vector<8x32xf32>
    %cst_184 = arith.constant 1.000000e+00 : f32
    %849 = vector.broadcast %cst_184 : f32 to vector<8x32xf32>
    %850 = arith.addf %849, %848 : vector<8x32xf32>
    %851 = arith.divf %849, %850 : vector<8x32xf32>
    %852 = vector.extract_strided_slice %832 {offsets = [0, 64], sizes = [8, 32], strides = [1, 1]} : vector<8x128xf32> to vector<8x32xf32>
    %853 = vector.extract_strided_slice %835 {offsets = [0, 64], sizes = [8, 32], strides = [1, 1]} : vector<8x128xf32> to vector<8x32xf32>
    %854 = arith.mulf %843, %853 : vector<8x32xf32>
    %855 = arith.addf %852, %854 : vector<8x32xf32>
    %856 = math.tanh %855 : vector<8x32xf32>
    %cst_185 = arith.constant 1.000000e+00 : f32
    %857 = vector.broadcast %cst_185 : f32 to vector<8x32xf32>
    %858 = arith.subf %857, %851 : vector<8x32xf32>
    %859 = arith.mulf %858, %856 : vector<8x32xf32>
    %860 = arith.mulf %851, %830 : vector<8x32xf32>
    %861 = arith.addf %859, %860 : vector<8x32xf32>
    %c8_186 = arith.constant 8 : index
    %c0_187 = arith.constant 0 : index
    %862 = vector.load %arg16[%c8_186, %c0_187] : memref<64x32xf32, #tpu.memory_space<vmem>>, vector<8x32xf32>
    tpu.vector_store %arg16[%c8_186, %c0_187], %861 {strides = array<i32>} : memref<64x32xf32, #tpu.memory_space<vmem>>, vector<8x32xf32>,
    %863 = vector.extract_strided_slice %796 {offsets = [16, 0], sizes = [8, 128], strides = [1, 1]} : vector<64x128xf32> to vector<8x128xf32>
    %cst_188 = arith.constant dense<0.000000e+00> : vector<8x128xf32>
    %864 = tpu.matmul %861, %798, %cst_188 {dimension_numbers = #tpu.dot_dimension_numbers<[1], [0], [0], [1], [0, 0, 1, 1], [], []>} : vector<8x32xf32>, vector<32x128xf32>, vector<8x128xf32> -> vector<8x128xf32>
    %865 = vector.broadcast %800 : vector<1x128xf32> to vector<8x128xf32>
    %866 = arith.addf %864, %865 : vector<8x128xf32>
    %867 = vector.extract_strided_slice %863 {offsets = [0, 0], sizes = [8, 32], strides = [1, 1]} : vector<8x128xf32> to vector<8x32xf32>
    %868 = vector.extract_strided_slice %866 {offsets = [0, 0], sizes = [8, 32], strides = [1, 1]} : vector<8x128xf32> to vector<8x32xf32>
    %869 = arith.addf %867, %868 : vector<8x32xf32>
    %870 = arith.negf %869 : vector<8x32xf32>
    %871 = math.exp %870 : vector<8x32xf32>
    %cst_189 = arith.constant 1.000000e+00 : f32
    %872 = vector.broadcast %cst_189 : f32 to vector<8x32xf32>
    %873 = arith.addf %872, %871 : vector<8x32xf32>
    %874 = arith.divf %872, %873 : vector<8x32xf32>
    %875 = vector.extract_strided_slice %863 {offsets = [0, 32], sizes = [8, 32], strides = [1, 1]} : vector<8x128xf32> to vector<8x32xf32>
    %876 = vector.extract_strided_slice %866 {offsets = [0, 32], sizes = [8, 32], strides = [1, 1]} : vector<8x128xf32> to vector<8x32xf32>
    %877 = arith.addf %875, %876 : vector<8x32xf32>
    %878 = arith.negf %877 : vector<8x32xf32>
    %879 = math.exp %878 : vector<8x32xf32>
    %cst_190 = arith.constant 1.000000e+00 : f32
    %880 = vector.broadcast %cst_190 : f32 to vector<8x32xf32>
    %881 = arith.addf %880, %879 : vector<8x32xf32>
    %882 = arith.divf %880, %881 : vector<8x32xf32>
    %883 = vector.extract_strided_slice %863 {offsets = [0, 64], sizes = [8, 32], strides = [1, 1]} : vector<8x128xf32> to vector<8x32xf32>
    %884 = vector.extract_strided_slice %866 {offsets = [0, 64], sizes = [8, 32], strides = [1, 1]} : vector<8x128xf32> to vector<8x32xf32>
    %885 = arith.mulf %874, %884 : vector<8x32xf32>
    %886 = arith.addf %883, %885 : vector<8x32xf32>
    %887 = math.tanh %886 : vector<8x32xf32>
    %cst_191 = arith.constant 1.000000e+00 : f32
    %888 = vector.broadcast %cst_191 : f32 to vector<8x32xf32>
    %889 = arith.subf %888, %882 : vector<8x32xf32>
    %890 = arith.mulf %889, %887 : vector<8x32xf32>
    %891 = arith.mulf %882, %861 : vector<8x32xf32>
    %892 = arith.addf %890, %891 : vector<8x32xf32>
    %c16_192 = arith.constant 16 : index
    %c0_193 = arith.constant 0 : index
    %893 = vector.load %arg16[%c16_192, %c0_193] : memref<64x32xf32, #tpu.memory_space<vmem>>, vector<8x32xf32>
    tpu.vector_store %arg16[%c16_192, %c0_193], %892 {strides = array<i32>} : memref<64x32xf32, #tpu.memory_space<vmem>>, vector<8x32xf32>,
    %894 = vector.extract_strided_slice %796 {offsets = [24, 0], sizes = [8, 128], strides = [1, 1]} : vector<64x128xf32> to vector<8x128xf32>
    %cst_194 = arith.constant dense<0.000000e+00> : vector<8x128xf32>
    %895 = tpu.matmul %892, %798, %cst_194 {dimension_numbers = #tpu.dot_dimension_numbers<[1], [0], [0], [1], [0, 0, 1, 1], [], []>} : vector<8x32xf32>, vector<32x128xf32>, vector<8x128xf32> -> vector<8x128xf32>
    %896 = vector.broadcast %800 : vector<1x128xf32> to vector<8x128xf32>
    %897 = arith.addf %895, %896 : vector<8x128xf32>
    %898 = vector.extract_strided_slice %894 {offsets = [0, 0], sizes = [8, 32], strides = [1, 1]} : vector<8x128xf32> to vector<8x32xf32>
    %899 = vector.extract_strided_slice %897 {offsets = [0, 0], sizes = [8, 32], strides = [1, 1]} : vector<8x128xf32> to vector<8x32xf32>
    %900 = arith.addf %898, %899 : vector<8x32xf32>
    %901 = arith.negf %900 : vector<8x32xf32>
    %902 = math.exp %901 : vector<8x32xf32>
    %cst_195 = arith.constant 1.000000e+00 : f32
    %903 = vector.broadcast %cst_195 : f32 to vector<8x32xf32>
    %904 = arith.addf %903, %902 : vector<8x32xf32>
    %905 = arith.divf %903, %904 : vector<8x32xf32>
    %906 = vector.extract_strided_slice %894 {offsets = [0, 32], sizes = [8, 32], strides = [1, 1]} : vector<8x128xf32> to vector<8x32xf32>
    %907 = vector.extract_strided_slice %897 {offsets = [0, 32], sizes = [8, 32], strides = [1, 1]} : vector<8x128xf32> to vector<8x32xf32>
    %908 = arith.addf %906, %907 : vector<8x32xf32>
    %909 = arith.negf %908 : vector<8x32xf32>
    %910 = math.exp %909 : vector<8x32xf32>
    %cst_196 = arith.constant 1.000000e+00 : f32
    %911 = vector.broadcast %cst_196 : f32 to vector<8x32xf32>
    %912 = arith.addf %911, %910 : vector<8x32xf32>
    %913 = arith.divf %911, %912 : vector<8x32xf32>
    %914 = vector.extract_strided_slice %894 {offsets = [0, 64], sizes = [8, 32], strides = [1, 1]} : vector<8x128xf32> to vector<8x32xf32>
    %915 = vector.extract_strided_slice %897 {offsets = [0, 64], sizes = [8, 32], strides = [1, 1]} : vector<8x128xf32> to vector<8x32xf32>
    %916 = arith.mulf %905, %915 : vector<8x32xf32>
    %917 = arith.addf %914, %916 : vector<8x32xf32>
    %918 = math.tanh %917 : vector<8x32xf32>
    %cst_197 = arith.constant 1.000000e+00 : f32
    %919 = vector.broadcast %cst_197 : f32 to vector<8x32xf32>
    %920 = arith.subf %919, %913 : vector<8x32xf32>
    %921 = arith.mulf %920, %918 : vector<8x32xf32>
    %922 = arith.mulf %913, %892 : vector<8x32xf32>
    %923 = arith.addf %921, %922 : vector<8x32xf32>
    %c24_198 = arith.constant 24 : index
    %c0_199 = arith.constant 0 : index
    %924 = vector.load %arg16[%c24_198, %c0_199] : memref<64x32xf32, #tpu.memory_space<vmem>>, vector<8x32xf32>
    tpu.vector_store %arg16[%c24_198, %c0_199], %923 {strides = array<i32>} : memref<64x32xf32, #tpu.memory_space<vmem>>, vector<8x32xf32>,
    %925 = vector.extract_strided_slice %796 {offsets = [32, 0], sizes = [8, 128], strides = [1, 1]} : vector<64x128xf32> to vector<8x128xf32>
    %cst_200 = arith.constant dense<0.000000e+00> : vector<8x128xf32>
    %926 = tpu.matmul %923, %798, %cst_200 {dimension_numbers = #tpu.dot_dimension_numbers<[1], [0], [0], [1], [0, 0, 1, 1], [], []>} : vector<8x32xf32>, vector<32x128xf32>, vector<8x128xf32> -> vector<8x128xf32>
    %927 = vector.broadcast %800 : vector<1x128xf32> to vector<8x128xf32>
    %928 = arith.addf %926, %927 : vector<8x128xf32>
    %929 = vector.extract_strided_slice %925 {offsets = [0, 0], sizes = [8, 32], strides = [1, 1]} : vector<8x128xf32> to vector<8x32xf32>
    %930 = vector.extract_strided_slice %928 {offsets = [0, 0], sizes = [8, 32], strides = [1, 1]} : vector<8x128xf32> to vector<8x32xf32>
    %931 = arith.addf %929, %930 : vector<8x32xf32>
    %932 = arith.negf %931 : vector<8x32xf32>
    %933 = math.exp %932 : vector<8x32xf32>
    %cst_201 = arith.constant 1.000000e+00 : f32
    %934 = vector.broadcast %cst_201 : f32 to vector<8x32xf32>
    %935 = arith.addf %934, %933 : vector<8x32xf32>
    %936 = arith.divf %934, %935 : vector<8x32xf32>
    %937 = vector.extract_strided_slice %925 {offsets = [0, 32], sizes = [8, 32], strides = [1, 1]} : vector<8x128xf32> to vector<8x32xf32>
    %938 = vector.extract_strided_slice %928 {offsets = [0, 32], sizes = [8, 32], strides = [1, 1]} : vector<8x128xf32> to vector<8x32xf32>
    %939 = arith.addf %937, %938 : vector<8x32xf32>
    %940 = arith.negf %939 : vector<8x32xf32>
    %941 = math.exp %940 : vector<8x32xf32>
    %cst_202 = arith.constant 1.000000e+00 : f32
    %942 = vector.broadcast %cst_202 : f32 to vector<8x32xf32>
    %943 = arith.addf %942, %941 : vector<8x32xf32>
    %944 = arith.divf %942, %943 : vector<8x32xf32>
    %945 = vector.extract_strided_slice %925 {offsets = [0, 64], sizes = [8, 32], strides = [1, 1]} : vector<8x128xf32> to vector<8x32xf32>
    %946 = vector.extract_strided_slice %928 {offsets = [0, 64], sizes = [8, 32], strides = [1, 1]} : vector<8x128xf32> to vector<8x32xf32>
    %947 = arith.mulf %936, %946 : vector<8x32xf32>
    %948 = arith.addf %945, %947 : vector<8x32xf32>
    %949 = math.tanh %948 : vector<8x32xf32>
    %cst_203 = arith.constant 1.000000e+00 : f32
    %950 = vector.broadcast %cst_203 : f32 to vector<8x32xf32>
    %951 = arith.subf %950, %944 : vector<8x32xf32>
    %952 = arith.mulf %951, %949 : vector<8x32xf32>
    %953 = arith.mulf %944, %923 : vector<8x32xf32>
    %954 = arith.addf %952, %953 : vector<8x32xf32>
    %c32_204 = arith.constant 32 : index
    %c0_205 = arith.constant 0 : index
    %955 = vector.load %arg16[%c32_204, %c0_205] : memref<64x32xf32, #tpu.memory_space<vmem>>, vector<8x32xf32>
    tpu.vector_store %arg16[%c32_204, %c0_205], %954 {strides = array<i32>} : memref<64x32xf32, #tpu.memory_space<vmem>>, vector<8x32xf32>,
    %956 = vector.extract_strided_slice %796 {offsets = [40, 0], sizes = [8, 128], strides = [1, 1]} : vector<64x128xf32> to vector<8x128xf32>
    %cst_206 = arith.constant dense<0.000000e+00> : vector<8x128xf32>
    %957 = tpu.matmul %954, %798, %cst_206 {dimension_numbers = #tpu.dot_dimension_numbers<[1], [0], [0], [1], [0, 0, 1, 1], [], []>} : vector<8x32xf32>, vector<32x128xf32>, vector<8x128xf32> -> vector<8x128xf32>
    %958 = vector.broadcast %800 : vector<1x128xf32> to vector<8x128xf32>
    %959 = arith.addf %957, %958 : vector<8x128xf32>
    %960 = vector.extract_strided_slice %956 {offsets = [0, 0], sizes = [8, 32], strides = [1, 1]} : vector<8x128xf32> to vector<8x32xf32>
    %961 = vector.extract_strided_slice %959 {offsets = [0, 0], sizes = [8, 32], strides = [1, 1]} : vector<8x128xf32> to vector<8x32xf32>
    %962 = arith.addf %960, %961 : vector<8x32xf32>
    %963 = arith.negf %962 : vector<8x32xf32>
    %964 = math.exp %963 : vector<8x32xf32>
    %cst_207 = arith.constant 1.000000e+00 : f32
    %965 = vector.broadcast %cst_207 : f32 to vector<8x32xf32>
    %966 = arith.addf %965, %964 : vector<8x32xf32>
    %967 = arith.divf %965, %966 : vector<8x32xf32>
    %968 = vector.extract_strided_slice %956 {offsets = [0, 32], sizes = [8, 32], strides = [1, 1]} : vector<8x128xf32> to vector<8x32xf32>
    %969 = vector.extract_strided_slice %959 {offsets = [0, 32], sizes = [8, 32], strides = [1, 1]} : vector<8x128xf32> to vector<8x32xf32>
    %970 = arith.addf %968, %969 : vector<8x32xf32>
    %971 = arith.negf %970 : vector<8x32xf32>
    %972 = math.exp %971 : vector<8x32xf32>
    %cst_208 = arith.constant 1.000000e+00 : f32
    %973 = vector.broadcast %cst_208 : f32 to vector<8x32xf32>
    %974 = arith.addf %973, %972 : vector<8x32xf32>
    %975 = arith.divf %973, %974 : vector<8x32xf32>
    %976 = vector.extract_strided_slice %956 {offsets = [0, 64], sizes = [8, 32], strides = [1, 1]} : vector<8x128xf32> to vector<8x32xf32>
    %977 = vector.extract_strided_slice %959 {offsets = [0, 64], sizes = [8, 32], strides = [1, 1]} : vector<8x128xf32> to vector<8x32xf32>
    %978 = arith.mulf %967, %977 : vector<8x32xf32>
    %979 = arith.addf %976, %978 : vector<8x32xf32>
    %980 = math.tanh %979 : vector<8x32xf32>
    %cst_209 = arith.constant 1.000000e+00 : f32
    %981 = vector.broadcast %cst_209 : f32 to vector<8x32xf32>
    %982 = arith.subf %981, %975 : vector<8x32xf32>
    %983 = arith.mulf %982, %980 : vector<8x32xf32>
    %984 = arith.mulf %975, %954 : vector<8x32xf32>
    %985 = arith.addf %983, %984 : vector<8x32xf32>
    %c40_210 = arith.constant 40 : index
    %c0_211 = arith.constant 0 : index
    %986 = vector.load %arg16[%c40_210, %c0_211] : memref<64x32xf32, #tpu.memory_space<vmem>>, vector<8x32xf32>
    tpu.vector_store %arg16[%c40_210, %c0_211], %985 {strides = array<i32>} : memref<64x32xf32, #tpu.memory_space<vmem>>, vector<8x32xf32>,
    %987 = vector.extract_strided_slice %796 {offsets = [48, 0], sizes = [8, 128], strides = [1, 1]} : vector<64x128xf32> to vector<8x128xf32>
    %cst_212 = arith.constant dense<0.000000e+00> : vector<8x128xf32>
    %988 = tpu.matmul %985, %798, %cst_212 {dimension_numbers = #tpu.dot_dimension_numbers<[1], [0], [0], [1], [0, 0, 1, 1], [], []>} : vector<8x32xf32>, vector<32x128xf32>, vector<8x128xf32> -> vector<8x128xf32>
    %989 = vector.broadcast %800 : vector<1x128xf32> to vector<8x128xf32>
    %990 = arith.addf %988, %989 : vector<8x128xf32>
    %991 = vector.extract_strided_slice %987 {offsets = [0, 0], sizes = [8, 32], strides = [1, 1]} : vector<8x128xf32> to vector<8x32xf32>
    %992 = vector.extract_strided_slice %990 {offsets = [0, 0], sizes = [8, 32], strides = [1, 1]} : vector<8x128xf32> to vector<8x32xf32>
    %993 = arith.addf %991, %992 : vector<8x32xf32>
    %994 = arith.negf %993 : vector<8x32xf32>
    %995 = math.exp %994 : vector<8x32xf32>
    %cst_213 = arith.constant 1.000000e+00 : f32
    %996 = vector.broadcast %cst_213 : f32 to vector<8x32xf32>
    %997 = arith.addf %996, %995 : vector<8x32xf32>
    %998 = arith.divf %996, %997 : vector<8x32xf32>
    %999 = vector.extract_strided_slice %987 {offsets = [0, 32], sizes = [8, 32], strides = [1, 1]} : vector<8x128xf32> to vector<8x32xf32>
    %1000 = vector.extract_strided_slice %990 {offsets = [0, 32], sizes = [8, 32], strides = [1, 1]} : vector<8x128xf32> to vector<8x32xf32>
    %1001 = arith.addf %999, %1000 : vector<8x32xf32>
    %1002 = arith.negf %1001 : vector<8x32xf32>
    %1003 = math.exp %1002 : vector<8x32xf32>
    %cst_214 = arith.constant 1.000000e+00 : f32
    %1004 = vector.broadcast %cst_214 : f32 to vector<8x32xf32>
    %1005 = arith.addf %1004, %1003 : vector<8x32xf32>
    %1006 = arith.divf %1004, %1005 : vector<8x32xf32>
    %1007 = vector.extract_strided_slice %987 {offsets = [0, 64], sizes = [8, 32], strides = [1, 1]} : vector<8x128xf32> to vector<8x32xf32>
    %1008 = vector.extract_strided_slice %990 {offsets = [0, 64], sizes = [8, 32], strides = [1, 1]} : vector<8x128xf32> to vector<8x32xf32>
    %1009 = arith.mulf %998, %1008 : vector<8x32xf32>
    %1010 = arith.addf %1007, %1009 : vector<8x32xf32>
    %1011 = math.tanh %1010 : vector<8x32xf32>
    %cst_215 = arith.constant 1.000000e+00 : f32
    %1012 = vector.broadcast %cst_215 : f32 to vector<8x32xf32>
    %1013 = arith.subf %1012, %1006 : vector<8x32xf32>
    %1014 = arith.mulf %1013, %1011 : vector<8x32xf32>
    %1015 = arith.mulf %1006, %985 : vector<8x32xf32>
    %1016 = arith.addf %1014, %1015 : vector<8x32xf32>
    %c48_216 = arith.constant 48 : index
    %c0_217 = arith.constant 0 : index
    %1017 = vector.load %arg16[%c48_216, %c0_217] : memref<64x32xf32, #tpu.memory_space<vmem>>, vector<8x32xf32>
    tpu.vector_store %arg16[%c48_216, %c0_217], %1016 {strides = array<i32>} : memref<64x32xf32, #tpu.memory_space<vmem>>, vector<8x32xf32>,
    %1018 = vector.extract_strided_slice %796 {offsets = [56, 0], sizes = [8, 128], strides = [1, 1]} : vector<64x128xf32> to vector<8x128xf32>
    %cst_218 = arith.constant dense<0.000000e+00> : vector<8x128xf32>
    %1019 = tpu.matmul %1016, %798, %cst_218 {dimension_numbers = #tpu.dot_dimension_numbers<[1], [0], [0], [1], [0, 0, 1, 1], [], []>} : vector<8x32xf32>, vector<32x128xf32>, vector<8x128xf32> -> vector<8x128xf32>
    %1020 = vector.broadcast %800 : vector<1x128xf32> to vector<8x128xf32>
    %1021 = arith.addf %1019, %1020 : vector<8x128xf32>
    %1022 = vector.extract_strided_slice %1018 {offsets = [0, 0], sizes = [8, 32], strides = [1, 1]} : vector<8x128xf32> to vector<8x32xf32>
    %1023 = vector.extract_strided_slice %1021 {offsets = [0, 0], sizes = [8, 32], strides = [1, 1]} : vector<8x128xf32> to vector<8x32xf32>
    %1024 = arith.addf %1022, %1023 : vector<8x32xf32>
    %1025 = arith.negf %1024 : vector<8x32xf32>
    %1026 = math.exp %1025 : vector<8x32xf32>
    %cst_219 = arith.constant 1.000000e+00 : f32
    %1027 = vector.broadcast %cst_219 : f32 to vector<8x32xf32>
    %1028 = arith.addf %1027, %1026 : vector<8x32xf32>
    %1029 = arith.divf %1027, %1028 : vector<8x32xf32>
    %1030 = vector.extract_strided_slice %1018 {offsets = [0, 32], sizes = [8, 32], strides = [1, 1]} : vector<8x128xf32> to vector<8x32xf32>
    %1031 = vector.extract_strided_slice %1021 {offsets = [0, 32], sizes = [8, 32], strides = [1, 1]} : vector<8x128xf32> to vector<8x32xf32>
    %1032 = arith.addf %1030, %1031 : vector<8x32xf32>
    %1033 = arith.negf %1032 : vector<8x32xf32>
    %1034 = math.exp %1033 : vector<8x32xf32>
    %cst_220 = arith.constant 1.000000e+00 : f32
    %1035 = vector.broadcast %cst_220 : f32 to vector<8x32xf32>
    %1036 = arith.addf %1035, %1034 : vector<8x32xf32>
    %1037 = arith.divf %1035, %1036 : vector<8x32xf32>
    %1038 = vector.extract_strided_slice %1018 {offsets = [0, 64], sizes = [8, 32], strides = [1, 1]} : vector<8x128xf32> to vector<8x32xf32>
    %1039 = vector.extract_strided_slice %1021 {offsets = [0, 64], sizes = [8, 32], strides = [1, 1]} : vector<8x128xf32> to vector<8x32xf32>
    %1040 = arith.mulf %1029, %1039 : vector<8x32xf32>
    %1041 = arith.addf %1038, %1040 : vector<8x32xf32>
    %1042 = math.tanh %1041 : vector<8x32xf32>
    %cst_221 = arith.constant 1.000000e+00 : f32
    %1043 = vector.broadcast %cst_221 : f32 to vector<8x32xf32>
    %1044 = arith.subf %1043, %1037 : vector<8x32xf32>
    %1045 = arith.mulf %1044, %1042 : vector<8x32xf32>
    %1046 = arith.mulf %1037, %1016 : vector<8x32xf32>
    %1047 = arith.addf %1045, %1046 : vector<8x32xf32>
    %c56_222 = arith.constant 56 : index
    %c0_223 = arith.constant 0 : index
    %1048 = vector.load %arg16[%c56_222, %c0_223] : memref<64x32xf32, #tpu.memory_space<vmem>>, vector<8x32xf32>
    tpu.vector_store %arg16[%c56_222, %c0_223], %1047 {strides = array<i32>} : memref<64x32xf32, #tpu.memory_space<vmem>>, vector<8x32xf32>,
    %c0_224 = arith.constant 0 : index
    %c0_225 = arith.constant 0 : index
    %1049 = vector.load %arg16[%c0_224, %c0_225] : memref<64x32xf32, #tpu.memory_space<vmem>>, vector<64x32xf32>
    %c0_226 = arith.constant 0 : index
    %c0_227 = arith.constant 0 : index
    %1050 = vector.load %arg10[%c0_226, %c0_227] : memref<32x128xf32, #tpu.memory_space<vmem>>, vector<32x128xf32>
    %cst_228 = arith.constant dense<0.000000e+00> : vector<64x128xf32>
    %1051 = tpu.matmul %1049, %1050, %cst_228 {dimension_numbers = #tpu.dot_dimension_numbers<[1], [0], [0], [1], [0, 0, 1, 1], [], []>} : vector<64x32xf32>, vector<32x128xf32>, vector<64x128xf32> -> vector<64x128xf32>
    %c0_229 = arith.constant 0 : index
    %c0_230 = arith.constant 0 : index
    %1052 = vector.load %arg11[%c0_229, %c0_230] : memref<1x128xf32, #tpu.memory_space<vmem>>, vector<1x128xf32>
    %1053 = vector.broadcast %1052 : vector<1x128xf32> to vector<64x128xf32>
    %1054 = arith.addf %1051, %1053 : vector<64x128xf32>
    %c0_231 = arith.constant 0 : index
    %c0_232 = arith.constant 0 : index
    %1055 = vector.load %arg12[%c0_231, %c0_232] : memref<64x128xf32, #tpu.memory_space<vmem>>, vector<64x128xf32>
    tpu.vector_store %arg12[%c0_231, %c0_232], %1054 {strides = array<i32>} : memref<64x128xf32, #tpu.memory_space<vmem>>, vector<64x128xf32>,
    %c0_233 = arith.constant 0 : index
    %c0_234 = arith.constant 0 : index
    %c0_235 = arith.constant 0 : index
    %1056 = vector.load %arg13[%c0_233, %c0_234, %c0_235] : memref<2x8x32xf32, #tpu.memory_space<vmem>>, vector<1x8x32xf32>
    %1057 = vector.shape_cast %1056 : vector<1x8x32xf32> to vector<8x32xf32>
    %1058 = vector.shape_cast %788 : vector<8x32xf32> to vector<1x8x32xf32>
    tpu.vector_store %arg13[%c0_233, %c0_234, %c0_235], %1058 {strides = array<i32>} : memref<2x8x32xf32, #tpu.memory_space<vmem>>, vector<1x8x32xf32>,
    %c1_236 = arith.constant 1 : index
    %c0_237 = arith.constant 0 : index
    %c0_238 = arith.constant 0 : index
    %1059 = vector.load %arg13[%c1_236, %c0_237, %c0_238] : memref<2x8x32xf32, #tpu.memory_space<vmem>>, vector<1x8x32xf32>
    %1060 = vector.shape_cast %1059 : vector<1x8x32xf32> to vector<8x32xf32>
    %1061 = vector.shape_cast %1047 : vector<8x32xf32> to vector<1x8x32xf32>
    tpu.vector_store %arg13[%c1_236, %c0_237, %c0_238], %1061 {strides = array<i32>} : memref<2x8x32xf32, #tpu.memory_space<vmem>>, vector<1x8x32xf32>,
    return
  }
}

</mosaic_0001>

<bundles_post_ra>
// kernel: encoder_decoder_forward.1
= control target key start
LH: loop header
LB: loop body
LE: loop exit
PB: predicated region body
PF: predicated region fallthrough
CT: control target
= control target key end

     0   :  { %v3082_v0 = vmov 0   ;;  %v43_v13 = vlaneseq  ;;  %vm163_vm0 = vcmask 130048   ;;  %v3083_v16 = vmov 0.0   ;;  %s3084_s21 = smov 64   ;;  %s3085_s22 = smov 96   ;;  %s3951_s0 = inlined_call_operand.vmem [shape: s32[64,1], index: 0, kind: input, shape index: {}]   ;;  %s3952_s2 = inlined_call_operand.vmem [shape: f32[16,128], index: 2, kind: input, shape index: {}]   ;;  %s3953_s8 = inlined_call_operand.vmem [shape: f32[4,1,128], index: 8, kind: input, shape index: {}]   ;;  %s3954_s7 = inlined_call_operand.vmem [shape: f32[4,32,128], index: 7, kind: input, shape index: {}]   ;;  %s3955_s9 = inlined_call_operand.vmem [shape: f32[4,1,128], index: 9, kind: input, shape index: {}]   ;;  %s3956_s3 = inlined_call_operand.vmem [shape: f32[32,128], index: 3, kind: input, shape index: {}]   ;;  %s3957_s1 = inlined_call_operand.vmem [shape: s32[64,1], index: 1, kind: input, shape index: {}]   ;;  %s3958_s4 = inlined_call_operand.vmem [shape: f32[16,128], index: 4, kind: input, shape index: {}]   ;;  %s3959_s5 = inlined_call_operand.vmem [shape: f32[32,128], index: 5, kind: input, shape index: {}]   ;;  %s3960_s6 = inlined_call_operand.vmem [shape: f32[32,128], index: 6, kind: input, shape index: {}]   ;;  %s3961_s10 = inlined_call_operand.vmem [shape: f32[32,128], index: 10, kind: input, shape index: {}]   ;;  %s3962_s11 = inlined_call_operand.vmem [shape: f32[1,128], index: 11, kind: input, shape index: {}]   ;;  %s3963_s12 = inlined_call_operand.vmem [shape: f32[64,128], index: 12, kind: output, shape index: {0}]   ;;  %s3964_s13 = inlined_call_operand.vmem [shape: f32[2,8,32], index: 13, kind: output, shape index: {1}]  }
   0x1   :  { %2876 = vset.pattern.permute.xlu1 %v3082_v0  ;;  %2875 = vset.pattern.permute.xlu0 %v3082_v0  ;;  %v47_v1 = vld [vmem:[%s3951_s0 + $0x10] sm:$0xff]  ;;  %v45_v2 = vld [vmem:[%s3951_s0] sm:$0xff]  ;;  %v158_v4 = vld [vmem:[%s3952_s2 + $0x8] sm:$0xff]  ;;  %vm237_vm13 = vcmask 261120  }
   0x2   :  { %60 = vperm.xlu1 %2876, %v47_v1   ;;  %54 = vperm.xlu0 %2875, %v45_v2   ;;  %v49_v3 = vld [vmem:[%s3951_s0 + $0x20] sm:$0xff]  ;;  %v48_v5 = vld [vmem:[%s3951_s0 + $0x18] sm:$0xff]  ;;  %v46_v6 = vld [vmem:[%s3951_s0 + $0x8] sm:$0xff]  ;;  %v3204_v14 = vand.u32 127, %v43_v13 }
   0x3   :  { %2877 = vset.pattern.permute.xlu2 %v3082_v0  ;;  %202 = vmatpush.msra.mxu0 %v158_v4  ;;  %v50_v7 = vld [vmem:[%s3951_s0 + $0x28] sm:$0xff]  ;;  %v52_v8 = vld [vmem:[%s3951_s0 + $0x38] sm:$0xff]  ;;  %v51_v9 = vld [vmem:[%s3951_s0 + $0x30] sm:$0xff] }
   0x4   :  { %66 = vperm.xlu2 %2877, %v49_v3   ;;  %v157_v10 = vld [vmem:[%s3952_s2] sm:$0xff]  ;;  %v3189_v11 = vld [vmem:[%s3954_s7 + $0x18] sm:$0xff]  ;;  %v3198_v12 = vld [vmem:[%s3954_s7 + $0x10] sm:$0xff] }
   0x5   :  { %203 = vmatpush.msra.mxu0 %v157_v10  ;;  %451 = vmatpush.msra.mxu1 %v3189_v11  ;;  %v230_v18 = vld [vmem:[%s3954_s7 + $0x8] sm:$0xff]  ;;  %v229_v23 = vld [vmem:[%s3954_s7] sm:$0xff] }
   0x6   :  { %517 = vmatpush.msra.mxu2 %v3189_v11  ;;  %583 = vmatpush.msra.mxu3 %v3189_v11  ;;  %v2878_v35 = vld [vmem:[%s3953_s8] ss:$0 sm:$0xff] }
   0x7   :  { %253 = vmatpush.msrb.mxu0 %v3189_v11  ;;  %452 = vmatpush.msra.mxu1 %v3198_v12  ;;  %v3265_v50 = vld [vmem:[%s3955_s9] ss:$0 sm:$0xff] }
   0x8   :  { %518 = vmatpush.msra.mxu2 %v3198_v12  ;;  %584 = vmatpush.msra.mxu3 %v3198_v12 }
   0x9   :  { %254 = vmatpush.msrb.mxu0 %v3198_v12  ;;  %453 = vmatpush.msra.mxu1 %v230_v18 }
   0xa   :  { %63 = vperm.xlu1 %2876, %v48_v5   ;;  %57 = vperm.xlu0 %2875, %v46_v6  }
   0xb   :  { %255 = vmatpush.msrb.mxu0 %v230_v18  ;;  %519 = vmatpush.msra.mxu2 %v230_v18 }
   0xc   :  { %69 = vperm.xlu2 %2877, %v50_v7   ;;  %585 = vmatpush.msra.mxu3 %v230_v18 }
   0xd   :  { %256 = vmatpush.msrb.mxu0 %v229_v23  ;;  %454 = vmatpush.msra.mxu1 %v229_v23 }
   0xe   :  { %520 = vmatpush.msra.mxu2 %v229_v23  ;;  %586 = vmatpush.msra.mxu3 %v229_v23 }
   0xf   :  { %649 = vmatpush.msrb.mxu1 %v3189_v11 }
  0x10   :  { %715 = vmatpush.msrb.mxu2 %v3189_v11 }
  0x11   :  { %650 = vmatpush.msrb.mxu1 %v3198_v12 }
  0x12   :  { %75 = vperm.xlu1 %2876, %v52_v8   ;;  %72 = vperm.xlu0 %2875, %v51_v9  }
  0x13   :  { %716 = vmatpush.msrb.mxu2 %v3198_v12  ;;  %651 = vmatpush.msrb.mxu1 %v230_v18 }
  0x15   :  { %717 = vmatpush.msrb.mxu2 %v230_v18  ;;  %652 = vmatpush.msrb.mxu1 %v229_v23 }
  0x17   :  { %718 = vmatpush.msrb.mxu2 %v229_v23 }
  0x5e   :  { %v67_v26 = vpop.permute.xlu2 %66 }
  0x5f   :  { %vm81_vm5 = vcmp.eq.s32.totalorder %v67_v26, %v3204_v14 }
  0x60   :  { %v2735_v27 = vsel %vm81_vm5, 1.0, %v3083_v16 }
  0x66   :  { %v70_v28 = vpop.permute.xlu2 %69 }
  0x67   :  { %vm82_vm6 = vcmp.eq.s32.totalorder %v70_v28, %v3204_v14 }
  0x68   :  { %v2736_v29 = vsel %vm82_vm6, 1.0, %v3083_v16 }
  0x74   :  { %v55_v15 = vpop.permute.xlu0 %54  ;;  %v61_v21 = vpop.permute.xlu1 %60 }
  0x75   :  { %vm77_vm1 = vcmp.eq.s32.totalorder %v55_v15, %v3204_v14  ;;  %vm79_vm3 = vcmp.eq.s32.totalorder %v61_v21, %v3204_v14 }
  0x76   :  { %v2731_v17 = vsel %vm77_vm1, 1.0, %v3083_v16  ;;  %v2733_v22 = vsel %vm79_vm3, 1.0, %v3083_v16 }
  0x77   :  { %2747 = vmatmul.msk.f32.vlgmr.msra.gmra.mxu0 %vm163_vm0, %v2731_v17 }
  0x78   :  { %319 = vmatpush.msra.mxu0 %v3189_v11 }
  0x7a   :  { %320 = vmatpush.msra.mxu0 %v3198_v12 }
  0x7c   :  { %v58_v19 = vpop.permute.xlu0 %57  ;;  %v64_v24 = vpop.permute.xlu1 %63  ;;  %321 = vmatpush.msra.mxu0 %v230_v18 }
  0x7d   :  { %vm78_vm2 = vcmp.eq.s32.totalorder %v58_v19, %v3204_v14  ;;  %vm80_vm4 = vcmp.eq.s32.totalorder %v64_v24, %v3204_v14 }
  0x7e   :  { %v2732_v20 = vsel %vm78_vm2, 1.0, %v3083_v16  ;;  %v2734_v25 = vsel %vm80_vm4, 1.0, %v3083_v16  ;;  %322 = vmatpush.msra.mxu0 %v229_v23 }
  0x7f   :  { %2748 = vmatmul.msk.f32.gmra.mxu0 %vm163_vm0, %v2732_v20 }
  0x84   :  { %v73_v30 = vpop.permute.xlu0 %72  ;;  %v76_v32 = vpop.permute.xlu1 %75 }
  0x85   :  { %vm83_vm7 = vcmp.eq.s32.totalorder %v73_v30, %v3204_v14  ;;  %vm84_vm8 = vcmp.eq.s32.totalorder %v76_v32, %v3204_v14 }
  0x86   :  { %v2737_v31 = vsel %vm83_vm7, 1.0, %v3083_v16  ;;  %v2738_v33 = vsel %vm84_vm8, 1.0, %v3083_v16 }
  0x87   :  { %2749 = vmatmul.msk.f32.gmra.mxu0 %vm163_vm0, %v2733_v22 }
  0x8f   :  { %2750 = vmatmul.msk.f32.gmra.mxu0 %vm163_vm0, %v2734_v25 }
  0x97   :  { %2751 = vmatmul.msk.f32.gmra.mxu0 %vm163_vm0, %v2735_v27 }
  0x9f   :  { %2752 = vmatmul.msk.f32.gmra.mxu0 %vm163_vm0, %v2736_v29 }
  0xa7   :  { %2753 = vmatmul.msk.f32.gmra.mxu0 %vm163_vm0, %v2737_v31 }
  0xaf   :  { %2754 = vmatmul.msk.f32.gmra.mxu0 %vm163_vm0, %v2738_v33 }
  0xb7   :  { %257 = vmatmul.f32.vlgmr.msrb.gmra.mxu0 %v3083_v16 }
  0xb8   :  { %385 = vmatpush.msrb.mxu0 %v3189_v11 }
  0xba   :  { %386 = vmatpush.msrb.mxu0 %v3198_v12 }
  0xbc   :  { %387 = vmatpush.msrb.mxu0 %v230_v18 }
  0xbe   :  { %388 = vmatpush.msrb.mxu0 %v229_v23 }
  0xf4   :  { %v205_v34 = vpop.f32.mrf.mxu0 }
  0xf5   :  { %v206_v53 = vadd.f32 %v2878_v35, %v205_v34 }
  0xfc   :  { %v208_v36 = vpop.f32.mrf.mxu0 }
  0xfd   :  { %v3248_v37 = vadd.f32 %v2878_v35, %v208_v36 }
 0x104   :  { %v211_v38 = vpop.f32.mrf.mxu0 }
 0x105   :  { %v3250_v39 = vadd.f32 %v2878_v35, %v211_v38 }
 0x10c   :  { %v214_v40 = vpop.f32.mrf.mxu0 }
 0x10d   :  { %v3252_v41 = vadd.f32 %v2878_v35, %v214_v40 }
 0x114   :  { %v217_v42 = vpop.f32.mrf.mxu0 }
 0x115   :  { %v3254_v43 = vadd.f32 %v2878_v35, %v217_v42 }
 0x11c   :  { %v220_v44 = vpop.f32.mrf.mxu0 }
 0x11d   :  { %v3256_v45 = vadd.f32 %v2878_v35, %v220_v44 }
 0x124   :  { %v223_v46 = vpop.f32.mrf.mxu0 }
 0x125   :  { %v3258_v47 = vadd.f32 %v2878_v35, %v223_v46 }
 0x12c   :  { %v226_v48 = vpop.f32.mrf.mxu0 }
 0x12d   :  { %v3260_v49 = vadd.f32 %v2878_v35, %v226_v48 }
 0x134   :  { %v258_v51 = vpop.f32.mrf.mxu0 }
 0x135   :  { %v259_v52 = vadd.f32 %v3265_v50, %v258_v51 }
 0x137   :  { %282 = vrot.lane.b32.xlu2 %v259_v52, %s3084_s21  ;;  %v261_v54 = vadd.f32 %v259_v52, %v206_v53 }
 0x139   :  { %v2755_v55 = vmul.f32 -1.442695, %v261_v54 }
 0x13b   :  { %2887 = vpow2.f32 %v2755_v55 }
 0x141   :  { %v2888_v56 = vpop.eup %2887 }
 0x142   :  { %v265_v57 = vadd.f32 1.0, %v2888_v56 }
 0x144   :  { %2889 = vrcp.f32 %v265_v57  ;;  %v277_v63 = vand.u32 2147483648, %v265_v57  ;;  %vm271_vm10 = vweird.f32 %v265_v57  ;;  %v275_v0 = vand.u32 2147483647, %v265_v57 }
 0x146   :  { %v278_v2 = vor.u32 1.1754944e-38, %v277_v63  ;;  %vm276_vm12 = vcmp.eq.f32.partialorder %v275_v0, 8.507059e+37 }
 0x14a   :  { %v2890_v58 = vpop.eup %2889 }
 0x14b   :  { %v267_v59 = vmul.f32 %v2890_v58, %v265_v57  ;;  %vm272_vm9 = vweird.f32 %v2890_v58 }
 0x14c   :  { %vm273_vm11 = vmor %vm271_vm10, %vm272_vm9 }
 0x14d   :  { %v268_v60 = vsub.f32 1.0, %v267_v59 }
 0x14f   :  { %v269_v61 = vmul.f32 %v2890_v58, %v268_v60 }
 0x151   :  { %v270_v62 = vadd.f32 %v2890_v58, %v269_v61 }
 0x153   :  { %v274_v1 = vsel %vm273_vm11, %v2890_v58, %v270_v62 }
 0x154   :  { %v279_v4 = vsel %vm276_vm12, %v278_v2, %v274_v1 }
 0x155   :  { %v292_v9 = vsub.f32 1.0, %v279_v4  ;;  %v298_v11 = vmul.f32 0.0, %v279_v4 }
 0x191   :  { %v283_v3 = vpop.permute.xlu2 %282 }
 0x192   :  { %v285_v5 = vmul.f32 %v283_v3, %v279_v4 }
 0x194   :  { %287 = vrot.lane.b32.xlu0 %v285_v5, %s3084_s21 }
 0x206   :  { %v288_v6 = vpop.permute.xlu0 %287 }
 0x207   :  { %v290_v7 = vadd.f32 %v288_v6, %v206_v53 }
 0x209   :  { %2891 = vtanh.f32 %v290_v7 }
 0x20f   :  { %v2892_v8 = vpop.eup %2891 }
 0x210   :  { %294 = vrot.lane.b32.xlu1 %v2892_v8, %s3085_s22 }
 0x282   :  { %v295_v10 = vpop.permute.xlu1 %294 }
 0x283   :  { %v297_v12 = vmul.f32 %v295_v10, %v292_v9 }
 0x285   :  { %v299_v13 = vadd.f32 %v298_v11, %v297_v12 }
 0x287   :  { %301 = vrot.lane.b32.xlu2 %v299_v13, %s3085_s22 }
 0x2e1   :  { %v302_v15 = vpop.permute.xlu2 %301 }
 0x2e2   :  { %304 = vst.msk [vmem:[#allocation2] sm:$0xff] %vm237_vm13, %v302_v15  ;;  %2756 = vmatmul.msk.f32.vlgmr.msra.gmra.mxu0 %vm237_vm13, %v302_v15 }
 0x35f   :  { %v324_v17 = vpop.f32.mrf.mxu0 }
 0x360   :  { %v325_v18 = vadd.f32 %v3265_v50, %v324_v17 }
 0x362   :  { %348 = vrot.lane.b32.xlu0 %v325_v18, %s3084_s21  ;;  %v327_v19 = vadd.f32 %v325_v18, %v3248_v37 }
 0x364   :  { %v2757_v20 = vmul.f32 -1.442695, %v327_v19 }
 0x366   :  { %2893 = vpow2.f32 %v2757_v20 }
 0x36c   :  { %v2894_v21 = vpop.eup %2893 }
 0x36d   :  { %v331_v22 = vadd.f32 1.0, %v2894_v21 }
 0x36f   :  { %2895 = vrcp.f32 %v331_v22  ;;  %v343_v28 = vand.u32 2147483648, %v331_v22  ;;  %vm337_vm15 = vweird.f32 %v331_v22  ;;  %v341_v29 = vand.u32 2147483647, %v331_v22 }
 0x371   :  { %v344_v31 = vor.u32 1.1754944e-38, %v343_v28  ;;  %vm342_vm2 = vcmp.eq.f32.partialorder %v341_v29, 8.507059e+37 }
 0x375   :  { %v2896_v23 = vpop.eup %2895 }
 0x376   :  { %v333_v24 = vmul.f32 %v2896_v23, %v331_v22  ;;  %vm338_vm14 = vweird.f32 %v2896_v23 }
 0x377   :  { %vm339_vm1 = vmor %vm337_vm15, %vm338_vm14 }
 0x378   :  { %v334_v25 = vsub.f32 1.0, %v333_v24 }
 0x37a   :  { %v335_v26 = vmul.f32 %v2896_v23, %v334_v25 }
 0x37c   :  { %v336_v27 = vadd.f32 %v2896_v23, %v335_v26 }
 0x37e   :  { %v340_v30 = vsel %vm339_vm1, %v2896_v23, %v336_v27 }
 0x37f   :  { %v345_v33 = vsel %vm342_vm2, %v344_v31, %v340_v30 }
 0x380   :  { %v358_v40 = vsub.f32 1.0, %v345_v33  ;;  %v364_v44 = vmul.f32 %v345_v33, %v299_v13 }
 0x3d4   :  { %v349_v32 = vpop.permute.xlu0 %348 }
 0x3d5   :  { %v351_v34 = vmul.f32 %v349_v32, %v345_v33 }
 0x3d7   :  { %353 = vrot.lane.b32.xlu1 %v351_v34, %s3084_s21 }
 0x449   :  { %v354_v35 = vpop.permute.xlu1 %353 }
 0x44a   :  { %v356_v36 = vadd.f32 %v354_v35, %v3248_v37 }
 0x44c   :  { %2897 = vtanh.f32 %v356_v36 }
 0x452   :  { %v2898_v38 = vpop.eup %2897 }
 0x453   :  { %360 = vrot.lane.b32.xlu2 %v2898_v38, %s3085_s22 }
 0x4ad   :  { %v361_v42 = vpop.permute.xlu2 %360 }
 0x4ae   :  { %v363_v46 = vmul.f32 %v361_v42, %v358_v40 }
 0x4b0   :  { %v365_v48 = vadd.f32 %v364_v44, %v363_v46 }
 0x4b2   :  { %367 = vrot.lane.b32.xlu0 %v365_v48, %s3085_s22 }
 0x524   :  { %v368_v51 = vpop.permute.xlu0 %367 }
 0x525   :  { %370 = vst.msk [vmem:[#allocation2 + $0x8] sm:$0xff] %vm237_vm13, %v368_v51  ;;  %2758 = vmatmul.msk.f32.vlgmr.msrb.gmra.mxu0 %vm237_vm13, %v368_v51 }
 0x5a2   :  { %v390_v52 = vpop.f32.mrf.mxu0 }
 0x5a3   :  { %v391_v53 = vadd.f32 %v3265_v50, %v390_v52 }
 0x5a5   :  { %414 = vrot.lane.b32.xlu1 %v391_v53, %s3084_s21  ;;  %v393_v37 = vadd.f32 %v391_v53, %v3250_v39 }
 0x5a7   :  { %v2759_v54 = vmul.f32 -1.442695, %v393_v37 }
 0x5a9   :  { %2899 = vpow2.f32 %v2759_v54 }
 0x5af   :  { %v2900_v55 = vpop.eup %2899 }
 0x5b0   :  { %v397_v56 = vadd.f32 1.0, %v2900_v55 }
 0x5b2   :  { %2901 = vrcp.f32 %v397_v56  ;;  %v409_v62 = vand.u32 2147483648, %v397_v56  ;;  %vm403_vm4 = vweird.f32 %v397_v56  ;;  %v407_v63 = vand.u32 2147483647, %v397_v56 }
 0x5b4   :  { %v410_v1 = vor.u32 1.1754944e-38, %v409_v62  ;;  %vm408_vm6 = vcmp.eq.f32.partialorder %v407_v63, 8.507059e+37 }
 0x5b8   :  { %v2902_v57 = vpop.eup %2901 }
 0x5b9   :  { %v399_v58 = vmul.f32 %v2902_v57, %v397_v56  ;;  %vm404_vm3 = vweird.f32 %v2902_v57 }
 0x5ba   :  { %vm405_vm5 = vmor %vm403_vm4, %vm404_vm3 }
 0x5bb   :  { %v400_v59 = vsub.f32 1.0, %v399_v58 }
 0x5bd   :  { %v401_v60 = vmul.f32 %v2902_v57, %v400_v59 }
 0x5bf   :  { %v402_v61 = vadd.f32 %v2902_v57, %v401_v60 }
 0x5c1   :  { %v406_v0 = vsel %vm405_vm5, %v2902_v57, %v402_v61 }
 0x5c2   :  { %v411_v3 = vsel %vm408_vm6, %v410_v1, %v406_v0 }
 0x5c3   :  { %v424_v8 = vsub.f32 1.0, %v411_v3  ;;  %v430_v10 = vmul.f32 %v411_v3, %v365_v48 }
 0x617   :  { %v415_v2 = vpop.permute.xlu1 %414 }
 0x618   :  { %v417_v4 = vmul.f32 %v415_v2, %v411_v3 }
 0x61a   :  { %419 = vrot.lane.b32.xlu2 %v417_v4, %s3084_s21 }
 0x674   :  { %v420_v5 = vpop.permute.xlu2 %419 }
 0x675   :  { %v422_v6 = vadd.f32 %v420_v5, %v3250_v39 }
 0x677   :  { %2903 = vtanh.f32 %v422_v6 }
 0x67d   :  { %v2904_v7 = vpop.eup %2903 }
 0x67e   :  { %426 = vrot.lane.b32.xlu0 %v2904_v7, %s3085_s22 }
 0x6f0   :  { %v427_v9 = vpop.permute.xlu0 %426 }
 0x6f1   :  { %v429_v11 = vmul.f32 %v427_v9, %v424_v8 }
 0x6f3   :  { %v431_v12 = vadd.f32 %v430_v10, %v429_v11  ;;  %v778_v10 = vld [vmem:[%s3956_s3 + $0x18] sm:$0xff]  ;;  %v777_v11 = vld [vmem:[%s3956_s3 + $0x10] sm:$0xff] }
 0x6f4   :  { %820 = vmatpush.msrb.mxu3 %v778_v10 }
 0x6f5   :  { %433 = vrot.lane.b32.xlu1 %v431_v12, %s3085_s22 }
 0x6f6   :  { %821 = vmatpush.msrb.mxu3 %v777_v11 }
 0x767   :  { %v434_v13 = vpop.permute.xlu1 %433 }
 0x768   :  { %436 = vst.msk [vmem:[#allocation2 + $0x10] sm:$0xff] %vm237_vm13, %v434_v13  ;;  %2760 = vmatmul.msk.f32.vlgmr.msra.gmra.mxu1 %vm237_vm13, %v434_v13 }
 0x7e5   :  { %v456_v15 = vpop.f32.mrf.mxu1 }
 0x7e6   :  { %v457_v17 = vadd.f32 %v3265_v50, %v456_v15  ;;  %v767_v15 = vld [vmem:[#allocation2] sm:$0xff] }
 0x7e8   :  { %480 = vrot.lane.b32.xlu2 %v457_v17, %s3084_s21  ;;  %v459_v39 = vadd.f32 %v457_v17, %v3252_v41  ;;  %v768_v17 = vld [vmem:[#allocation2 + $0x8] sm:$0xff] }
 0x7ea   :  { %v2761_v18 = vmul.f32 -1.442695, %v459_v39  ;;  %v769_v39 = vld [vmem:[#allocation2 + $0x10] sm:$0xff] }
 0x7ec   :  { %2905 = vpow2.f32 %v2761_v18 }
 0x7f2   :  { %v2906_v19 = vpop.eup %2905 }
 0x7f3   :  { %v463_v20 = vadd.f32 1.0, %v2906_v19 }
 0x7f5   :  { %2907 = vrcp.f32 %v463_v20  ;;  %v475_v26 = vand.u32 2147483648, %v463_v20  ;;  %vm469_vm8 = vweird.f32 %v463_v20  ;;  %v473_v27 = vand.u32 2147483647, %v463_v20 }
 0x7f7   :  { %v476_v29 = vor.u32 1.1754944e-38, %v475_v26  ;;  %vm474_vm10 = vcmp.eq.f32.partialorder %v473_v27, 8.507059e+37 }
 0x7fb   :  { %v2908_v21 = vpop.eup %2907 }
 0x7fc   :  { %v465_v22 = vmul.f32 %v2908_v21, %v463_v20  ;;  %vm470_vm7 = vweird.f32 %v2908_v21 }
 0x7fd   :  { %vm471_vm9 = vmor %vm469_vm8, %vm470_vm7 }
 0x7fe   :  { %v466_v23 = vsub.f32 1.0, %v465_v22 }
 0x800   :  { %v467_v24 = vmul.f32 %v2908_v21, %v466_v23 }
 0x802   :  { %v468_v25 = vadd.f32 %v2908_v21, %v467_v24 }
 0x804   :  { %v472_v28 = vsel %vm471_vm9, %v2908_v21, %v468_v25 }
 0x805   :  { %v477_v31 = vsel %vm474_vm10, %v476_v29, %v472_v28 }
 0x806   :  { %v490_v36 = vsub.f32 1.0, %v477_v31  ;;  %v496_v40 = vmul.f32 %v477_v31, %v431_v12  ;;  %v775_v12 = vld [vmem:[%s3956_s3] sm:$0xff] }
 0x842   :  { %v481_v30 = vpop.permute.xlu2 %480 }
 0x843   :  { %v483_v32 = vmul.f32 %v481_v30, %v477_v31 }
 0x845   :  { %485 = vrot.lane.b32.xlu0 %v483_v32, %s3084_s21 }
 0x8b7   :  { %v486_v33 = vpop.permute.xlu0 %485 }
 0x8b8   :  { %v488_v34 = vadd.f32 %v486_v33, %v3252_v41 }
 0x8ba   :  { %2909 = vtanh.f32 %v488_v34 }
 0x8c0   :  { %v2910_v35 = vpop.eup %2909 }
 0x8c1   :  { %492 = vrot.lane.b32.xlu1 %v2910_v35, %s3085_s22 }
 0x933   :  { %v493_v38 = vpop.permute.xlu1 %492 }
 0x934   :  { %v495_v42 = vmul.f32 %v493_v38, %v490_v36 }
 0x936   :  { %v497_v44 = vadd.f32 %v496_v40, %v495_v42 }
 0x938   :  { %499 = vrot.lane.b32.xlu2 %v497_v44, %s3085_s22 }
 0x992   :  { %v500_v46 = vpop.permute.xlu2 %499 }
 0x993   :  { %502 = vst.msk [vmem:[#allocation2 + $0x18] sm:$0xff] %vm237_vm13, %v500_v46  ;;  %2762 = vmatmul.msk.f32.vlgmr.msra.gmra.mxu2 %vm237_vm13, %v500_v46 }
 0x99a   :  { %v770_v18 = vld [vmem:[#allocation2 + $0x18] sm:$0xff] }
 0xa16   :  { %v522_v48 = vpop.f32.mrf.mxu2 }
 0xa17   :  { %v523_v51 = vadd.f32 %v3265_v50, %v522_v48 }
 0xa19   :  { %546 = vrot.lane.b32.xlu0 %v523_v51, %s3084_s21  ;;  %v525_v41 = vadd.f32 %v523_v51, %v3254_v43 }
 0xa1b   :  { %v2763_v52 = vmul.f32 -1.442695, %v525_v41 }
 0xa1d   :  { %2911 = vpow2.f32 %v2763_v52 }
 0xa23   :  { %v2912_v53 = vpop.eup %2911 }
 0xa24   :  { %v529_v37 = vadd.f32 1.0, %v2912_v53  ;;  %v3340_v53 = vld [vmem:[%s3954_s7 + $0x38] sm:$0xff] }
 0xa25   :  { %871 = vmatpush.msra.mxu1 %v3340_v53  ;;  %935 = vmatpush.msra.mxu2 %v3340_v53 }
 0xa26   :  { %2913 = vrcp.f32 %v529_v37  ;;  %v541_v59 = vand.u32 2147483648, %v529_v37  ;;  %vm535_vm12 = vweird.f32 %v529_v37  ;;  %v539_v60 = vand.u32 2147483647, %v529_v37 }
 0xa28   :  { %v542_v62 = vor.u32 1.1754944e-38, %v541_v59  ;;  %vm540_vm15 = vcmp.eq.f32.partialorder %v539_v60, 8.507059e+37  ;;  %v3382_v59 = vld [vmem:[%s3955_s9 + $0x1] ss:$0 sm:$0xff] }
 0xa2c   :  { %v2914_v54 = vpop.eup %2913 }
 0xa2d   :  { %v531_v55 = vmul.f32 %v2914_v54, %v529_v37  ;;  %vm536_vm11 = vweird.f32 %v2914_v54  ;;  %v3352_v37 = vld [vmem:[%s3954_s7 + $0x28] sm:$0xff] }
 0xa2e   :  { %vm537_vm14 = vmor %vm535_vm12, %vm536_vm11 }
 0xa2f   :  { %v532_v56 = vsub.f32 1.0, %v531_v55 }
 0xa31   :  { %v533_v57 = vmul.f32 %v2914_v54, %v532_v56 }
 0xa33   :  { %v534_v58 = vadd.f32 %v2914_v54, %v533_v57 }
 0xa35   :  { %v538_v61 = vsel %vm537_vm14, %v2914_v54, %v534_v58  ;;  %v3359_v54 = vld [vmem:[%s3954_s7 + $0x20] sm:$0xff] }
 0xa36   :  { %v543_v0 = vsel %vm540_vm15, %v542_v62, %v538_v61 }
 0xa37   :  { %v556_v5 = vsub.f32 1.0, %v543_v0  ;;  %v562_v7 = vmul.f32 %v543_v0, %v497_v44 }
 0xa8b   :  { %v547_v63 = vpop.permute.xlu0 %546 }
 0xa8c   :  { %v549_v1 = vmul.f32 %v547_v63, %v543_v0 }
 0xa8e   :  { %551 = vrot.lane.b32.xlu1 %v549_v1, %s3084_s21 }
 0xb00   :  { %v552_v2 = vpop.permute.xlu1 %551 }
 0xb01   :  { %v554_v3 = vadd.f32 %v552_v2, %v3254_v43  ;;  %v776_v43 = vld [vmem:[%s3956_s3 + $0x8] sm:$0xff] }
 0xb02   :  { %822 = vmatpush.msrb.mxu3 %v776_v43 }
 0xb03   :  { %2915 = vtanh.f32 %v554_v3 }
 0xb04   :  { %823 = vmatpush.msrb.mxu3 %v775_v12 }
 0xb09   :  { %v2916_v4 = vpop.eup %2915 }
 0xb0a   :  { %558 = vrot.lane.b32.xlu2 %v2916_v4, %s3085_s22 }
 0xb64   :  { %v559_v6 = vpop.permute.xlu2 %558 }
 0xb65   :  { %v561_v8 = vmul.f32 %v559_v6, %v556_v5 }
 0xb67   :  { %v563_v9 = vadd.f32 %v562_v7, %v561_v8 }
 0xb69   :  { %565 = vrot.lane.b32.xlu0 %v563_v9, %s3085_s22 }
 0xbdb   :  { %v566_v13 = vpop.permute.xlu0 %565 }
 0xbdc   :  { %568 = vst.msk [vmem:[#allocation2 + $0x20] sm:$0xff] %vm237_vm13, %v566_v13  ;;  %2764 = vmatmul.msk.f32.vlgmr.msra.gmra.mxu3 %vm237_vm13, %v566_v13 }
 0xbe3   :  { %v771_v19 = vld [vmem:[#allocation2 + $0x20] sm:$0xff] }
 0xbe4   :  { %2771 = vmatmul.msk.f32.vlgmr.msrb.gmra.mxu3 %vm237_vm13, %v767_v15 }
 0xbec   :  { %2772 = vmatmul.msk.f32.gmra.mxu3 %vm237_vm13, %v768_v17 }
 0xbf4   :  { %2773 = vmatmul.msk.f32.gmra.mxu3 %vm237_vm13, %v769_v39 }
 0xbfc   :  { %2774 = vmatmul.msk.f32.gmra.mxu3 %vm237_vm13, %v770_v18 }
 0xc04   :  { %2775 = vmatmul.msk.f32.gmra.mxu3 %vm237_vm13, %v771_v19 }
 0xc5f   :  { %v588_v20 = vpop.f32.mrf.mxu3 }
 0xc60   :  { %v589_v21 = vadd.f32 %v3265_v50, %v588_v20 }
 0xc62   :  { %612 = vrot.lane.b32.xlu1 %v589_v21, %s3084_s21  ;;  %v591_v22 = vadd.f32 %v589_v21, %v3256_v45 }
 0xc64   :  { %v2765_v23 = vmul.f32 -1.442695, %v591_v22 }
 0xc66   :  { %2917 = vpow2.f32 %v2765_v23 }
 0xc67   :  { %v825_v3 = vpop.f32.mrf.mxu3 }
 0xc6c   :  { %v2918_v24 = vpop.eup %2917 }
 0xc6d   :  { %v595_v25 = vadd.f32 1.0, %v2918_v24 }
 0xc6f   :  { %2919 = vrcp.f32 %v595_v25  ;;  %v607_v31 = vand.u32 2147483648, %v595_v25  ;;  %vm601_vm2 = vweird.f32 %v595_v25  ;;  %v605_v32 = vand.u32 2147483647, %v595_v25 }
 0xc71   :  { %v608_v34 = vor.u32 1.1754944e-38, %v607_v31  ;;  %vm606_vm4 = vcmp.eq.f32.partialorder %v605_v32, 8.507059e+37 }
 0xc75   :  { %v2920_v26 = vpop.eup %2919 }
 0xc76   :  { %v597_v27 = vmul.f32 %v2920_v26, %v595_v25  ;;  %vm602_vm1 = vweird.f32 %v2920_v26 }
 0xc77   :  { %vm603_vm3 = vmor %vm601_vm2, %vm602_vm1 }
 0xc78   :  { %v598_v28 = vsub.f32 1.0, %v597_v27 }
 0xc7a   :  { %v599_v29 = vmul.f32 %v2920_v26, %v598_v28 }
 0xc7c   :  { %v600_v30 = vadd.f32 %v2920_v26, %v599_v29 }
 0xc7e   :  { %v604_v33 = vsel %vm603_vm3, %v2920_v26, %v600_v30 }
 0xc7f   :  { %v609_v36 = vsel %vm606_vm4, %v608_v34, %v604_v33 }
 0xc80   :  { %v622_v46 = vsub.f32 1.0, %v609_v36  ;;  %v628_v51 = vmul.f32 %v609_v36, %v563_v9 }
 0xcd4   :  { %v613_v35 = vpop.permute.xlu1 %612 }
 0xcd5   :  { %v615_v38 = vmul.f32 %v613_v35, %v609_v36 }
 0xcd7   :  { %617 = vrot.lane.b32.xlu2 %v615_v38, %s3084_s21 }
 0xd31   :  { %v618_v40 = vpop.permute.xlu2 %617 }
 0xd32   :  { %v620_v42 = vadd.f32 %v618_v40, %v3256_v45  ;;  %v3345_v45 = vld [vmem:[%s3954_s7 + $0x30] sm:$0xff] }
 0xd33   :  { %872 = vmatpush.msra.mxu1 %v3345_v45  ;;  %936 = vmatpush.msra.mxu2 %v3345_v45 }
 0xd34   :  { %2921 = vtanh.f32 %v620_v42 }
 0xd35   :  { %873 = vmatpush.msra.mxu1 %v3352_v37  ;;  %937 = vmatpush.msra.mxu2 %v3352_v37 }
 0xd37   :  { %874 = vmatpush.msra.mxu1 %v3359_v54  ;;  %938 = vmatpush.msra.mxu2 %v3359_v54 }
 0xd3a   :  { %v2922_v44 = vpop.eup %2921 }
 0xd3b   :  { %624 = vrot.lane.b32.xlu0 %v2922_v44, %s3085_s22 }
 0xdad   :  { %v625_v48 = vpop.permute.xlu0 %624 }
 0xdae   :  { %v627_v41 = vmul.f32 %v625_v48, %v622_v46 }
 0xdb0   :  { %v3333_v52 = vadd.f32 %v628_v51, %v627_v41 }
 0xdb2   :  { %631 = vrot.lane.b32.xlu1 %v3333_v52, %s3085_s22 }
 0xe24   :  { %v632_v55 = vpop.permute.xlu1 %631 }
 0xe25   :  { %634 = vst.msk [vmem:[#allocation2 + $0x28] sm:$0xff] %vm237_vm13, %v632_v55  ;;  %2766 = vmatmul.msk.f32.vlgmr.msrb.gmra.mxu1 %vm237_vm13, %v632_v55 }
 0xe26   :  { %999 = vmatpush.msrb.mxu1 %v3340_v53 }
 0xe28   :  { %1000 = vmatpush.msrb.mxu1 %v3345_v45 }
 0xe2a   :  { %1001 = vmatpush.msrb.mxu1 %v3352_v37 }
 0xe2c   :  { %v772_v56 = vld [vmem:[#allocation2 + $0x28] sm:$0xff]  ;;  %1002 = vmatpush.msrb.mxu1 %v3359_v54 }
 0xe2d   :  { %2776 = vmatmul.msk.f32.gmra.mxu3 %vm237_vm13, %v772_v56  ;;  %875 = vmatmul.f32.vlgmr.msra.gmra.mxu1 %v3083_v16 }
 0xe2e   :  { %1127 = vmatpush.msra.mxu1 %v3340_v53 }
 0xe30   :  { %1128 = vmatpush.msra.mxu1 %v3345_v45 }
 0xe32   :  { %1129 = vmatpush.msra.mxu1 %v3352_v37 }
 0xe34   :  { %1130 = vmatpush.msra.mxu1 %v3359_v54 }
 0xea2   :  { %v654_v57 = vpop.f32.mrf.mxu1 }
 0xea3   :  { %v655_v58 = vadd.f32 %v3265_v50, %v654_v57  ;;  %v3390_v50 = vld [vmem:[%s3953_s8 + $0x1] ss:$0 sm:$0xff] }
 0xea4   :  { %v826_v4 = vadd.f32 %v3390_v50, %v825_v3 }
 0xea5   :  { %678 = vrot.lane.b32.xlu2 %v655_v58, %s3084_s21  ;;  %v657_v62 = vadd.f32 %v655_v58, %v3258_v47 }
 0xea7   :  { %v2767_v63 = vmul.f32 -1.442695, %v657_v62 }
 0xea9   :  { %2923 = vpow2.f32 %v2767_v63  ;;  %v828_v63 = vpop.f32.mrf.mxu3 }
 0xeaa   :  { %v876_v60 = vpop.f32.mrf.mxu1 }
 0xeab   :  { %v877_v61 = vadd.f32 %v3382_v59, %v876_v60 }
 0xead   :  { %900 = vrot.lane.b32.xlu0 %v877_v61, %s3084_s21  ;;  %v879_v6 = vadd.f32 %v877_v61, %v826_v4 }
 0xeaf   :  { %v2924_v0 = vpop.eup %2923  ;;  %v2784_v8 = vmul.f32 -1.442695, %v879_v6 }
 0xeb0   :  { %v661_v1 = vadd.f32 1.0, %v2924_v0  ;;  %v829_v0 = vadd.f32 %v3390_v50, %v828_v63 }
 0xeb2   :  { %2925 = vrcp.f32 %v661_v1  ;;  %v673_v11 = vand.u32 2147483648, %v661_v1  ;;  %vm667_vm6 = vweird.f32 %v661_v1  ;;  %v671_v43 = vand.u32 2147483647, %v661_v1 }
 0xeb3   :  { %2927 = vpow2.f32 %v2784_v8 }
 0xeb4   :  { %v674_v15 = vor.u32 1.1754944e-38, %v673_v11  ;;  %vm672_vm8 = vcmp.eq.f32.partialorder %v671_v43, 8.507059e+37 }
 0xeb8   :  { %v2926_v2 = vpop.eup %2925 }
 0xeb9   :  { %v663_v5 = vmul.f32 %v2926_v2, %v661_v1  ;;  %vm668_vm5 = vweird.f32 %v2926_v2  ;;  %v2928_v12 = vpop.eup %2927 }
 0xeba   :  { %vm669_vm7 = vmor %vm667_vm6, %vm668_vm5  ;;  %v883_v17 = vadd.f32 1.0, %v2928_v12 }
 0xebb   :  { %v664_v7 = vsub.f32 1.0, %v663_v5 }
 0xebc   :  { %2929 = vrcp.f32 %v883_v17  ;;  %v895_v25 = vand.u32 2147483648, %v883_v17  ;;  %vm889_vm10 = vweird.f32 %v883_v17  ;;  %v893_v26 = vand.u32 2147483647, %v883_v17 }
 0xebd   :  { %v665_v9 = vmul.f32 %v2926_v2, %v664_v7 }
 0xebe   :  { %v896_v28 = vor.u32 1.1754944e-38, %v895_v25  ;;  %vm894_vm12 = vcmp.eq.f32.partialorder %v893_v26, 8.507059e+37 }
 0xebf   :  { %v666_v10 = vadd.f32 %v2926_v2, %v665_v9 }
 0xec1   :  { %v670_v13 = vsel %vm669_vm7, %v2926_v2, %v666_v10 }
 0xec2   :  { %v675_v18 = vsel %vm672_vm8, %v674_v15, %v670_v13  ;;  %v2930_v20 = vpop.eup %2929 }
 0xec3   :  { %v885_v21 = vmul.f32 %v2930_v20, %v883_v17  ;;  %vm890_vm9 = vweird.f32 %v2930_v20  ;;  %v688_v40 = vsub.f32 1.0, %v675_v18  ;;  %v694_v44 = vmul.f32 %v675_v18, %v3333_v52 }
 0xec4   :  { %vm891_vm11 = vmor %vm889_vm10, %vm890_vm9 }
 0xec5   :  { %v886_v22 = vsub.f32 1.0, %v885_v21 }
 0xec7   :  { %v887_v23 = vmul.f32 %v2930_v20, %v886_v22 }
 0xec9   :  { %v888_v24 = vadd.f32 %v2930_v20, %v887_v23 }
 0xecb   :  { %v892_v27 = vsel %vm891_vm11, %v2930_v20, %v888_v24 }
 0xecc   :  { %v897_v30 = vsel %vm894_vm12, %v896_v28, %v892_v27  ;;  %v831_v28 = vpop.f32.mrf.mxu3 }
 0xecd   :  { %v916_v41 = vmul.f32 0.0, %v897_v30 }
 0xeff   :  { %v679_v39 = vpop.permute.xlu2 %678 }
 0xf00   :  { %v681_v19 = vmul.f32 %v679_v39, %v675_v18 }
 0xf02   :  { %683 = vrot.lane.b32.xlu1 %v681_v19, %s3084_s21 }
 0xf1f   :  { %v901_v29 = vpop.permute.xlu0 %900 }
 0xf20   :  { %v903_v31 = vmul.f32 %v901_v29, %v897_v30  ;;  %v832_v29 = vadd.f32 %v3390_v50, %v831_v28 }
 0xf22   :  { %905 = vrot.lane.b32.xlu2 %v903_v31, %s3084_s21 }
 0xf74   :  { %v684_v32 = vpop.permute.xlu1 %683 }
 0xf75   :  { %v686_v33 = vadd.f32 %v684_v32, %v3258_v47  ;;  %v910_v47 = vsub.f32 1.0, %v897_v30 }
 0xf77   :  { %2931 = vtanh.f32 %v686_v33 }
 0xf7c   :  { %v906_v34 = vpop.permute.xlu2 %905 }
 0xf7d   :  { %v2932_v35 = vpop.eup %2931  ;;  %v908_v36 = vadd.f32 %v906_v34, %v826_v4 }
 0xf7e   :  { %690 = vrot.lane.b32.xlu0 %v2932_v35, %s3085_s22 }
 0xf7f   :  { %2933 = vtanh.f32 %v908_v36 }
 0xf85   :  { %v2934_v38 = vpop.eup %2933 }
 0xf86   :  { %912 = vrot.lane.b32.xlu1 %v2934_v38, %s3085_s22 }
 0xff0   :  { %v691_v42 = vpop.permute.xlu0 %690 }
 0xff1   :  { %v693_v46 = vmul.f32 %v691_v42, %v688_v40 }
 0xff3   :  { %v3399_v48 = vadd.f32 %v694_v44, %v693_v46 }
 0xff5   :  { %697 = vrot.lane.b32.xlu2 %v3399_v48, %s3085_s22 }
 0xff8   :  { %v913_v51 = vpop.permute.xlu1 %912 }
 0xff9   :  { %v915_v55 = vmul.f32 %v913_v51, %v910_v47 }
 0xffb   :  { %v917_v56 = vadd.f32 %v916_v41, %v915_v55 }
 0xffd   :  { %919 = vrot.lane.b32.xlu0 %v917_v56, %s3085_s22 }
0x104f   :  { %v698_v57 = vpop.permute.xlu2 %697 }
0x1050   :  { %700 = vst.msk [vmem:[#allocation2 + $0x30] sm:$0xff] %vm237_vm13, %v698_v57  ;;  %2768 = vmatmul.msk.f32.vlgmr.msrb.gmra.mxu2 %vm237_vm13, %v698_v57 }
0x1051   :  { %1063 = vmatpush.msrb.mxu2 %v3340_v53 }
0x1053   :  { %1064 = vmatpush.msrb.mxu2 %v3345_v45 }
0x1055   :  { %1065 = vmatpush.msrb.mxu2 %v3352_v37 }
0x1057   :  { %v773_v52 = vld [vmem:[#allocation2 + $0x30] sm:$0xff]  ;;  %1066 = vmatpush.msrb.mxu2 %v3359_v54 }
0x1058   :  { %2777 = vmatmul.msk.f32.gmra.mxu3 %vm237_vm13, %v773_v52 }
0x106f   :  { %v920_v58 = vpop.permute.xlu0 %919 }
0x1070   :  { %2785 = vmatmul.msk.f32.vlgmr.msra.gmra.mxu2 %vm237_vm13, %v920_v58 }
0x1071   :  { %1191 = vmatpush.msra.mxu2 %v3340_v53 }
0x1073   :  { %1192 = vmatpush.msra.mxu2 %v3345_v45 }
0x1075   :  { %1193 = vmatpush.msra.mxu2 %v3352_v37 }
0x1077   :  { %1194 = vmatpush.msra.mxu2 %v3359_v54 }
0x10d3   :  { %v3416_v60 = vpop.f32.mrf.mxu2 }
0x10f3   :  { %v940_v61 = vpop.f32.mrf.mxu2 }
0x10f4   :  { %v941_v62 = vadd.f32 %v3382_v59, %v940_v61 }
0x10f6   :  { %964 = vrot.lane.b32.xlu1 %v941_v62, %s3084_s21  ;;  %v943_v1 = vadd.f32 %v941_v62, %v829_v0 }
0x10f8   :  { %v2786_v2 = vmul.f32 -1.442695, %v943_v1 }
0x10fa   :  { %2935 = vpow2.f32 %v2786_v2 }
0x1100   :  { %v2936_v3 = vpop.eup %2935 }
0x1101   :  { %v947_v4 = vadd.f32 1.0, %v2936_v3 }
0x1103   :  { %2937 = vrcp.f32 %v947_v4  ;;  %v959_v10 = vand.u32 2147483648, %v947_v4  ;;  %vm953_vm15 = vweird.f32 %v947_v4  ;;  %v957_v11 = vand.u32 2147483647, %v947_v4 }
0x1105   :  { %v960_v12 = vor.u32 1.1754944e-38, %v959_v10  ;;  %vm958_vm2 = vcmp.eq.f32.partialorder %v957_v11, 8.507059e+37 }
0x1109   :  { %v2938_v5 = vpop.eup %2937 }
0x110a   :  { %v949_v6 = vmul.f32 %v2938_v5, %v947_v4  ;;  %vm954_vm14 = vweird.f32 %v2938_v5  ;;  %v834_v4 = vpop.f32.mrf.mxu3 }
0x110b   :  { %vm955_vm1 = vmor %vm953_vm15, %vm954_vm14 }
0x110c   :  { %v950_v7 = vsub.f32 1.0, %v949_v6 }
0x110e   :  { %v951_v8 = vmul.f32 %v2938_v5, %v950_v7 }
0x1110   :  { %v952_v9 = vadd.f32 %v2938_v5, %v951_v8 }
0x1112   :  { %v956_v43 = vsel %vm955_vm1, %v2938_v5, %v952_v9  ;;  %v835_v5 = vadd.f32 %v3390_v50, %v834_v4 }
0x1113   :  { %v961_v15 = vsel %vm958_vm2, %v960_v12, %v956_v43 }
0x1114   :  { %v974_v20 = vsub.f32 1.0, %v961_v15  ;;  %v980_v22 = vmul.f32 %v961_v15, %v917_v56 }
0x1168   :  { %v965_v13 = vpop.permute.xlu1 %964 }
0x1169   :  { %v967_v17 = vmul.f32 %v965_v13, %v961_v15 }
0x116b   :  { %969 = vrot.lane.b32.xlu2 %v967_v17, %s3084_s21 }
0x11c5   :  { %v970_v39 = vpop.permute.xlu2 %969 }
0x11c6   :  { %v972_v18 = vadd.f32 %v970_v39, %v829_v0 }
0x11c8   :  { %2939 = vtanh.f32 %v972_v18 }
0x11ce   :  { %v2940_v19 = vpop.eup %2939 }
0x11cf   :  { %976 = vrot.lane.b32.xlu0 %v2940_v19, %s3085_s22 }
0x1241   :  { %v977_v21 = vpop.permute.xlu0 %976 }
0x1242   :  { %v979_v23 = vmul.f32 %v977_v21, %v974_v20 }
0x1244   :  { %v981_v24 = vadd.f32 %v980_v22, %v979_v23 }
0x1246   :  { %983 = vrot.lane.b32.xlu1 %v981_v24, %s3085_s22 }
0x12b8   :  { %v984_v25 = vpop.permute.xlu1 %983 }
0x12b9   :  { %2787 = vmatmul.msk.f32.vlgmr.msrb.gmra.mxu1 %vm237_vm13, %v984_v25 }
0x12ba   :  { %1255 = vmatpush.msrb.mxu1 %v3340_v53 }
0x12bc   :  { %1256 = vmatpush.msrb.mxu1 %v3345_v45 }
0x12be   :  { %1257 = vmatpush.msrb.mxu1 %v3352_v37 }
0x12c0   :  { %1258 = vmatpush.msrb.mxu1 %v3359_v54 }
0x1336   :  { %v1004_v26 = vpop.f32.mrf.mxu1 }
0x1337   :  { %v1005_v27 = vadd.f32 %v3382_v59, %v1004_v26 }
0x1339   :  { %1028 = vrot.lane.b32.xlu2 %v1005_v27, %s3084_s21  ;;  %v1007_v30 = vadd.f32 %v1005_v27, %v832_v29 }
0x133b   :  { %v2788_v31 = vmul.f32 -1.442695, %v1007_v30 }
0x133d   :  { %2941 = vpow2.f32 %v2788_v31 }
0x1343   :  { %v2942_v32 = vpop.eup %2941 }
0x1344   :  { %v1011_v33 = vadd.f32 1.0, %v2942_v32 }
0x1346   :  { %2943 = vrcp.f32 %v1011_v33  ;;  %v1023_v42 = vand.u32 2147483648, %v1011_v33  ;;  %vm1017_vm4 = vweird.f32 %v1011_v33  ;;  %v1021_v44 = vand.u32 2147483647, %v1011_v33 }
0x1348   :  { %v1024_v47 = vor.u32 1.1754944e-38, %v1023_v42  ;;  %vm1022_vm6 = vcmp.eq.f32.partialorder %v1021_v44, 8.507059e+37 }
0x134c   :  { %v2944_v34 = vpop.eup %2943 }
0x134d   :  { %v1013_v35 = vmul.f32 %v2944_v34, %v1011_v33  ;;  %vm1018_vm3 = vweird.f32 %v2944_v34 }
0x134e   :  { %vm1019_vm5 = vmor %vm1017_vm4, %vm1018_vm3 }
0x134f   :  { %v1014_v36 = vsub.f32 1.0, %v1013_v35 }
0x1351   :  { %v1015_v38 = vmul.f32 %v2944_v34, %v1014_v36 }
0x1353   :  { %v1016_v40 = vadd.f32 %v2944_v34, %v1015_v38 }
0x1355   :  { %v1020_v46 = vsel %vm1019_vm5, %v2944_v34, %v1016_v40 }
0x1356   :  { %v1025_v41 = vsel %vm1022_vm6, %v1024_v47, %v1020_v46 }
0x1357   :  { %v1038_v58 = vsub.f32 1.0, %v1025_v41  ;;  %v1044_v62 = vmul.f32 %v1025_v41, %v981_v24 }
0x1393   :  { %v1029_v51 = vpop.permute.xlu2 %1028 }
0x1394   :  { %v1031_v55 = vmul.f32 %v1029_v51, %v1025_v41 }
0x1396   :  { %1033 = vrot.lane.b32.xlu0 %v1031_v55, %s3084_s21 }
0x1408   :  { %v1034_v56 = vpop.permute.xlu0 %1033 }
0x1409   :  { %v1036_v57 = vadd.f32 %v1034_v56, %v832_v29  ;;  %v837_v29 = vpop.f32.mrf.mxu3 }
0x140a   :  { %v838_v30 = vadd.f32 %v3390_v50, %v837_v29 }
0x140b   :  { %2945 = vtanh.f32 %v1036_v57 }
0x1411   :  { %v2946_v52 = vpop.eup %2945 }
0x1412   :  { %1040 = vrot.lane.b32.xlu1 %v2946_v52, %s3085_s22 }
0x1484   :  { %v1041_v61 = vpop.permute.xlu1 %1040 }
0x1485   :  { %v1043_v63 = vmul.f32 %v1041_v61, %v1038_v58 }
0x1487   :  { %v1045_v0 = vadd.f32 %v1044_v62, %v1043_v63 }
0x1489   :  { %1047 = vrot.lane.b32.xlu2 %v1045_v0, %s3085_s22 }
0x14e3   :  { %v1048_v1 = vpop.permute.xlu2 %1047 }
0x14e4   :  { %2789 = vmatmul.msk.f32.vlgmr.msrb.gmra.mxu2 %vm237_vm13, %v1048_v1 }
0x14e5   :  { %1319 = vmatpush.msrb.mxu2 %v3340_v53 }
0x14e7   :  { %1320 = vmatpush.msrb.mxu2 %v3345_v45 }
0x14e9   :  { %1321 = vmatpush.msrb.mxu2 %v3352_v37 }
0x14eb   :  { %1322 = vmatpush.msrb.mxu2 %v3359_v54 }
0x1567   :  { %v1068_v2 = vpop.f32.mrf.mxu2 }
0x1568   :  { %v1069_v3 = vadd.f32 %v3382_v59, %v1068_v2 }
0x156a   :  { %1092 = vrot.lane.b32.xlu0 %v1069_v3, %s3084_s21  ;;  %v1071_v6 = vadd.f32 %v1069_v3, %v835_v5 }
0x156c   :  { %v2790_v7 = vmul.f32 -1.442695, %v1071_v6 }
0x156e   :  { %2947 = vpow2.f32 %v2790_v7 }
0x1574   :  { %v2948_v8 = vpop.eup %2947 }
0x1575   :  { %v1075_v9 = vadd.f32 1.0, %v2948_v8 }
0x1577   :  { %2949 = vrcp.f32 %v1075_v9  ;;  %v1087_v54 = vand.u32 2147483648, %v1075_v9  ;;  %vm1081_vm8 = vweird.f32 %v1075_v9  ;;  %v1085_v43 = vand.u32 2147483647, %v1075_v9 }
0x1579   :  { %v1088_v13 = vor.u32 1.1754944e-38, %v1087_v54  ;;  %vm1086_vm10 = vcmp.eq.f32.partialorder %v1085_v43, 8.507059e+37 }
0x157d   :  { %v2950_v53 = vpop.eup %2949 }
0x157e   :  { %v1077_v45 = vmul.f32 %v2950_v53, %v1075_v9  ;;  %vm1082_vm7 = vweird.f32 %v2950_v53 }
0x157f   :  { %vm1083_vm9 = vmor %vm1081_vm8, %vm1082_vm7 }
0x1580   :  { %v1078_v10 = vsub.f32 1.0, %v1077_v45 }
0x1582   :  { %v1079_v37 = vmul.f32 %v2950_v53, %v1078_v10 }
0x1584   :  { %v1080_v11 = vadd.f32 %v2950_v53, %v1079_v37 }
0x1586   :  { %v1084_v12 = vsel %vm1083_vm9, %v2950_v53, %v1080_v11 }
0x1587   :  { %v1089_v17 = vsel %vm1086_vm10, %v1088_v13, %v1084_v12 }
0x1588   :  { %v1102_v21 = vsub.f32 1.0, %v1089_v17  ;;  %v1108_v23 = vmul.f32 %v1089_v17, %v1045_v0 }
0x15dc   :  { %v1093_v15 = vpop.permute.xlu0 %1092 }
0x15dd   :  { %v1095_v39 = vmul.f32 %v1093_v15, %v1089_v17 }
0x15df   :  { %1097 = vrot.lane.b32.xlu1 %v1095_v39, %s3084_s21 }
0x1651   :  { %v1098_v18 = vpop.permute.xlu1 %1097 }
0x1652   :  { %v1100_v19 = vadd.f32 %v1098_v18, %v835_v5  ;;  %v840_v5 = vpop.f32.mrf.mxu3 }
0x1653   :  { %v841_v6 = vadd.f32 %v3390_v50, %v840_v5 }
0x1654   :  { %2951 = vtanh.f32 %v1100_v19 }
0x165a   :  { %v2952_v20 = vpop.eup %2951 }
0x165b   :  { %1104 = vrot.lane.b32.xlu2 %v2952_v20, %s3085_s22 }
0x16b5   :  { %v1105_v22 = vpop.permute.xlu2 %1104 }
0x16b6   :  { %v1107_v24 = vmul.f32 %v1105_v22, %v1102_v21  ;;  %v3079_v22 = vld [vmem:[%s3955_s9] ss:$0 sm:$0xff] }
0x16b8   :  { %v1109_v25 = vadd.f32 %v1108_v23, %v1107_v24  ;;  %v721_v23 = vadd.f32 %v3079_v22, %v3416_v60 }
0x16ba   :  { %1111 = vrot.lane.b32.xlu0 %v1109_v25, %s3085_s22 }
0x172c   :  { %v1112_v26 = vpop.permute.xlu0 %1111 }
0x172d   :  { %2791 = vmatmul.msk.f32.vlgmr.msra.gmra.mxu1 %vm237_vm13, %v1112_v26 }
0x17aa   :  { %v1132_v27 = vpop.f32.mrf.mxu1 }
0x17ab   :  { %v1133_v28 = vadd.f32 %v3382_v59, %v1132_v27 }
0x17ad   :  { %1156 = vrot.lane.b32.xlu1 %v1133_v28, %s3084_s21  ;;  %v1135_v31 = vadd.f32 %v1133_v28, %v838_v30 }
0x17af   :  { %v2792_v32 = vmul.f32 -1.442695, %v1135_v31 }
0x17b1   :  { %2953 = vpow2.f32 %v2792_v32 }
0x17b7   :  { %v2954_v33 = vpop.eup %2953 }
0x17b8   :  { %v1139_v34 = vadd.f32 1.0, %v2954_v33 }
0x17ba   :  { %2955 = vrcp.f32 %v1139_v34  ;;  %v1151_v44 = vand.u32 2147483648, %v1139_v34  ;;  %vm1145_vm12 = vweird.f32 %v1139_v34  ;;  %v1149_v46 = vand.u32 2147483647, %v1139_v34 }
0x17bc   :  { %v1152_v51 = vor.u32 1.1754944e-38, %v1151_v44  ;;  %vm1150_vm15 = vcmp.eq.f32.partialorder %v1149_v46, 8.507059e+37 }
0x17c0   :  { %v2956_v35 = vpop.eup %2955 }
0x17c1   :  { %v1141_v36 = vmul.f32 %v2956_v35, %v1139_v34  ;;  %vm1146_vm11 = vweird.f32 %v2956_v35 }
0x17c2   :  { %vm1147_vm14 = vmor %vm1145_vm12, %vm1146_vm11 }
0x17c3   :  { %v1142_v38 = vsub.f32 1.0, %v1141_v36 }
0x17c5   :  { %v1143_v40 = vmul.f32 %v2956_v35, %v1142_v38 }
0x17c7   :  { %v1144_v42 = vadd.f32 %v2956_v35, %v1143_v40 }
0x17c9   :  { %v1148_v47 = vsel %vm1147_vm14, %v2956_v35, %v1144_v42 }
0x17ca   :  { %v1153_v55 = vsel %vm1150_vm15, %v1152_v51, %v1148_v47 }
0x17cb   :  { %v1166_v61 = vsub.f32 1.0, %v1153_v55  ;;  %v1172_v63 = vmul.f32 %v1153_v55, %v1109_v25 }
0x181f   :  { %v1157_v41 = vpop.permute.xlu1 %1156 }
0x1820   :  { %v1159_v56 = vmul.f32 %v1157_v41, %v1153_v55 }
0x1822   :  { %1161 = vrot.lane.b32.xlu2 %v1159_v56, %s3084_s21 }
0x187c   :  { %v1162_v57 = vpop.permute.xlu2 %1161 }
0x187d   :  { %v1164_v52 = vadd.f32 %v1162_v57, %v838_v30  ;;  %v723_v30 = vadd.f32 %v721_v23, %v3260_v49  ;;  %v843_v57 = vpop.f32.mrf.mxu3 }
0x187f   :  { %2957 = vtanh.f32 %v1164_v52  ;;  %v2769_v31 = vmul.f32 -1.442695, %v723_v30  ;;  %v844_v52 = vadd.f32 %v3390_v50, %v843_v57 }
0x1885   :  { %v2958_v58 = vpop.eup %2957 }
0x1886   :  { %1168 = vrot.lane.b32.xlu0 %v2958_v58, %s3085_s22 }
0x18f8   :  { %v1169_v62 = vpop.permute.xlu0 %1168 }
0x18f9   :  { %v1171_v0 = vmul.f32 %v1169_v62, %v1166_v61 }
0x18fb   :  { %v1173_v1 = vadd.f32 %v1172_v63, %v1171_v0 }
0x18fd   :  { %1175 = vrot.lane.b32.xlu1 %v1173_v1, %s3085_s22 }
0x196f   :  { %v1176_v2 = vpop.permute.xlu1 %1175 }
0x1970   :  { %2793 = vmatmul.msk.f32.vlgmr.msra.gmra.mxu2 %vm237_vm13, %v1176_v2 }
0x19f3   :  { %v1196_v3 = vpop.f32.mrf.mxu2 }
0x19f4   :  { %v1197_v4 = vadd.f32 %v3382_v59, %v1196_v3 }
0x19f6   :  { %1220 = vrot.lane.b32.xlu2 %v1197_v4, %s3084_s21  ;;  %v1199_v7 = vadd.f32 %v1197_v4, %v841_v6 }
0x19f8   :  { %v2794_v8 = vmul.f32 -1.442695, %v1199_v7 }
0x19fa   :  { %2959 = vpow2.f32 %v2794_v8 }
0x1a00   :  { %v2960_v9 = vpop.eup %2959 }
0x1a01   :  { %v1203_v53 = vadd.f32 1.0, %v2960_v9 }
0x1a03   :  { %2961 = vrcp.f32 %v1203_v53  ;;  %v1215_v43 = vand.u32 2147483648, %v1203_v53  ;;  %vm1209_vm2 = vweird.f32 %v1203_v53  ;;  %v1213_v12 = vand.u32 2147483647, %v1203_v53 }
0x1a05   :  { %v1216_v15 = vor.u32 1.1754944e-38, %v1215_v43  ;;  %vm1214_vm4 = vcmp.eq.f32.partialorder %v1213_v12, 8.507059e+37 }
0x1a09   :  { %v2962_v45 = vpop.eup %2961 }
0x1a0a   :  { %v1205_v10 = vmul.f32 %v2962_v45, %v1203_v53  ;;  %vm1210_vm1 = vweird.f32 %v2962_v45 }
0x1a0b   :  { %vm1211_vm3 = vmor %vm1209_vm2, %vm1210_vm1 }
0x1a0c   :  { %v1206_v37 = vsub.f32 1.0, %v1205_v10 }
0x1a0e   :  { %v1207_v11 = vmul.f32 %v2962_v45, %v1206_v37 }
0x1a10   :  { %v1208_v54 = vadd.f32 %v2962_v45, %v1207_v11 }
0x1a12   :  { %v1212_v13 = vsel %vm1211_vm3, %v2962_v45, %v1208_v54 }
0x1a13   :  { %v1217_v39 = vsel %vm1214_vm4, %v1216_v15, %v1212_v13 }
0x1a14   :  { %v1230_v24 = vsub.f32 1.0, %v1217_v39  ;;  %v1236_v26 = vmul.f32 %v1217_v39, %v1173_v1 }
0x1a50   :  { %v1221_v17 = vpop.permute.xlu2 %1220 }
0x1a51   :  { %v1223_v18 = vmul.f32 %v1221_v17, %v1217_v39 }
0x1a53   :  { %1225 = vrot.lane.b32.xlu0 %v1223_v18, %s3084_s21 }
0x1ac5   :  { %v1226_v19 = vpop.permute.xlu0 %1225 }
0x1ac6   :  { %v1228_v20 = vadd.f32 %v1226_v19, %v841_v6  ;;  %v3492_v19 = vld [vmem:[%s3954_s7 + $0x50] sm:$0xff] }
0x1ac8   :  { %2963 = vtanh.f32 %v1228_v20  ;;  %v3503_v20 = vld [vmem:[%s3954_s7 + $0x40] sm:$0xff] }
0x1ac9   :  { %2965 = vpow2.f32 %v2769_v31  ;;  %v101_v31 = vld [vmem:[%s3957_s1] sm:$0xff] }
0x1ace   :  { %v2964_v21 = vpop.eup %2963 }
0x1acf   :  { %1232 = vrot.lane.b32.xlu1 %v2964_v21, %s3085_s22  ;;  %v2966_v32 = vpop.eup %2965 }
0x1ad0   :  { %v727_v60 = vadd.f32 1.0, %v2966_v32 }
0x1ad2   :  { %2967 = vrcp.f32 %v727_v60  ;;  %v739_v44 = vand.u32 2147483648, %v727_v60  ;;  %vm733_vm6 = vweird.f32 %v727_v60  ;;  %v737_v46 = vand.u32 2147483647, %v727_v60 }
0x1ad4   :  { %v740_v51 = vor.u32 1.1754944e-38, %v739_v44  ;;  %vm738_vm8 = vcmp.eq.f32.partialorder %v737_v46, 8.507059e+37 }
0x1ad7   :  { %744 = vrot.lane.b32.xlu1 %v721_v23, %s3084_s21 }
0x1ad8   :  { %v2968_v33 = vpop.eup %2967 }
0x1ad9   :  { %v729_v34 = vmul.f32 %v2968_v33, %v727_v60  ;;  %vm734_vm5 = vweird.f32 %v2968_v33 }
0x1ada   :  { %vm735_vm7 = vmor %vm733_vm6, %vm734_vm5 }
0x1adb   :  { %v730_v35 = vsub.f32 1.0, %v729_v34 }
0x1add   :  { %v731_v36 = vmul.f32 %v2968_v33, %v730_v35 }
0x1adf   :  { %v732_v40 = vadd.f32 %v2968_v33, %v731_v36 }
0x1ae1   :  { %v736_v47 = vsel %vm735_vm7, %v2968_v33, %v732_v40 }
0x1ae2   :  { %v741_v55 = vsel %vm738_vm8, %v740_v51, %v736_v47 }
0x1ae3   :  { %v754_v13 = vsub.f32 1.0, %v741_v55  ;;  %v760_v17 = vmul.f32 %v741_v55, %v3399_v48  ;;  %v3497_v48 = vld [vmem:[%s3954_s7 + $0x48] sm:$0xff] }
0x1b41   :  { %v1233_v25 = vpop.permute.xlu1 %1232 }
0x1b42   :  { %v1235_v27 = vmul.f32 %v1233_v25, %v1230_v24 }
0x1b44   :  { %v3464_v28 = vadd.f32 %v1236_v26, %v1235_v27 }
0x1b46   :  { %1239 = vrot.lane.b32.xlu2 %v3464_v28, %s3085_s22 }
0x1b49   :  { %v745_v41 = vpop.permute.xlu1 %744 }
0x1b4a   :  { %v747_v56 = vmul.f32 %v745_v41, %v741_v55 }
0x1ba0   :  { %v1240_v29 = vpop.permute.xlu2 %1239 }
0x1ba1   :  { %2795 = vmatmul.msk.f32.vlgmr.msrb.gmra.mxu1 %vm237_vm13, %v1240_v29 }
0x1c1e   :  { %v1260_v38 = vpop.f32.mrf.mxu1 }
0x1c1f   :  { %v1261_v42 = vadd.f32 %v3382_v59, %v1260_v38  ;;  %v1396_v38 = vld [vmem:[%s3958_s4 + $0x8] sm:$0xff] }
0x1c20   :  { %1440 = vmatpush.msra.mxu2 %v1396_v38  ;;  %2869 = vmatpush.msra.mxu3 %v1396_v38 }
0x1c21   :  { %1284 = vrot.lane.b32.xlu0 %v1261_v42, %s3084_s21  ;;  %v1263_v58 = vadd.f32 %v1261_v42, %v844_v52 }
0x1c23   :  { %v2796_v61 = vmul.f32 -1.442695, %v1263_v58 }
0x1c25   :  { %2969 = vpow2.f32 %v2796_v61 }
0x1c29   :  { %749 = vrot.lane.b32.xlu0 %v747_v56, %s3084_s21 }
0x1c2b   :  { %v2970_v62 = vpop.eup %2969 }
0x1c2c   :  { %v1267_v63 = vadd.f32 1.0, %v2970_v62 }
0x1c2e   :  { %2971 = vrcp.f32 %v1267_v63  ;;  %v1279_v5 = vand.u32 2147483648, %v1267_v63  ;;  %vm1273_vm10 = vweird.f32 %v1267_v63  ;;  %v1277_v6 = vand.u32 2147483647, %v1267_v63 }
0x1c30   :  { %v1280_v8 = vor.u32 1.1754944e-38, %v1279_v5  ;;  %vm1278_vm12 = vcmp.eq.f32.partialorder %v1277_v6, 8.507059e+37  ;;  %v1369_v5 = vld [vmem:[%s3959_s5 + $0x18] sm:$0xff]  ;;  %v1368_v6 = vld [vmem:[%s3959_s5 + $0x10] sm:$0xff] }
0x1c31   :  { %1387 = vmatpush.msra.mxu1 %v1369_v5 }
0x1c33   :  { %1388 = vmatpush.msra.mxu1 %v1368_v6 }
0x1c34   :  { %v2972_v0 = vpop.eup %2971 }
0x1c35   :  { %v1269_v1 = vmul.f32 %v2972_v0, %v1267_v63  ;;  %vm1274_vm9 = vweird.f32 %v2972_v0 }
0x1c36   :  { %vm1275_vm11 = vmor %vm1273_vm10, %vm1274_vm9 }
0x1c37   :  { %v1270_v2 = vsub.f32 1.0, %v1269_v1  ;;  %v3548_v1 = vld [vmem:[%s3955_s9 + $0x2] ss:$0 sm:$0xff] }
0x1c39   :  { %v1271_v3 = vmul.f32 %v2972_v0, %v1270_v2 }
0x1c3b   :  { %v1272_v4 = vadd.f32 %v2972_v0, %v1271_v3 }
0x1c3d   :  { %v1276_v7 = vsel %vm1275_vm11, %v2972_v0, %v1272_v4  ;;  %v102_v4 = vld [vmem:[%s3957_s1 + $0x8] sm:$0xff] }
0x1c3e   :  { %v1281_v53 = vsel %vm1278_vm12, %v1280_v8, %v1276_v7  ;;  %v1367_v7 = vld [vmem:[%s3959_s5 + $0x8] sm:$0xff]  ;;  %v1366_v8 = vld [vmem:[%s3959_s5] sm:$0xff] }
0x1c3f   :  { %v1294_v21 = vsub.f32 1.0, %v1281_v53  ;;  %v1300_v23 = vmul.f32 %v1281_v53, %v3464_v28  ;;  %1389 = vmatpush.msra.mxu1 %v1367_v7 }
0x1c41   :  { %1390 = vmatpush.msra.mxu1 %v1366_v8 }
0x1c93   :  { %v1285_v9 = vpop.permute.xlu0 %1284 }
0x1c94   :  { %v1287_v45 = vmul.f32 %v1285_v9, %v1281_v53 }
0x1c96   :  { %1289 = vrot.lane.b32.xlu2 %v1287_v45, %s3084_s21 }
0x1c9b   :  { %v750_v10 = vpop.permute.xlu0 %749 }
0x1c9c   :  { %v752_v37 = vadd.f32 %v750_v10, %v3260_v49  ;;  %v3486_v49 = vld [vmem:[%s3954_s7 + $0x58] sm:$0xff] }
0x1c9d   :  { %1492 = vmatpush.msra.mxu0 %v3486_v49  ;;  %1559 = vmatpush.msrb.mxu1 %v3486_v49 }
0x1c9e   :  { %2973 = vtanh.f32 %v752_v37 }
0x1c9f   :  { %1493 = vmatpush.msra.mxu0 %v3492_v19  ;;  %1560 = vmatpush.msrb.mxu1 %v3492_v19 }
0x1ca1   :  { %1494 = vmatpush.msra.mxu0 %v3497_v48  ;;  %1561 = vmatpush.msrb.mxu1 %v3497_v48 }
0x1ca3   :  { %1495 = vmatpush.msra.mxu0 %v3503_v20  ;;  %1562 = vmatpush.msrb.mxu1 %v3503_v20 }
0x1ca4   :  { %v2974_v11 = vpop.eup %2973 }
0x1ca5   :  { %756 = vrot.lane.b32.xlu2 %v2974_v11, %s3085_s22  ;;  %1626 = vmatpush.msrb.mxu0 %v3486_v49 }
0x1ca7   :  { %1627 = vmatpush.msrb.mxu0 %v3492_v19 }
0x1ca9   :  { %1628 = vmatpush.msrb.mxu0 %v3497_v48 }
0x1cab   :  { %1629 = vmatpush.msrb.mxu0 %v3503_v20 }
0x1cf0   :  { %v1290_v54 = vpop.permute.xlu2 %1289 }
0x1cf1   :  { %v1292_v43 = vadd.f32 %v1290_v54, %v844_v52 }
0x1cf3   :  { %2975 = vtanh.f32 %v1292_v43 }
0x1cf9   :  { %v2976_v12 = vpop.eup %2975 }
0x1cfa   :  { %1296 = vrot.lane.b32.xlu1 %v2976_v12, %s3085_s22 }
0x1cff   :  { %v757_v15 = vpop.permute.xlu2 %756 }
0x1d00   :  { %v759_v39 = vmul.f32 %v757_v15, %v754_v13  ;;  %v3590_v13 = vld [vmem:[%s3953_s8 + $0x2] ss:$0 sm:$0xff] }
0x1d02   :  { %v3479_v18 = vadd.f32 %v760_v17, %v759_v39 }
0x1d04   :  { %763 = vrot.lane.b32.xlu1 %v3479_v18, %s3085_s22 }
0x1d6c   :  { %v1297_v22 = vpop.permute.xlu1 %1296 }
0x1d6d   :  { %v1299_v24 = vmul.f32 %v1297_v22, %v1294_v21 }
0x1d6f   :  { %v3512_v25 = vadd.f32 %v1300_v23, %v1299_v24 }
0x1d71   :  { %1303 = vrot.lane.b32.xlu0 %v3512_v25, %s3085_s22 }
0x1d76   :  { %v764_v26 = vpop.permute.xlu1 %763 }
0x1d77   :  { %766 = vst.msk [vmem:[#allocation2 + $0x38] sm:$0xff] %vm237_vm13, %v764_v26  ;;  %2814 = vmatmul.msk.f32.vlgmr.msra.gmra.mxu0 %vm237_vm13, %v764_v26 }
0x1d78   :  { %1760 = vmatpush.msra.mxu0 %v3486_v49 }
0x1d7a   :  { %1761 = vmatpush.msra.mxu0 %v3492_v19 }
0x1d7c   :  { %1762 = vmatpush.msra.mxu0 %v3497_v48 }
0x1d7e   :  { %v774_v27 = vld [vmem:[#allocation2 + $0x38] sm:$0xff]  ;;  %1763 = vmatpush.msra.mxu0 %v3503_v20 }
0x1d7f   :  { %2778 = vmatmul.msk.f32.gmra.mxu3 %vm237_vm13, %v774_v27 }
0x1de3   :  { %v1304_v28 = vpop.permute.xlu0 %1303 }
0x1de4   :  { %2797 = vmatmul.msk.f32.vlgmr.msrb.gmra.mxu2 %vm237_vm13, %v1304_v28 }
0x1df4   :  { %v1497_v2 = vpop.f32.mrf.mxu0 }
0x1df5   :  { %v1498_v3 = vadd.f32 %v3548_v1, %v1497_v2 }
0x1e02   :  { %v846_v32 = vpop.f32.mrf.mxu3 }
0x1e03   :  { %v847_v60 = vadd.f32 %v3390_v50, %v846_v32 }
0x1e67   :  { %v1324_v29 = vpop.f32.mrf.mxu2 }
0x1e68   :  { %v1325_v30 = vadd.f32 %v3382_v59, %v1324_v29  ;;  %v1395_v59 = vld [vmem:[%s3958_s4] sm:$0xff] }
0x1e69   :  { %1441 = vmatpush.msra.mxu2 %v1395_v59  ;;  %2870 = vmatpush.msra.mxu3 %v1395_v59 }
0x1e6a   :  { %1348 = vrot.lane.b32.xlu2 %v1325_v30, %s3084_s21  ;;  %v1327_v33 = vadd.f32 %v1325_v30, %v847_v60 }
0x1e6b   :  { %1894 = vmatpush.msrb.mxu3 %v3486_v49 }
0x1e6c   :  { %v2798_v34 = vmul.f32 -1.442695, %v1327_v33 }
0x1e6d   :  { %1895 = vmatpush.msrb.mxu3 %v3492_v19 }
0x1e6e   :  { %2977 = vpow2.f32 %v2798_v34 }
0x1e6f   :  { %1896 = vmatpush.msrb.mxu3 %v3497_v48 }
0x1e71   :  { %1897 = vmatpush.msrb.mxu3 %v3503_v20 }
0x1e72   :  { %110 = vperm.xlu2 %2877, %v101_v31  }
0x1e74   :  { %v2978_v35 = vpop.eup %2977 }
0x1e75   :  { %v1331_v36 = vadd.f32 1.0, %v2978_v35 }
0x1e77   :  { %2979 = vrcp.f32 %v1331_v36  ;;  %v1343_v47 = vand.u32 2147483648, %v1331_v36  ;;  %vm1337_vm15 = vweird.f32 %v1331_v36  ;;  %v1341_v51 = vand.u32 2147483647, %v1331_v36 }
0x1e79   :  { %v1344_v55 = vor.u32 1.1754944e-38, %v1343_v47  ;;  %vm1342_vm2 = vcmp.eq.f32.partialorder %v1341_v51, 8.507059e+37 }
0x1e7d   :  { %v2980_v40 = vpop.eup %2979 }
0x1e7e   :  { %v1333_v50 = vmul.f32 %v2980_v40, %v1331_v36  ;;  %vm1338_vm14 = vweird.f32 %v2980_v40 }
0x1e7f   :  { %vm1339_vm1 = vmor %vm1337_vm15, %vm1338_vm14 }
0x1e80   :  { %v1334_v42 = vsub.f32 1.0, %v1333_v50 }
0x1e82   :  { %v1335_v44 = vmul.f32 %v2980_v40, %v1334_v42 }
0x1e84   :  { %v1336_v46 = vadd.f32 %v2980_v40, %v1335_v44 }
0x1e86   :  { %v1340_v41 = vsel %vm1339_vm1, %v2980_v40, %v1336_v46 }
0x1e87   :  { %v1345_v57 = vsel %vm1342_vm2, %v1344_v55, %v1340_v41  ;;  %v103_v41 = vld [vmem:[%s3957_s1 + $0x10] sm:$0xff] }
0x1e88   :  { %v1358_v9 = vsub.f32 1.0, %v1345_v57  ;;  %v1364_v45 = vmul.f32 %v1345_v57, %v3512_v25 }
0x1ec4   :  { %v1349_v56 = vpop.permute.xlu2 %1348 }
0x1ec5   :  { %v1351_v52 = vmul.f32 %v1349_v56, %v1345_v57 }
0x1ec7   :  { %1353 = vrot.lane.b32.xlu0 %v1351_v52, %s3084_s21 }
0x1ecc   :  { %v111_v58 = vpop.permute.xlu2 %110 }
0x1ecd   :  { %vm133_vm3 = vcmp.eq.s32.totalorder %v111_v58, %v3204_v14 }
0x1ece   :  { %v2739_v61 = vsel %vm133_vm3, 1.0, %v3083_v16 }
0x1ecf   :  { %2801 = vmatmul.msk.f32.vlgmr.msra.gmra.mxu2 %vm163_vm0, %v2739_v61 }
0x1f39   :  { %v1354_v62 = vpop.permute.xlu0 %1353 }
0x1f3a   :  { %v1356_v63 = vadd.f32 %v1354_v62, %v847_v60 }
0x1f3c   :  { %2981 = vtanh.f32 %v1356_v63 }
0x1f42   :  { %v2982_v0 = vpop.eup %2981 }
0x1f43   :  { %1360 = vrot.lane.b32.xlu1 %v2982_v0, %s3085_s22 }
0x1f4b   :  { %1521 = vrot.lane.b32.xlu1 %v1498_v3, %s3084_s21 }
0x1f52   :  { %v1443_v15 = vpop.f32.mrf.mxu2 }
0x1f53   :  { %113 = vperm.xlu1 %2876, %v102_v4   ;;  %v1444_v17 = vadd.f32 %v3590_v13, %v1443_v15 }
0x1fb5   :  { %v1361_v53 = vpop.permute.xlu1 %1360 }
0x1fb6   :  { %v1363_v10 = vmul.f32 %v1361_v53, %v1358_v9 }
0x1fb8   :  { %v3572_v37 = vadd.f32 %v1364_v45, %v1363_v10 }
0x1fba   :  { %1371 = vrot.lane.b32.xlu0 %v3572_v37, %s3085_s22 }
0x1fbd   :  { %v1522_v11 = vpop.permute.xlu1 %1521 }
0x1fc5   :  { %v114_v54 = vpop.permute.xlu1 %113 }
0x1fc6   :  { %vm134_vm4 = vcmp.eq.s32.totalorder %v114_v54, %v3204_v14 }
0x1fc7   :  { %v2740_v43 = vsel %vm134_vm4, 1.0, %v3083_v16 }
0x1fc8   :  { %2802 = vmatmul.msk.f32.gmra.mxu2 %vm163_vm0, %v2740_v43 }
0x202c   :  { %v3579_v12 = vpop.permute.xlu0 %1371 }
0x202d   :  { %2799 = vmatmul.msk.f32.vlgmr.msra.gmra.mxu1 %vm237_vm13, %v3579_v12 }
0x202e   :  { %1693 = vmatpush.msra.mxu1 %v3486_v49 }
0x2030   :  { %1694 = vmatpush.msra.mxu1 %v3492_v19 }
0x2032   :  { %1695 = vmatpush.msra.mxu1 %v3497_v48 }
0x2034   :  { %1696 = vmatpush.msra.mxu1 %v3503_v20 }
0x204b   :  { %v1446_v55 = vpop.f32.mrf.mxu2 }
0x204c   :  { %v1447_v56 = vadd.f32 %v3590_v13, %v1446_v55 }
0x20aa   :  { %v3593_v39 = vpop.f32.mrf.mxu1 }
0x20ab   :  { %v1474_v21 = vadd.f32 %v1444_v17, %v3593_v39  ;;  %v1544_v57 = vadd.f32 %v1447_v56, %v3593_v39 }
0x20ad   :  { %v1500_v22 = vadd.f32 %v1498_v3, %v1474_v21 }
0x20af   :  { %v2815_v23 = vmul.f32 -1.442695, %v1500_v22 }
0x20b1   :  { %2983 = vpow2.f32 %v2815_v23 }
0x20b7   :  { %v2984_v24 = vpop.eup %2983 }
0x20b8   :  { %v1504_v25 = vadd.f32 1.0, %v2984_v24 }
0x20ba   :  { %2985 = vrcp.f32 %v1504_v25  ;;  %v1516_v29 = vand.u32 2147483648, %v1504_v25  ;;  %v1514_v31 = vand.u32 2147483647, %v1504_v25  ;;  %vm1510_vm6 = vweird.f32 %v1504_v25 }
0x20bc   :  { %v1517_v60 = vor.u32 1.1754944e-38, %v1516_v29  ;;  %vm1515_vm8 = vcmp.eq.f32.partialorder %v1514_v31, 8.507059e+37 }
0x20c0   :  { %v2986_v26 = vpop.eup %2985 }
0x20c1   :  { %v1506_v27 = vmul.f32 %v2986_v26, %v1504_v25  ;;  %vm1511_vm5 = vweird.f32 %v2986_v26 }
0x20c2   :  { %vm1512_vm7 = vmor %vm1510_vm6, %vm1511_vm5 }
0x20c3   :  { %v1507_v28 = vsub.f32 1.0, %v1506_v27 }
0x20c5   :  { %v1508_v30 = vmul.f32 %v2986_v26, %v1507_v28  ;;  %v104_v28 = vld [vmem:[%s3957_s1 + $0x18] sm:$0xff] }
0x20c7   :  { %v1509_v32 = vadd.f32 %v2986_v26, %v1508_v30 }
0x20c9   :  { %v1513_v33 = vsel %vm1512_vm7, %v2986_v26, %v1509_v32 }
0x20ca   :  { %v1518_v34 = vsel %vm1515_vm8, %v1517_v60, %v1513_v33 }
0x20cb   :  { %v1524_v35 = vmul.f32 %v1522_v11, %v1518_v34  ;;  %v1531_v40 = vsub.f32 1.0, %v1518_v34  ;;  %v1537_v42 = vmul.f32 %v1518_v34, %v3479_v18 }
0x20cd   :  { %1526 = vrot.lane.b32.xlu2 %v1524_v35, %s3084_s21 }
0x2127   :  { %v1527_v36 = vpop.permute.xlu2 %1526 }
0x2128   :  { %v1529_v38 = vadd.f32 %v1527_v36, %v1474_v21 }
0x212a   :  { %2987 = vtanh.f32 %v1529_v38 }
0x2130   :  { %v2988_v59 = vpop.eup %2987 }
0x2131   :  { %1533 = vrot.lane.b32.xlu0 %v2988_v59, %s3085_s22 }
0x21a3   :  { %v1534_v50 = vpop.permute.xlu0 %1533 }
0x21a4   :  { %v1536_v44 = vmul.f32 %v1534_v50, %v1531_v40 }
0x21a6   :  { %v1538_v46 = vadd.f32 %v1537_v42, %v1536_v44 }
0x21a8   :  { %1540 = vrot.lane.b32.xlu2 %v1538_v46, %s3085_s22 }
0x2202   :  { %v1541_v47 = vpop.permute.xlu2 %1540 }
0x2203   :  { %1543 = vst.msk [vmem:[#allocation3] sm:$0xff] %vm237_vm13, %v1541_v47  ;;  %2816 = vmatmul.msk.f32.vlgmr.msrb.gmra.mxu1 %vm237_vm13, %v1541_v47 }
0x2204   :  { %1827 = vmatpush.msrb.mxu1 %v3486_v49 }
0x2206   :  { %1828 = vmatpush.msrb.mxu1 %v3492_v19 }
0x2208   :  { %1829 = vmatpush.msrb.mxu1 %v3497_v48 }
0x220a   :  { %1830 = vmatpush.msrb.mxu1 %v3503_v20 }
0x2280   :  { %v1564_v51 = vpop.f32.mrf.mxu1 }
0x2281   :  { %v1565_v18 = vadd.f32 %v3548_v1, %v1564_v51 }
0x2283   :  { %1588 = vrot.lane.b32.xlu0 %v1565_v18, %s3084_s21  ;;  %v1567_v52 = vadd.f32 %v1565_v18, %v1544_v57 }
0x2285   :  { %v2817_v58 = vmul.f32 -1.442695, %v1567_v52 }
0x2287   :  { %2989 = vpow2.f32 %v2817_v58 }
0x228b   :  { %116 = vperm.xlu0 %2875, %v103_v41  }
0x228d   :  { %v2990_v61 = vpop.eup %2989 }
0x228e   :  { %v1571_v62 = vadd.f32 1.0, %v2990_v61 }
0x2290   :  { %2991 = vrcp.f32 %v1571_v62  ;;  %v1583_v5 = vand.u32 2147483648, %v1571_v62  ;;  %vm1577_vm10 = vweird.f32 %v1571_v62  ;;  %v1581_v6 = vand.u32 2147483647, %v1571_v62 }
0x2292   :  { %v1584_v8 = vor.u32 1.1754944e-38, %v1583_v5  ;;  %vm1582_vm12 = vcmp.eq.f32.partialorder %v1581_v6, 8.507059e+37 }
0x2296   :  { %v2992_v63 = vpop.eup %2991 }
0x2297   :  { %v1573_v0 = vmul.f32 %v2992_v63, %v1571_v62  ;;  %vm1578_vm9 = vweird.f32 %v2992_v63 }
0x2298   :  { %vm1579_vm11 = vmor %vm1577_vm10, %vm1578_vm9 }
0x2299   :  { %v1574_v2 = vsub.f32 1.0, %v1573_v0  ;;  %v105_v0 = vld [vmem:[%s3957_s1 + $0x20] sm:$0xff] }
0x229b   :  { %v1575_v3 = vmul.f32 %v2992_v63, %v1574_v2 }
0x229d   :  { %v1576_v4 = vadd.f32 %v2992_v63, %v1575_v3 }
0x229f   :  { %v1580_v7 = vsel %vm1579_vm11, %v2992_v63, %v1576_v4 }
0x22a0   :  { %v1585_v53 = vsel %vm1582_vm12, %v1584_v8, %v1580_v7 }
0x22a1   :  { %v1598_v17 = vsub.f32 1.0, %v1585_v53  ;;  %v1604_v22 = vmul.f32 %v1585_v53, %v1538_v46 }
0x22f5   :  { %v1589_v9 = vpop.permute.xlu0 %1588 }
0x22f6   :  { %v1591_v45 = vmul.f32 %v1589_v9, %v1585_v53 }
0x22f8   :  { %1593 = vrot.lane.b32.xlu1 %v1591_v45, %s3084_s21 }
0x22fd   :  { %v117_v10 = vpop.permute.xlu0 %116 }
0x22fe   :  { %vm135_vm14 = vcmp.eq.s32.totalorder %v117_v10, %v3204_v14 }
0x22ff   :  { %v2741_v11 = vsel %vm135_vm14, 1.0, %v3083_v16 }
0x2300   :  { %2803 = vmatmul.msk.f32.gmra.mxu2 %vm163_vm0, %v2741_v11 }
0x236a   :  { %v1594_v54 = vpop.permute.xlu1 %1593 }
0x236b   :  { %v1596_v43 = vadd.f32 %v1594_v54, %v1544_v57 }
0x236d   :  { %2993 = vtanh.f32 %v1596_v43 }
0x2373   :  { %v2994_v15 = vpop.eup %2993 }
0x2374   :  { %1600 = vrot.lane.b32.xlu2 %v2994_v15, %s3085_s22 }
0x2383   :  { %v1449_v29 = vpop.f32.mrf.mxu2 }
0x2384   :  { %v1450_v30 = vadd.f32 %v3590_v13, %v1449_v29 }
0x23ce   :  { %v1601_v21 = vpop.permute.xlu2 %1600 }
0x23cf   :  { %v1603_v23 = vmul.f32 %v1601_v21, %v1598_v17 }
0x23d1   :  { %v1605_v24 = vadd.f32 %v1604_v22, %v1603_v23 }
0x23d3   :  { %1607 = vrot.lane.b32.xlu1 %v1605_v24, %s3085_s22 }
0x2445   :  { %v1608_v25 = vpop.permute.xlu1 %1607 }
0x2446   :  { %1610 = vst.msk [vmem:[#allocation3 + $0x8] sm:$0xff] %vm237_vm13, %v1608_v25  ;;  %2818 = vmatmul.msk.f32.vlgmr.msrb.gmra.mxu0 %vm237_vm13, %v1608_v25 }
0x2447   :  { %1961 = vmatpush.msrb.mxu0 %v3486_v49  ;;  %v1611_v49 = vadd.f32 %v1450_v30, %v3593_v39 }
0x2449   :  { %1962 = vmatpush.msrb.mxu0 %v3492_v19 }
0x244b   :  { %1963 = vmatpush.msrb.mxu0 %v3497_v48 }
0x244d   :  { %1964 = vmatpush.msrb.mxu0 %v3503_v20 }
0x24c3   :  { %v1631_v26 = vpop.f32.mrf.mxu0 }
0x24c4   :  { %v1632_v27 = vadd.f32 %v3548_v1, %v1631_v26 }
0x24c6   :  { %1655 = vrot.lane.b32.xlu2 %v1632_v27, %s3084_s21  ;;  %v1634_v19 = vadd.f32 %v1632_v27, %v1611_v49 }
0x24c8   :  { %v2819_v31 = vmul.f32 -1.442695, %v1634_v19 }
0x24ca   :  { %2995 = vpow2.f32 %v2819_v31 }
0x24ce   :  { %119 = vperm.xlu2 %2877, %v104_v28  }
0x24d0   :  { %v2996_v48 = vpop.eup %2995 }
0x24d1   :  { %v1638_v20 = vadd.f32 1.0, %v2996_v48 }
0x24d3   :  { %2997 = vrcp.f32 %v1638_v20  ;;  %v1650_v36 = vand.u32 2147483648, %v1638_v20  ;;  %vm1644_vm1 = vweird.f32 %v1638_v20  ;;  %v1648_v38 = vand.u32 2147483647, %v1638_v20 }
0x24d5   :  { %v1651_v40 = vor.u32 1.1754944e-38, %v1650_v36  ;;  %vm1649_vm3 = vcmp.eq.f32.partialorder %v1648_v38, 8.507059e+37 }
0x24d9   :  { %v2998_v32 = vpop.eup %2997 }
0x24da   :  { %v1640_v60 = vmul.f32 %v2998_v32, %v1638_v20  ;;  %vm1645_vm15 = vweird.f32 %v2998_v32 }
0x24db   :  { %vm1646_vm2 = vmor %vm1644_vm1, %vm1645_vm15 }
0x24dc   :  { %v1641_v33 = vsub.f32 1.0, %v1640_v60  ;;  %v106_v60 = vld [vmem:[%s3957_s1 + $0x28] sm:$0xff] }
0x24de   :  { %v1642_v34 = vmul.f32 %v2998_v32, %v1641_v33 }
0x24e0   :  { %v1643_v35 = vadd.f32 %v2998_v32, %v1642_v34 }
0x24e2   :  { %v1647_v59 = vsel %vm1646_vm2, %v2998_v32, %v1643_v35 }
0x24e3   :  { %v1652_v42 = vsel %vm1649_vm3, %v1651_v40, %v1647_v59 }
0x24e4   :  { %v1665_v55 = vsub.f32 1.0, %v1652_v42  ;;  %v1671_v57 = vmul.f32 %v1652_v42, %v1605_v24 }
0x2520   :  { %v1656_v50 = vpop.permute.xlu2 %1655 }
0x2521   :  { %v1658_v44 = vmul.f32 %v1656_v50, %v1652_v42 }
0x2523   :  { %1660 = vrot.lane.b32.xlu0 %v1658_v44, %s3084_s21 }
0x2528   :  { %v120_v46 = vpop.permute.xlu2 %119 }
0x2529   :  { %vm136_vm4 = vcmp.eq.s32.totalorder %v120_v46, %v3204_v14 }
0x252a   :  { %v2742_v47 = vsel %vm136_vm4, 1.0, %v3083_v16 }
0x252b   :  { %2804 = vmatmul.msk.f32.gmra.mxu2 %vm163_vm0, %v2742_v47 }
0x2595   :  { %v1661_v51 = vpop.permute.xlu0 %1660 }
0x2596   :  { %v1663_v18 = vadd.f32 %v1661_v51, %v1611_v49 }
0x2598   :  { %2999 = vtanh.f32 %v1663_v18 }
0x259e   :  { %v3000_v41 = vpop.eup %2999 }
0x259f   :  { %1667 = vrot.lane.b32.xlu1 %v3000_v41, %s3085_s22 }
0x25ae   :  { %v1452_v2 = vpop.f32.mrf.mxu2 }
0x25af   :  { %v1453_v3 = vadd.f32 %v3590_v13, %v1452_v2 }
0x25b1   :  { %v1678_v4 = vadd.f32 %v1453_v3, %v3593_v39 }
0x2611   :  { %v1668_v56 = vpop.permute.xlu1 %1667 }
0x2612   :  { %v1670_v52 = vmul.f32 %v1668_v56, %v1665_v55 }
0x2614   :  { %v1672_v58 = vadd.f32 %v1671_v57, %v1670_v52 }
0x2616   :  { %1674 = vrot.lane.b32.xlu0 %v1672_v58, %s3085_s22 }
0x2688   :  { %v1675_v61 = vpop.permute.xlu0 %1674 }
0x2689   :  { %1677 = vst.msk [vmem:[#allocation3 + $0x10] sm:$0xff] %vm237_vm13, %v1675_v61  ;;  %2820 = vmatmul.msk.f32.vlgmr.msra.gmra.mxu1 %vm237_vm13, %v1675_v61 }
0x2706   :  { %v1698_v62 = vpop.f32.mrf.mxu1 }
0x2707   :  { %v1699_v63 = vadd.f32 %v3548_v1, %v1698_v62 }
0x2709   :  { %1722 = vrot.lane.b32.xlu1 %v1699_v63, %s3084_s21  ;;  %v1701_v5 = vadd.f32 %v1699_v63, %v1678_v4 }
0x270b   :  { %v2821_v6 = vmul.f32 -1.442695, %v1701_v5 }
0x270d   :  { %3001 = vpow2.f32 %v2821_v6 }
0x2711   :  { %122 = vperm.xlu1 %2876, %v105_v0  }
0x2713   :  { %v3002_v7 = vpop.eup %3001 }
0x2714   :  { %v1705_v8 = vadd.f32 1.0, %v3002_v7  ;;  %v2024_v7 = vld [vmem:[%s3960_s6 + $0x18] sm:$0xff] }
0x2715   :  { %2066 = vmatpush.msra.mxu1 %v2024_v7 }
0x2716   :  { %3003 = vrcp.f32 %v1705_v8  ;;  %v1717_v54 = vand.u32 2147483648, %v1705_v8  ;;  %vm1711_vm6 = vweird.f32 %v1705_v8  ;;  %v1715_v43 = vand.u32 2147483647, %v1705_v8 }
0x2718   :  { %v1718_v17 = vor.u32 1.1754944e-38, %v1717_v54  ;;  %vm1716_vm8 = vcmp.eq.f32.partialorder %v1715_v43, 8.507059e+37  ;;  %v2015_v54 = vld [vmem:[#allocation3 + $0x10] sm:$0xff] }
0x271c   :  { %v3004_v9 = vpop.eup %3003 }
0x271d   :  { %v1707_v53 = vmul.f32 %v3004_v9, %v1705_v8  ;;  %vm1712_vm5 = vweird.f32 %v3004_v9  ;;  %v2023_v8 = vld [vmem:[%s3960_s6 + $0x10] sm:$0xff] }
0x271e   :  { %vm1713_vm7 = vmor %vm1711_vm6, %vm1712_vm5  ;;  %2067 = vmatpush.msra.mxu1 %v2023_v8 }
0x271f   :  { %v1708_v45 = vsub.f32 1.0, %v1707_v53  ;;  %v2021_v53 = vld [vmem:[%s3960_s6] sm:$0xff] }
0x2721   :  { %v1709_v10 = vmul.f32 %v3004_v9, %v1708_v45 }
0x2723   :  { %v1710_v11 = vadd.f32 %v3004_v9, %v1709_v10  ;;  %v2013_v10 = vld [vmem:[#allocation3] sm:$0xff] }
0x2725   :  { %v1714_v15 = vsel %vm1713_vm7, %v3004_v9, %v1710_v11  ;;  %v2022_v9 = vld [vmem:[%s3960_s6 + $0x8] sm:$0xff] }
0x2726   :  { %v1719_v22 = vsel %vm1716_vm8, %v1718_v17, %v1714_v15  ;;  %2068 = vmatpush.msra.mxu1 %v2022_v9  ;;  %v2014_v11 = vld [vmem:[#allocation3 + $0x8] sm:$0xff] }
0x2727   :  { %v1732_v29 = vsub.f32 1.0, %v1719_v22  ;;  %v1738_v49 = vmul.f32 %v1719_v22, %v1672_v58 }
0x2728   :  { %2069 = vmatpush.msra.mxu1 %v2021_v53  ;;  %v3770_v53 = vld [vmem:[%s3953_s8 + $0x3] ss:$0 sm:$0xff] }
0x277b   :  { %v1723_v21 = vpop.permute.xlu1 %1722 }
0x277c   :  { %v1725_v23 = vmul.f32 %v1723_v21, %v1719_v22  ;;  %v107_v22 = vld [vmem:[%s3957_s1 + $0x30] sm:$0xff] }
0x277e   :  { %1727 = vrot.lane.b32.xlu2 %v1725_v23, %s3084_s21 }
0x2783   :  { %v123_v24 = vpop.permute.xlu1 %122 }
0x2784   :  { %vm137_vm9 = vcmp.eq.s32.totalorder %v123_v24, %v3204_v14 }
0x2785   :  { %v2743_v25 = vsel %vm137_vm9, 1.0, %v3083_v16 }
0x2786   :  { %2805 = vmatmul.msk.f32.vlgmr.msra.gmra.mxu3 %vm163_vm0, %v2743_v25 }
0x27d8   :  { %v1728_v26 = vpop.permute.xlu2 %1727 }
0x27d9   :  { %v1730_v27 = vadd.f32 %v1728_v26, %v1678_v4 }
0x27db   :  { %3005 = vtanh.f32 %v1730_v27 }
0x27e1   :  { %v3006_v28 = vpop.eup %3005 }
0x27e2   :  { %1734 = vrot.lane.b32.xlu0 %v3006_v28, %s3085_s22 }
0x2809   :  { %v1455_v33 = vpop.f32.mrf.mxu3 }
0x280a   :  { %v1456_v34 = vadd.f32 %v3590_v13, %v1455_v33 }
0x280c   :  { %v1745_v35 = vadd.f32 %v1456_v34, %v3593_v39 }
0x2854   :  { %v1735_v30 = vpop.permute.xlu0 %1734 }
0x2855   :  { %v1737_v19 = vmul.f32 %v1735_v30, %v1732_v29 }
0x2857   :  { %v1739_v31 = vadd.f32 %v1738_v49, %v1737_v19 }
0x2859   :  { %1741 = vrot.lane.b32.xlu2 %v1739_v31, %s3085_s22 }
0x28b3   :  { %v1742_v48 = vpop.permute.xlu2 %1741 }
0x28b4   :  { %1744 = vst.msk [vmem:[#allocation3 + $0x18] sm:$0xff] %vm237_vm13, %v1742_v48  ;;  %2822 = vmatmul.msk.f32.vlgmr.msra.gmra.mxu0 %vm237_vm13, %v1742_v48 }
0x28bb   :  { %v2016_v43 = vld [vmem:[#allocation3 + $0x18] sm:$0xff] }
0x2931   :  { %v1765_v20 = vpop.f32.mrf.mxu0 }
0x2932   :  { %v1766_v32 = vadd.f32 %v3548_v1, %v1765_v20 }
0x2934   :  { %1789 = vrot.lane.b32.xlu0 %v1766_v32, %s3084_s21  ;;  %v1768_v36 = vadd.f32 %v1766_v32, %v1745_v35 }
0x2936   :  { %v2823_v38 = vmul.f32 -1.442695, %v1768_v36 }
0x2938   :  { %3007 = vpow2.f32 %v2823_v38 }
0x293c   :  { %125 = vperm.xlu0 %2875, %v106_v60  }
0x293e   :  { %v3008_v59 = vpop.eup %3007 }
0x293f   :  { %v1772_v40 = vadd.f32 1.0, %v3008_v59  ;;  %v108_v59 = vld [vmem:[%s3957_s1 + $0x38] sm:$0xff] }
0x2941   :  { %3009 = vrcp.f32 %v1772_v40  ;;  %v1784_v51 = vand.u32 2147483648, %v1772_v40  ;;  %vm1778_vm11 = vweird.f32 %v1772_v40  ;;  %v1782_v18 = vand.u32 2147483647, %v1772_v40 }
0x2943   :  { %v1785_v55 = vor.u32 1.1754944e-38, %v1784_v51  ;;  %vm1783_vm14 = vcmp.eq.f32.partialorder %v1782_v18, 8.507059e+37 }
0x2947   :  { %v3010_v50 = vpop.eup %3009 }
0x2948   :  { %v1774_v42 = vmul.f32 %v3010_v50, %v1772_v40  ;;  %vm1779_vm10 = vweird.f32 %v3010_v50 }
0x2949   :  { %vm1780_vm12 = vmor %vm1778_vm11, %vm1779_vm10 }
0x294a   :  { %v1775_v44 = vsub.f32 1.0, %v1774_v42 }
0x294c   :  { %v1776_v46 = vmul.f32 %v3010_v50, %v1775_v44 }
0x294e   :  { %v1777_v47 = vadd.f32 %v3010_v50, %v1776_v46 }
0x2950   :  { %v1781_v41 = vsel %vm1780_vm12, %v3010_v50, %v1777_v47 }
0x2951   :  { %v1786_v57 = vsel %vm1783_vm14, %v1785_v55, %v1781_v41 }
0x2952   :  { %v1799_v2 = vsub.f32 1.0, %v1786_v57  ;;  %v1805_v4 = vmul.f32 %v1786_v57, %v1739_v31 }
0x29a6   :  { %v1790_v56 = vpop.permute.xlu0 %1789 }
0x29a7   :  { %v1792_v52 = vmul.f32 %v1790_v56, %v1786_v57  ;;  %v3728_v57 = vld [vmem:[%s3954_s7 + $0x68] sm:$0xff] }
0x29a9   :  { %1794 = vrot.lane.b32.xlu1 %v1792_v52, %s3084_s21  ;;  %v3735_v52 = vld [vmem:[%s3954_s7 + $0x60] sm:$0xff] }
0x29ae   :  { %v126_v58 = vpop.permute.xlu0 %125 }
0x29af   :  { %vm138_vm15 = vcmp.eq.s32.totalorder %v126_v58, %v3204_v14 }
0x29b0   :  { %v2744_v61 = vsel %vm138_vm15, 1.0, %v3083_v16 }
0x29b1   :  { %2806 = vmatmul.msk.f32.gmra.mxu3 %vm163_vm0, %v2744_v61 }
0x2a1b   :  { %v1795_v62 = vpop.permute.xlu1 %1794 }
0x2a1c   :  { %v1797_v63 = vadd.f32 %v1795_v62, %v1745_v35 }
0x2a1e   :  { %3011 = vtanh.f32 %v1797_v63 }
0x2a24   :  { %v3012_v0 = vpop.eup %3011 }
0x2a25   :  { %1801 = vrot.lane.b32.xlu2 %v3012_v0, %s3085_s22 }
0x2a34   :  { %v1458_v23 = vpop.f32.mrf.mxu3 }
0x2a35   :  { %v1459_v24 = vadd.f32 %v3590_v13, %v1458_v23 }
0x2a37   :  { %v1812_v25 = vadd.f32 %v1459_v24, %v3593_v39 }
0x2a7f   :  { %v1802_v3 = vpop.permute.xlu2 %1801 }
0x2a80   :  { %v1804_v5 = vmul.f32 %v1802_v3, %v1799_v2 }
0x2a82   :  { %v3667_v6 = vadd.f32 %v1805_v4, %v1804_v5 }
0x2a84   :  { %1808 = vrot.lane.b32.xlu1 %v3667_v6, %s3085_s22 }
0x2af6   :  { %v1809_v45 = vpop.permute.xlu1 %1808 }
0x2af7   :  { %1811 = vst.msk [vmem:[#allocation3 + $0x20] sm:$0xff] %vm237_vm13, %v1809_v45  ;;  %2824 = vmatmul.msk.f32.vlgmr.msrb.gmra.mxu1 %vm237_vm13, %v1809_v45 }
0x2afe   :  { %v2017_v15 = vld [vmem:[#allocation3 + $0x20] sm:$0xff] }
0x2aff   :  { %2831 = vmatmul.msk.f32.vlgmr.msra.gmra.mxu1 %vm237_vm13, %v2013_v10 }
0x2b07   :  { %2832 = vmatmul.msk.f32.gmra.mxu1 %vm237_vm13, %v2014_v11 }
0x2b0f   :  { %2833 = vmatmul.msk.f32.gmra.mxu1 %vm237_vm13, %v2015_v54 }
0x2b17   :  { %2834 = vmatmul.msk.f32.gmra.mxu1 %vm237_vm13, %v2016_v43 }
0x2b1f   :  { %2835 = vmatmul.msk.f32.gmra.mxu1 %vm237_vm13, %v2017_v15 }
0x2b74   :  { %v1832_v17 = vpop.f32.mrf.mxu1 }
0x2b75   :  { %v1833_v21 = vadd.f32 %v3548_v1, %v1832_v17 }
0x2b77   :  { %1856 = vrot.lane.b32.xlu2 %v1833_v21, %s3084_s21  ;;  %v1835_v26 = vadd.f32 %v1833_v21, %v1812_v25 }
0x2b79   :  { %v2825_v27 = vmul.f32 -1.442695, %v1835_v26 }
0x2b7b   :  { %3013 = vpow2.f32 %v2825_v27 }
0x2b7c   :  { %v2071_v10 = vpop.f32.mrf.mxu1 }
0x2b7d   :  { %v2072_v11 = vadd.f32 %v3770_v53, %v2071_v10  ;;  %v3820_v10 = vld [vmem:[%s3962_s11] ss:$0 sm:$0xff] }
0x2b7f   :  { %128 = vperm.xlu2 %2877, %v107_v22  }
0x2b81   :  { %v3014_v28 = vpop.eup %3013 }
0x2b82   :  { %v1839_v29 = vadd.f32 1.0, %v3014_v28 }
0x2b84   :  { %3015 = vrcp.f32 %v1839_v29  ;;  %v1851_v20 = vand.u32 2147483648, %v1839_v29  ;;  %vm1845_vm2 = vweird.f32 %v1839_v29  ;;  %v1849_v32 = vand.u32 2147483647, %v1839_v29 }
0x2b86   :  { %v1852_v33 = vor.u32 1.1754944e-38, %v1851_v20  ;;  %vm1850_vm4 = vcmp.eq.f32.partialorder %v1849_v32, 8.507059e+37 }
0x2b8a   :  { %v3016_v30 = vpop.eup %3015 }
0x2b8b   :  { %v1841_v49 = vmul.f32 %v3016_v30, %v1839_v29  ;;  %vm1846_vm1 = vweird.f32 %v3016_v30 }
0x2b8c   :  { %vm1847_vm3 = vmor %vm1845_vm2, %vm1846_vm1 }
0x2b8d   :  { %v1842_v19 = vsub.f32 1.0, %v1841_v49 }
0x2b8f   :  { %v1843_v31 = vmul.f32 %v3016_v30, %v1842_v19 }
0x2b91   :  { %v1844_v48 = vadd.f32 %v3016_v30, %v1843_v31 }
0x2b93   :  { %v1848_v60 = vsel %vm1847_vm3, %v3016_v30, %v1844_v48 }
0x2b94   :  { %v1853_v35 = vsel %vm1850_vm4, %v1852_v33, %v1848_v60 }
0x2b95   :  { %v1866_v51 = vsub.f32 1.0, %v1853_v35  ;;  %v1872_v41 = vmul.f32 %v1853_v35, %v3667_v6 }
0x2bd1   :  { %v1857_v34 = vpop.permute.xlu2 %1856 }
0x2bd2   :  { %v1859_v36 = vmul.f32 %v1857_v34, %v1853_v35 }
0x2bd4   :  { %1861 = vrot.lane.b32.xlu0 %v1859_v36, %s3084_s21 }
0x2bd9   :  { %v129_v38 = vpop.permute.xlu2 %128 }
0x2bda   :  { %vm139_vm5 = vcmp.eq.s32.totalorder %v129_v38, %v3204_v14 }
0x2bdb   :  { %v2745_v40 = vsel %vm139_vm5, 1.0, %v3083_v16 }
0x2bdc   :  { %2807 = vmatmul.msk.f32.gmra.mxu3 %vm163_vm0, %v2745_v40  ;;  %131 = vperm.xlu0 %2875, %v108_v59  }
0x2c46   :  { %v1862_v50 = vpop.permute.xlu0 %1861 }
0x2c47   :  { %v1864_v42 = vadd.f32 %v1862_v50, %v1812_v25 }
0x2c49   :  { %3017 = vtanh.f32 %v1864_v42 }
0x2c4e   :  { %v132_v44 = vpop.permute.xlu0 %131 }
0x2c4f   :  { %v3018_v46 = vpop.eup %3017  ;;  %vm140_vm6 = vcmp.eq.s32.totalorder %v132_v44, %v3204_v14  ;;  %v3716_v14 = vld [vmem:[%s3954_s7 + $0x78] sm:$0xff] }
0x2c50   :  { %v2746_v47 = vsel %vm140_vm6, 1.0, %v3083_v16  ;;  %1868 = vrot.lane.b32.xlu1 %v3018_v46, %s3085_s22  ;;  %v3721_v16 = vld [vmem:[%s3954_s7 + $0x70] sm:$0xff]  ;;  %2117 = vmatpush.msra.mxu3 %v3716_v14 }
0x2c51   :  { %2808 = vmatmul.msk.f32.gmra.mxu3 %vm163_vm0, %v2746_v47  ;;  %2183 = vmatpush.msra.mxu0 %v3716_v14 }
0x2c52   :  { %2118 = vmatpush.msra.mxu3 %v3721_v16 }
0x2c53   :  { %2184 = vmatpush.msra.mxu0 %v3721_v16 }
0x2c54   :  { %2119 = vmatpush.msra.mxu3 %v3728_v57 }
0x2c55   :  { %2185 = vmatpush.msra.mxu0 %v3728_v57 }
0x2c56   :  { %2120 = vmatpush.msra.mxu3 %v3735_v52 }
0x2c57   :  { %2186 = vmatpush.msra.mxu0 %v3735_v52 }
0x2c5f   :  { %v1461_v62 = vpop.f32.mrf.mxu3 }
0x2c60   :  { %v1462_v5 = vadd.f32 %v3590_v13, %v1461_v62 }
0x2c62   :  { %v1879_v6 = vadd.f32 %v1462_v5, %v3593_v39  ;;  %v2639_v5 = vld [vmem:[%s3961_s10] sm:$0xff] }
0x2cc2   :  { %v1869_v18 = vpop.permute.xlu1 %1868 }
0x2cc3   :  { %v1871_v55 = vmul.f32 %v1869_v18, %v1866_v51 }
0x2cc5   :  { %v3709_v56 = vadd.f32 %v1872_v41, %v1871_v55 }
0x2cc7   :  { %1875 = vrot.lane.b32.xlu1 %v3709_v56, %s3085_s22 }
0x2cd4   :  { %v3754_v63 = vpop.f32.mrf.mxu3 }
0x2d39   :  { %v1876_v58 = vpop.permute.xlu1 %1875 }
0x2d3a   :  { %1878 = vst.msk [vmem:[#allocation3 + $0x28] sm:$0xff] %vm237_vm13, %v1876_v58  ;;  %2826 = vmatmul.msk.f32.vlgmr.msrb.gmra.mxu3 %vm237_vm13, %v1876_v58 }
0x2d3b   :  { %2249 = vmatpush.msrb.mxu3 %v3716_v14 }
0x2d3d   :  { %2250 = vmatpush.msrb.mxu3 %v3721_v16 }
0x2d3f   :  { %2251 = vmatpush.msrb.mxu3 %v3728_v57 }
0x2d41   :  { %v2018_v61 = vld [vmem:[#allocation3 + $0x28] sm:$0xff]  ;;  %2252 = vmatpush.msrb.mxu3 %v3735_v52 }
0x2d42   :  { %2836 = vmatmul.msk.f32.gmra.mxu1 %vm237_vm13, %v2018_v61  ;;  %2844 = vmatmul.msk.f32.vlgmr.msra.gmra.mxu3 %vm237_vm13, %v3579_v12  ;;  %v3761_v12 = vld [vmem:[%s3955_s9 + $0x3] ss:$0 sm:$0xff] }
0x2d43   :  { %2381 = vmatpush.msra.mxu3 %v3716_v14 }
0x2d45   :  { %2382 = vmatpush.msra.mxu3 %v3721_v16 }
0x2d47   :  { %2383 = vmatpush.msra.mxu3 %v3728_v57 }
0x2d49   :  { %2384 = vmatpush.msra.mxu3 %v3735_v52 }
0x2dbd   :  { %v1899_v0 = vpop.f32.mrf.mxu3 }
0x2dbe   :  { %v1900_v2 = vadd.f32 %v3548_v1, %v1899_v0 }
0x2dc0   :  { %1923 = vrot.lane.b32.xlu2 %v1900_v2, %s3084_s21  ;;  %v1902_v7 = vadd.f32 %v1900_v2, %v1879_v6 }
0x2dc2   :  { %v2827_v8 = vmul.f32 -1.442695, %v1902_v7 }
0x2dc4   :  { %3019 = vpow2.f32 %v2827_v8 }
0x2dc5   :  { %v2122_v3 = vpop.f32.mrf.mxu3 }
0x2dc6   :  { %v2123_v4 = vadd.f32 %v3761_v12, %v2122_v3 }
0x2dc8   :  { %2146 = vrot.lane.b32.xlu0 %v2123_v4, %s3084_s21  ;;  %v2125_v43 = vadd.f32 %v2123_v4, %v2072_v11  ;;  %v2641_v4 = vld [vmem:[%s3961_s10 + $0x10] sm:$0xff] }
0x2dca   :  { %v3020_v1 = vpop.eup %3019  ;;  %v2845_v15 = vmul.f32 -1.442695, %v2125_v43  ;;  %v2074_v43 = vpop.f32.mrf.mxu1 }
0x2dcb   :  { %v1906_v9 = vadd.f32 1.0, %v3020_v1 }
0x2dcd   :  { %3021 = vrcp.f32 %v1906_v9  ;;  %v1918_v22 = vand.u32 2147483648, %v1906_v9  ;;  %vm1912_vm7 = vweird.f32 %v1906_v9  ;;  %v1916_v23 = vand.u32 2147483647, %v1906_v9 }
0x2dce   :  { %3023 = vpow2.f32 %v2845_v15 }
0x2dcf   :  { %v1919_v26 = vor.u32 1.1754944e-38, %v1918_v22  ;;  %vm1917_vm9 = vcmp.eq.f32.partialorder %v1916_v23, 8.507059e+37 }
0x2dd3   :  { %v3022_v45 = vpop.eup %3021 }
0x2dd4   :  { %v1908_v54 = vmul.f32 %v3022_v45, %v1906_v9  ;;  %vm1913_vm0 = vweird.f32 %v3022_v45  ;;  %v3024_v24 = vpop.eup %3023 }
0x2dd5   :  { %vm1914_vm8 = vmor %vm1912_vm7, %vm1913_vm0  ;;  %v2129_v27 = vadd.f32 1.0, %v3024_v24 }
0x2dd6   :  { %v1909_v13 = vsub.f32 1.0, %v1908_v54 }
0x2dd7   :  { %3025 = vrcp.f32 %v2129_v27  ;;  %v2141_v32 = vand.u32 2147483648, %v2129_v27  ;;  %vm2135_vm11 = vweird.f32 %v2129_v27  ;;  %v2139_v60 = vand.u32 2147483647, %v2129_v27 }
0x2dd8   :  { %v1910_v17 = vmul.f32 %v3022_v45, %v1909_v13  ;;  %v2075_v13 = vadd.f32 %v3770_v53, %v2074_v43 }
0x2dd9   :  { %v2142_v34 = vor.u32 1.1754944e-38, %v2141_v32  ;;  %vm2140_vm14 = vcmp.eq.f32.partialorder %v2139_v60, 8.507059e+37 }
0x2dda   :  { %v1911_v21 = vadd.f32 %v3022_v45, %v1910_v17 }
0x2ddc   :  { %v1915_v25 = vsel %vm1914_vm8, %v3022_v45, %v1911_v21 }
0x2ddd   :  { %v1920_v29 = vsel %vm1917_vm9, %v1919_v26, %v1915_v25  ;;  %v3026_v49 = vpop.eup %3025 }
0x2dde   :  { %v2131_v19 = vmul.f32 %v3026_v49, %v2129_v27  ;;  %vm2136_vm10 = vweird.f32 %v3026_v49  ;;  %v1933_v47 = vsub.f32 1.0, %v1920_v29  ;;  %v1939_v18 = vmul.f32 %v1920_v29, %v3709_v56  ;;  %v2642_v56 = vld [vmem:[%s3961_s10 + $0x18] sm:$0xff] }
0x2ddf   :  { %vm2137_vm12 = vmor %vm2135_vm11, %vm2136_vm10  ;;  %2683 = vmatpush.msrb.mxu2 %v2642_v56 }
0x2de0   :  { %v2132_v31 = vsub.f32 1.0, %v2131_v19 }
0x2de1   :  { %2684 = vmatpush.msrb.mxu2 %v2641_v4 }
0x2de2   :  { %v2133_v48 = vmul.f32 %v3026_v49, %v2132_v31 }
0x2de4   :  { %v2134_v20 = vadd.f32 %v3026_v49, %v2133_v48 }
0x2de6   :  { %v2138_v33 = vsel %vm2137_vm12, %v3026_v49, %v2134_v20 }
0x2de7   :  { %v2143_v36 = vsel %vm2140_vm14, %v2142_v34, %v2138_v33 }
0x2de8   :  { %v2156_v58 = vsub.f32 1.0, %v2143_v36  ;;  %v2162_v62 = vmul.f32 %v2143_v36, %v3572_v37  ;;  %v2640_v37 = vld [vmem:[%s3961_s10 + $0x8] sm:$0xff] }
0x2de9   :  { %2685 = vmatpush.msrb.mxu2 %v2640_v37 }
0x2deb   :  { %2686 = vmatpush.msrb.mxu2 %v2639_v5 }
0x2e1a   :  { %v1924_v28 = vpop.permute.xlu2 %1923 }
0x2e1b   :  { %v1926_v30 = vmul.f32 %v1924_v28, %v1920_v29 }
0x2e1d   :  { %1928 = vrot.lane.b32.xlu1 %v1926_v30, %s3084_s21 }
0x2e3a   :  { %v2147_v35 = vpop.permute.xlu0 %2146 }
0x2e3b   :  { %v2149_v38 = vmul.f32 %v2147_v35, %v2143_v36 }
0x2e3d   :  { %2151 = vrot.lane.b32.xlu2 %v2149_v38, %s3084_s21 }
0x2e8f   :  { %v1929_v59 = vpop.permute.xlu1 %1928 }
0x2e90   :  { %v1931_v40 = vadd.f32 %v1929_v59, %v1879_v6 }
0x2e92   :  { %3027 = vtanh.f32 %v1931_v40 }
0x2e97   :  { %v2152_v50 = vpop.permute.xlu2 %2151 }
0x2e98   :  { %v3028_v42 = vpop.eup %3027  ;;  %v2154_v44 = vadd.f32 %v2152_v50, %v2072_v11 }
0x2e99   :  { %1935 = vrot.lane.b32.xlu0 %v3028_v42, %s3085_s22 }
0x2e9a   :  { %3029 = vtanh.f32 %v2154_v44 }
0x2ea0   :  { %v3030_v46 = vpop.eup %3029 }
0x2ea1   :  { %2158 = vrot.lane.b32.xlu1 %v3030_v46, %s3085_s22 }
0x2f0b   :  { %v1936_v51 = vpop.permute.xlu0 %1935 }
0x2f0c   :  { %v1938_v41 = vmul.f32 %v1936_v51, %v1933_v47  ;;  %v2077_v47 = vpop.f32.mrf.mxu1 }
0x2f0d   :  { %v2078_v51 = vadd.f32 %v3770_v53, %v2077_v47 }
0x2f0e   :  { %v3778_v55 = vadd.f32 %v1939_v18, %v1938_v41 }
0x2f10   :  { %1942 = vrot.lane.b32.xlu2 %v3778_v55, %s3085_s22 }
0x2f13   :  { %v2159_v61 = vpop.permute.xlu1 %2158 }
0x2f14   :  { %v2161_v0 = vmul.f32 %v2159_v61, %v2156_v58 }
0x2f16   :  { %v3783_v2 = vadd.f32 %v2162_v62, %v2161_v0 }
0x2f18   :  { %2165 = vrot.lane.b32.xlu0 %v3783_v2, %s3085_s22 }
0x2f6a   :  { %v1943_v3 = vpop.permute.xlu2 %1942 }
0x2f6b   :  { %1945 = vst.msk [vmem:[#allocation3 + $0x30] sm:$0xff] %vm237_vm13, %v1943_v3  ;;  %2828 = vmatmul.msk.f32.vlgmr.msrb.gmra.mxu0 %vm237_vm13, %v1943_v3 }
0x2f6c   :  { %2315 = vmatpush.msrb.mxu0 %v3716_v14 }
0x2f6e   :  { %2316 = vmatpush.msrb.mxu0 %v3721_v16 }
0x2f70   :  { %2317 = vmatpush.msrb.mxu0 %v3728_v57 }
0x2f72   :  { %v2019_v6 = vld [vmem:[#allocation3 + $0x30] sm:$0xff]  ;;  %2318 = vmatpush.msrb.mxu0 %v3735_v52 }
0x2f73   :  { %2837 = vmatmul.msk.f32.gmra.mxu1 %vm237_vm13, %v2019_v6 }
0x2f8a   :  { %v2166_v7 = vpop.permute.xlu0 %2165 }
0x2f8b   :  { %2168 = vst.msk [vmem:[#allocation4] sm:$0xff] %vm237_vm13, %v2166_v7  ;;  %2846 = vmatmul.msk.f32.vlgmr.msra.gmra.mxu0 %vm237_vm13, %v2166_v7 }
0x2f8c   :  { %2447 = vmatpush.msra.mxu0 %v3716_v14 }
0x2f8e   :  { %2448 = vmatpush.msra.mxu0 %v3721_v16 }
0x2f90   :  { %2449 = vmatpush.msra.mxu0 %v3728_v57 }
0x2f92   :  { %v2631_v8 = vld [vmem:[#allocation4] sm:$0xff]  ;;  %2450 = vmatpush.msra.mxu0 %v3735_v52 }
0x2f93   :  { %2860 = vmatmul.msk.f32.vlgmr.msrb.gmra.mxu2 %vm237_vm13, %v2631_v8 }
0x2fe8   :  { %v3813_v1 = vpop.f32.mrf.mxu0 }
0x3008   :  { %v2188_v9 = vpop.f32.mrf.mxu0 }
0x3009   :  { %v2189_v45 = vadd.f32 %v3761_v12, %v2188_v9 }
0x300b   :  { %2212 = vrot.lane.b32.xlu1 %v2189_v45, %s3084_s21  ;;  %v2191_v15 = vadd.f32 %v2189_v45, %v2075_v13 }
0x300d   :  { %v2847_v17 = vmul.f32 -1.442695, %v2191_v15 }
0x300f   :  { %3031 = vpow2.f32 %v2847_v17 }
0x3015   :  { %v3032_v21 = vpop.eup %3031 }
0x3016   :  { %v2688_v11 = vpop.f32.mrf.mxu2  ;;  %v2195_v22 = vadd.f32 1.0, %v3032_v21 }
0x3017   :  { %v2689_v54 = vadd.f32 %v3820_v10, %v2688_v11 }
0x3018   :  { %3033 = vrcp.f32 %v2195_v22  ;;  %v2207_v28 = vand.u32 2147483648, %v2195_v22  ;;  %vm2201_vm1 = vweird.f32 %v2195_v22  ;;  %v2205_v29 = vand.u32 2147483647, %v2195_v22 }
0x3019   :  { %2712 = vst [vmem:[%s3963_s12] sm:$0xff] %v2689_v54 }
0x301a   :  { %v2208_v49 = vor.u32 1.1754944e-38, %v2207_v28  ;;  %vm2206_vm3 = vcmp.eq.f32.partialorder %v2205_v29, 8.507059e+37 }
0x301e   :  { %v3034_v23 = vpop.eup %3033 }
0x301f   :  { %v2197_v24 = vmul.f32 %v3034_v23, %v2195_v22  ;;  %vm2202_vm15 = vweird.f32 %v3034_v23 }
0x3020   :  { %vm2203_vm2 = vmor %vm2201_vm1, %vm2202_vm15 }
0x3021   :  { %v2198_v25 = vsub.f32 1.0, %v2197_v24 }
0x3023   :  { %v2199_v26 = vmul.f32 %v3034_v23, %v2198_v25 }
0x3025   :  { %v2200_v27 = vadd.f32 %v3034_v23, %v2199_v26 }
0x3027   :  { %v2204_v30 = vsel %vm2203_vm2, %v3034_v23, %v2200_v27 }
0x3028   :  { %v2209_v31 = vsel %vm2206_vm3, %v2208_v49, %v2204_v30 }
0x3029   :  { %v2222_v33 = vsub.f32 1.0, %v2209_v31  ;;  %v2228_v35 = vmul.f32 %v2209_v31, %v3783_v2 }
0x307d   :  { %v2213_v19 = vpop.permute.xlu1 %2212 }
0x307e   :  { %v2215_v48 = vmul.f32 %v2213_v19, %v2209_v31 }
0x3080   :  { %2217 = vrot.lane.b32.xlu2 %v2215_v48, %s3084_s21 }
0x30da   :  { %v2218_v20 = vpop.permute.xlu2 %2217 }
0x30db   :  { %v2220_v32 = vadd.f32 %v2218_v20, %v2075_v13 }
0x30dd   :  { %3035 = vtanh.f32 %v2220_v32 }
0x30e3   :  { %v3036_v60 = vpop.eup %3035 }
0x30e4   :  { %2224 = vrot.lane.b32.xlu0 %v3036_v60, %s3085_s22 }
0x3156   :  { %v2225_v34 = vpop.permute.xlu0 %2224 }
0x3157   :  { %v2227_v36 = vmul.f32 %v2225_v34, %v2222_v33 }
0x3159   :  { %v2229_v38 = vadd.f32 %v2228_v35, %v2227_v36 }
0x315b   :  { %2231 = vrot.lane.b32.xlu1 %v2229_v38, %s3085_s22 }
0x31cd   :  { %v2232_v59 = vpop.permute.xlu1 %2231 }
0x31ce   :  { %2234 = vst.msk [vmem:[#allocation4 + $0x8] sm:$0xff] %vm237_vm13, %v2232_v59  ;;  %2848 = vmatmul.msk.f32.vlgmr.msrb.gmra.mxu3 %vm237_vm13, %v2232_v59 }
0x31cf   :  { %2513 = vmatpush.msrb.mxu3 %v3716_v14 }
0x31d1   :  { %2514 = vmatpush.msrb.mxu3 %v3721_v16 }
0x31d3   :  { %2515 = vmatpush.msrb.mxu3 %v3728_v57 }
0x31d5   :  { %v2632_v40 = vld [vmem:[#allocation4 + $0x8] sm:$0xff]  ;;  %2516 = vmatpush.msrb.mxu3 %v3735_v52 }
0x31d6   :  { %2861 = vmatmul.msk.f32.gmra.mxu2 %vm237_vm13, %v2632_v40 }
0x3251   :  { %v2254_v50 = vpop.f32.mrf.mxu3 }
0x3252   :  { %v2255_v42 = vadd.f32 %v3761_v12, %v2254_v50 }
0x3254   :  { %2278 = vrot.lane.b32.xlu2 %v2255_v42, %s3084_s21  ;;  %v2257_v18 = vadd.f32 %v2255_v42, %v2078_v51 }
0x3256   :  { %v2849_v41 = vmul.f32 -1.442695, %v2257_v18 }
0x3258   :  { %3037 = vpow2.f32 %v2849_v41 }
0x3259   :  { %v2691_v44 = vpop.f32.mrf.mxu2 }
0x325a   :  { %v2692_v46 = vadd.f32 %v3820_v10, %v2691_v44 }
0x325c   :  { %2713 = vst [vmem:[%s3963_s12 + $0x8] sm:$0xff] %v2692_v46 }
0x325e   :  { %v3038_v58 = vpop.eup %3037 }
0x325f   :  { %v2261_v61 = vadd.f32 1.0, %v3038_v58 }
0x3261   :  { %3039 = vrcp.f32 %v2261_v61  ;;  %v2273_v4 = vand.u32 2147483648, %v2261_v61  ;;  %vm2267_vm5 = vweird.f32 %v2261_v61  ;;  %v2271_v37 = vand.u32 2147483647, %v2261_v61 }
0x3263   :  { %v2274_v6 = vor.u32 1.1754944e-38, %v2273_v4  ;;  %vm2272_vm0 = vcmp.eq.f32.partialorder %v2271_v37, 8.507059e+37 }
0x3267   :  { %v3040_v62 = vpop.eup %3039 }
0x3268   :  { %v2263_v0 = vmul.f32 %v3040_v62, %v2261_v61  ;;  %vm2268_vm4 = vweird.f32 %v3040_v62 }
0x3269   :  { %vm2269_vm6 = vmor %vm2267_vm5, %vm2268_vm4 }
0x326a   :  { %v2264_v2 = vsub.f32 1.0, %v2263_v0 }
0x326c   :  { %v2265_v3 = vmul.f32 %v3040_v62, %v2264_v2 }
0x326e   :  { %v2266_v56 = vadd.f32 %v3040_v62, %v2265_v3 }
0x3270   :  { %v2270_v5 = vsel %vm2269_vm6, %v3040_v62, %v2266_v56 }
0x3271   :  { %v2275_v8 = vsel %vm2272_vm0, %v2274_v6, %v2270_v5 }
0x3272   :  { %v2288_v43 = vsub.f32 1.0, %v2275_v8  ;;  %v2294_v15 = vmul.f32 %v2275_v8, %v2229_v38 }
0x32ae   :  { %v2279_v7 = vpop.permute.xlu2 %2278 }
0x32af   :  { %v2281_v9 = vmul.f32 %v2279_v7, %v2275_v8 }
0x32b1   :  { %2283 = vrot.lane.b32.xlu0 %v2281_v9, %s3084_s21 }
0x3323   :  { %v2284_v45 = vpop.permute.xlu0 %2283 }
0x3324   :  { %v2286_v11 = vadd.f32 %v2284_v45, %v2078_v51 }
0x3326   :  { %3041 = vtanh.f32 %v2286_v11 }
0x332c   :  { %v3042_v54 = vpop.eup %3041 }
0x332d   :  { %2290 = vrot.lane.b32.xlu1 %v3042_v54, %s3085_s22 }
0x339f   :  { %v2291_v13 = vpop.permute.xlu1 %2290 }
0x33a0   :  { %v2293_v17 = vmul.f32 %v2291_v13, %v2288_v43 }
0x33a2   :  { %v2295_v21 = vadd.f32 %v2294_v15, %v2293_v17 }
0x33a4   :  { %2297 = vrot.lane.b32.xlu2 %v2295_v21, %s3085_s22 }
0x33fe   :  { %v2298_v22 = vpop.permute.xlu2 %2297 }
0x33ff   :  { %2300 = vst.msk [vmem:[#allocation4 + $0x10] sm:$0xff] %vm237_vm13, %v2298_v22  ;;  %2850 = vmatmul.msk.f32.vlgmr.msrb.gmra.mxu0 %vm237_vm13, %v2298_v22 }
0x3400   :  { %2579 = vmatpush.msrb.mxu0 %v3716_v14  ;;  %v2080_v14 = vpop.f32.mrf.mxu1 }
0x3402   :  { %2580 = vmatpush.msrb.mxu0 %v3721_v16  ;;  %v2081_v16 = vadd.f32 %v3770_v53, %v2080_v14 }
0x3404   :  { %2581 = vmatpush.msrb.mxu0 %v3728_v57 }
0x3406   :  { %v2633_v23 = vld [vmem:[#allocation4 + $0x10] sm:$0xff]  ;;  %2582 = vmatpush.msrb.mxu0 %v3735_v52 }
0x3407   :  { %2862 = vmatmul.msk.f32.gmra.mxu2 %vm237_vm13, %v2633_v23 }
0x3408   :  { %v2083_v0 = vpop.f32.mrf.mxu1 }
0x3409   :  { %v2084_v2 = vadd.f32 %v3770_v53, %v2083_v0 }
0x347c   :  { %v2320_v24 = vpop.f32.mrf.mxu0 }
0x347d   :  { %v2321_v25 = vadd.f32 %v3761_v12, %v2320_v24 }
0x347f   :  { %2344 = vrot.lane.b32.xlu0 %v2321_v25, %s3084_s21  ;;  %v2323_v57 = vadd.f32 %v2321_v25, %v2081_v16 }
0x3481   :  { %v2851_v28 = vmul.f32 -1.442695, %v2323_v57 }
0x3483   :  { %3043 = vpow2.f32 %v2851_v28 }
0x3489   :  { %v3044_v52 = vpop.eup %3043 }
0x348a   :  { %v2694_v26 = vpop.f32.mrf.mxu2  ;;  %v2327_v29 = vadd.f32 1.0, %v3044_v52 }
0x348b   :  { %v2695_v27 = vadd.f32 %v3820_v10, %v2694_v26 }
0x348c   :  { %3045 = vrcp.f32 %v2327_v29  ;;  %v2339_v20 = vand.u32 2147483648, %v2327_v29  ;;  %vm2333_vm8 = vweird.f32 %v2327_v29  ;;  %v2337_v32 = vand.u32 2147483647, %v2327_v29 }
0x348d   :  { %2714 = vst [vmem:[%s3963_s12 + $0x10] sm:$0xff] %v2695_v27 }
0x348e   :  { %v2340_v33 = vor.u32 1.1754944e-38, %v2339_v20  ;;  %vm2338_vm10 = vcmp.eq.f32.partialorder %v2337_v32, 8.507059e+37 }
0x3492   :  { %v3046_v30 = vpop.eup %3045 }
0x3493   :  { %v2329_v49 = vmul.f32 %v3046_v30, %v2327_v29  ;;  %vm2334_vm7 = vweird.f32 %v3046_v30 }
0x3494   :  { %vm2335_vm9 = vmor %vm2333_vm8, %vm2334_vm7 }
0x3495   :  { %v2330_v19 = vsub.f32 1.0, %v2329_v49  ;;  %v2086_v49 = vpop.f32.mrf.mxu1 }
0x3497   :  { %v2331_v31 = vmul.f32 %v3046_v30, %v2330_v19  ;;  %v2087_v19 = vadd.f32 %v3770_v53, %v2086_v49 }
0x3499   :  { %v2332_v48 = vadd.f32 %v3046_v30, %v2331_v31 }
0x349b   :  { %v2336_v60 = vsel %vm2335_vm9, %v3046_v30, %v2332_v48 }
0x349c   :  { %v2341_v35 = vsel %vm2338_vm10, %v2340_v33, %v2336_v60 }
0x349d   :  { %v2354_v50 = vsub.f32 1.0, %v2341_v35  ;;  %v2360_v44 = vmul.f32 %v2341_v35, %v2295_v21 }
0x34f1   :  { %v2345_v34 = vpop.permute.xlu0 %2344 }
0x34f2   :  { %v2347_v36 = vmul.f32 %v2345_v34, %v2341_v35 }
0x34f4   :  { %2349 = vrot.lane.b32.xlu1 %v2347_v36, %s3084_s21 }
0x3566   :  { %v2350_v38 = vpop.permute.xlu1 %2349 }
0x3567   :  { %v2352_v59 = vadd.f32 %v2350_v38, %v2081_v16 }
0x3569   :  { %3047 = vtanh.f32 %v2352_v59 }
0x356f   :  { %v3048_v40 = vpop.eup %3047 }
0x3570   :  { %2356 = vrot.lane.b32.xlu2 %v3048_v40, %s3085_s22 }
0x35ca   :  { %v2357_v42 = vpop.permute.xlu2 %2356 }
0x35cb   :  { %v2359_v46 = vmul.f32 %v2357_v42, %v2354_v50 }
0x35cd   :  { %v2361_v47 = vadd.f32 %v2360_v44, %v2359_v46 }
0x35cf   :  { %2363 = vrot.lane.b32.xlu0 %v2361_v47, %s3085_s22 }
0x3641   :  { %v2364_v51 = vpop.permute.xlu0 %2363 }
0x3642   :  { %2366 = vst.msk [vmem:[#allocation4 + $0x18] sm:$0xff] %vm237_vm13, %v2364_v51  ;;  %2852 = vmatmul.msk.f32.vlgmr.msra.gmra.mxu3 %vm237_vm13, %v2364_v51 }
0x3649   :  { %v2634_v18 = vld [vmem:[#allocation4 + $0x18] sm:$0xff] }
0x364a   :  { %2863 = vmatmul.msk.f32.gmra.mxu2 %vm237_vm13, %v2634_v18 }
0x36c5   :  { %v2386_v41 = vpop.f32.mrf.mxu3 }
0x36c6   :  { %v2387_v58 = vadd.f32 %v3761_v12, %v2386_v41  ;;  %v3080_v41 = vld [vmem:[%s3955_s9 + $0x2] ss:$0 sm:$0xff] }
0x36c8   :  { %2410 = vrot.lane.b32.xlu1 %v2387_v58, %s3084_s21  ;;  %v2389_v3 = vadd.f32 %v2387_v58, %v2084_v2  ;;  %v1967_v58 = vadd.f32 %v3080_v41, %v3813_v1  ;;  %v3081_v1 = vld [vmem:[%s3953_s8 + $0x2] ss:$0 sm:$0xff] }
0x36ca   :  { %v2853_v56 = vmul.f32 -1.442695, %v2389_v3 }
0x36cc   :  { %3049 = vpow2.f32 %v2853_v56 }
0x36cd   :  { %v2697_v61 = vpop.f32.mrf.mxu2 }
0x36ce   :  { %v2698_v62 = vadd.f32 %v3820_v10, %v2697_v61 }
0x36d0   :  { %2715 = vst [vmem:[%s3963_s12 + $0x18] sm:$0xff] %v2698_v62 }
0x36d2   :  { %v3050_v4 = vpop.eup %3049 }
0x36d3   :  { %v2393_v37 = vadd.f32 1.0, %v3050_v4 }
0x36d5   :  { %3051 = vrcp.f32 %v2393_v37  ;;  %v2405_v45 = vand.u32 2147483648, %v2393_v37  ;;  %vm2399_vm12 = vweird.f32 %v2393_v37  ;;  %v2403_v11 = vand.u32 2147483647, %v2393_v37 }
0x36d7   :  { %v2406_v43 = vor.u32 1.1754944e-38, %v2405_v45  ;;  %vm2404_vm15 = vcmp.eq.f32.partialorder %v2403_v11, 8.507059e+37 }
0x36db   :  { %v3052_v5 = vpop.eup %3051 }
0x36dc   :  { %v2395_v6 = vmul.f32 %v3052_v5, %v2393_v37  ;;  %vm2400_vm11 = vweird.f32 %v3052_v5  ;;  %v1465_v37 = vadd.f32 %v3081_v1, %v3754_v63 }
0x36dd   :  { %vm2401_vm14 = vmor %vm2399_vm12, %vm2400_vm11 }
0x36de   :  { %v2396_v7 = vsub.f32 1.0, %v2395_v6 }
0x36e0   :  { %v2397_v8 = vmul.f32 %v3052_v5, %v2396_v7 }
0x36e2   :  { %v2398_v9 = vadd.f32 %v3052_v5, %v2397_v8 }
0x36e4   :  { %v2402_v54 = vsel %vm2401_vm14, %v3052_v5, %v2398_v9  ;;  %v1946_v5 = vadd.f32 %v1465_v37, %v3593_v39 }
0x36e5   :  { %v2407_v15 = vsel %vm2404_vm15, %v2406_v43, %v2402_v54 }
0x36e6   :  { %v2420_v24 = vsub.f32 1.0, %v2407_v15  ;;  %v2426_v26 = vmul.f32 %v2407_v15, %v2361_v47  ;;  %v1969_v6 = vadd.f32 %v1967_v58, %v1946_v5 }
0x36e8   :  { %v2829_v7 = vmul.f32 -1.442695, %v1969_v6 }
0x373a   :  { %v2411_v13 = vpop.permute.xlu1 %2410 }
0x373b   :  { %v2413_v17 = vmul.f32 %v2411_v13, %v2407_v15 }
0x373d   :  { %2415 = vrot.lane.b32.xlu2 %v2413_v17, %s3084_s21 }
0x3797   :  { %v2416_v21 = vpop.permute.xlu2 %2415 }
0x3798   :  { %v2418_v22 = vadd.f32 %v2416_v21, %v2084_v2 }
0x379a   :  { %3053 = vtanh.f32 %v2418_v22 }
0x37a0   :  { %v3054_v23 = vpop.eup %3053 }
0x37a1   :  { %2422 = vrot.lane.b32.xlu0 %v3054_v23, %s3085_s22 }
0x3813   :  { %v2423_v25 = vpop.permute.xlu0 %2422 }
0x3814   :  { %v2425_v27 = vmul.f32 %v2423_v25, %v2420_v24 }
0x3816   :  { %v2427_v14 = vadd.f32 %v2426_v26, %v2425_v27 }
0x3818   :  { %2429 = vrot.lane.b32.xlu1 %v2427_v14, %s3085_s22 }
0x388a   :  { %v2430_v16 = vpop.permute.xlu1 %2429 }
0x388b   :  { %2432 = vst.msk [vmem:[#allocation4 + $0x20] sm:$0xff] %vm237_vm13, %v2430_v16  ;;  %2854 = vmatmul.msk.f32.vlgmr.msra.gmra.mxu0 %vm237_vm13, %v2430_v16 }
0x3892   :  { %v2635_v57 = vld [vmem:[#allocation4 + $0x20] sm:$0xff] }
0x3893   :  { %2864 = vmatmul.msk.f32.gmra.mxu2 %vm237_vm13, %v2635_v57 }
0x3908   :  { %v2452_v28 = vpop.f32.mrf.mxu0 }
0x3909   :  { %v2453_v52 = vadd.f32 %v3761_v12, %v2452_v28 }
0x390b   :  { %2476 = vrot.lane.b32.xlu2 %v2453_v52, %s3084_s21  ;;  %v2455_v31 = vadd.f32 %v2453_v52, %v2087_v19 }
0x390d   :  { %v2855_v48 = vmul.f32 -1.442695, %v2455_v31 }
0x390f   :  { %3055 = vpow2.f32 %v2855_v48 }
0x3915   :  { %v3056_v20 = vpop.eup %3055 }
0x3916   :  { %v2700_v29 = vpop.f32.mrf.mxu2  ;;  %v2459_v32 = vadd.f32 1.0, %v3056_v20 }
0x3917   :  { %v2701_v30 = vadd.f32 %v3820_v10, %v2700_v29 }
0x3918   :  { %3057 = vrcp.f32 %v2459_v32  ;;  %v2471_v38 = vand.u32 2147483648, %v2459_v32  ;;  %vm2465_vm2 = vweird.f32 %v2459_v32  ;;  %v2469_v59 = vand.u32 2147483647, %v2459_v32 }
0x3919   :  { %2716 = vst [vmem:[%s3963_s12 + $0x20] sm:$0xff] %v2701_v30 }
0x391a   :  { %v2472_v50 = vor.u32 1.1754944e-38, %v2471_v38  ;;  %vm2470_vm4 = vcmp.eq.f32.partialorder %v2469_v59, 8.507059e+37 }
0x391e   :  { %v3058_v60 = vpop.eup %3057 }
0x391f   :  { %v2461_v33 = vmul.f32 %v3058_v60, %v2459_v32  ;;  %vm2466_vm1 = vweird.f32 %v3058_v60 }
0x3920   :  { %vm2467_vm3 = vmor %vm2465_vm2, %vm2466_vm1 }
0x3921   :  { %v2462_v34 = vsub.f32 1.0, %v2461_v33 }
0x3923   :  { %v2463_v35 = vmul.f32 %v3058_v60, %v2462_v34 }
0x3925   :  { %v2464_v36 = vadd.f32 %v3058_v60, %v2463_v35 }
0x3927   :  { %v2468_v40 = vsel %vm2467_vm3, %v3058_v60, %v2464_v36 }
0x3928   :  { %v2473_v44 = vsel %vm2470_vm4, %v2472_v50, %v2468_v40 }
0x3929   :  { %v2486_v61 = vsub.f32 1.0, %v2473_v44  ;;  %v2492_v0 = vmul.f32 %v2473_v44, %v2427_v14  ;;  %v2089_v14 = vpop.f32.mrf.mxu1 }
0x392a   :  { %v2090_v16 = vadd.f32 %v3770_v53, %v2089_v14 }
0x3965   :  { %v2477_v42 = vpop.permute.xlu2 %2476 }
0x3966   :  { %v2479_v46 = vmul.f32 %v2477_v42, %v2473_v44 }
0x3968   :  { %2481 = vrot.lane.b32.xlu0 %v2479_v46, %s3084_s21 }
0x39da   :  { %v2482_v47 = vpop.permute.xlu0 %2481 }
0x39db   :  { %v2484_v51 = vadd.f32 %v2482_v47, %v2087_v19 }
0x39dd   :  { %3059 = vtanh.f32 %v2484_v51 }
0x39de   :  { %3061 = vpow2.f32 %v2829_v7 }
0x39e3   :  { %v3060_v18 = vpop.eup %3059 }
0x39e4   :  { %2488 = vrot.lane.b32.xlu1 %v3060_v18, %s3085_s22  ;;  %v3062_v8 = vpop.eup %3061 }
0x39e5   :  { %v1973_v9 = vadd.f32 1.0, %v3062_v8 }
0x39e7   :  { %3063 = vrcp.f32 %v1973_v9  ;;  %v1985_v21 = vand.u32 2147483648, %v1973_v9  ;;  %vm1979_vm6 = vweird.f32 %v1973_v9  ;;  %v1983_v63 = vand.u32 2147483647, %v1973_v9 }
0x39e9   :  { %v1986_v22 = vor.u32 1.1754944e-38, %v1985_v21  ;;  %vm1984_vm7 = vcmp.eq.f32.partialorder %v1983_v63, 8.507059e+37 }
0x39ec   :  { %1990 = vrot.lane.b32.xlu1 %v1967_v58, %s3084_s21 }
0x39ed   :  { %v3064_v45 = vpop.eup %3063 }
0x39ee   :  { %v1975_v11 = vmul.f32 %v3064_v45, %v1973_v9  ;;  %vm1980_vm5 = vweird.f32 %v3064_v45 }
0x39ef   :  { %vm1981_vm0 = vmor %vm1979_vm6, %vm1980_vm5 }
0x39f0   :  { %v1976_v54 = vsub.f32 1.0, %v1975_v11 }
0x39f2   :  { %v1977_v43 = vmul.f32 %v3064_v45, %v1976_v54 }
0x39f4   :  { %v1978_v15 = vadd.f32 %v3064_v45, %v1977_v43 }
0x39f6   :  { %v1982_v39 = vsel %vm1981_vm0, %v3064_v45, %v1978_v15 }
0x39f7   :  { %v1987_v24 = vsel %vm1984_vm7, %v1986_v22, %v1982_v39 }
0x39f8   :  { %v2000_v46 = vsub.f32 1.0, %v1987_v24  ;;  %v2006_v51 = vmul.f32 %v1987_v24, %v3778_v55 }
0x3a56   :  { %v2489_v62 = vpop.permute.xlu1 %2488 }
0x3a57   :  { %v2491_v2 = vmul.f32 %v2489_v62, %v2486_v61 }
0x3a59   :  { %v3895_v3 = vadd.f32 %v2492_v0, %v2491_v2 }
0x3a5b   :  { %2495 = vrot.lane.b32.xlu2 %v3895_v3, %s3085_s22 }
0x3a5e   :  { %v1991_v23 = vpop.permute.xlu1 %1990 }
0x3a5f   :  { %v1993_v26 = vmul.f32 %v1991_v23, %v1987_v24 }
0x3ab5   :  { %v2496_v56 = vpop.permute.xlu2 %2495 }
0x3ab6   :  { %2498 = vst.msk [vmem:[#allocation4 + $0x28] sm:$0xff] %vm237_vm13, %v2496_v56  ;;  %2856 = vmatmul.msk.f32.vlgmr.msrb.gmra.mxu3 %vm237_vm13, %v2496_v56 }
0x3abd   :  { %v2636_v4 = vld [vmem:[#allocation4 + $0x28] sm:$0xff] }
0x3abe   :  { %2865 = vmatmul.msk.f32.gmra.mxu2 %vm237_vm13, %v2636_v4 }
0x3b39   :  { %v2518_v13 = vpop.f32.mrf.mxu3 }
0x3b3a   :  { %v2519_v17 = vadd.f32 %v3761_v12, %v2518_v13 }
0x3b3c   :  { %2542 = vrot.lane.b32.xlu0 %v2519_v17, %s3084_s21  ;;  %v2521_v57 = vadd.f32 %v2519_v17, %v2090_v16 }
0x3b3e   :  { %v2857_v28 = vmul.f32 -1.442695, %v2521_v57 }
0x3b40   :  { %3065 = vpow2.f32 %v2857_v28 }
0x3b41   :  { %v2703_v25 = vpop.f32.mrf.mxu2 }
0x3b42   :  { %v2704_v27 = vadd.f32 %v3820_v10, %v2703_v25 }
0x3b44   :  { %2717 = vst [vmem:[%s3963_s12 + $0x28] sm:$0xff] %v2704_v27  ;;  %1995 = vrot.lane.b32.xlu0 %v1993_v26, %s3084_s21 }
0x3b46   :  { %v3066_v52 = vpop.eup %3065 }
0x3b47   :  { %v2525_v29 = vadd.f32 1.0, %v3066_v52 }
0x3b49   :  { %3067 = vrcp.f32 %v2525_v29  ;;  %v2537_v20 = vand.u32 2147483648, %v2525_v29  ;;  %vm2531_vm9 = vweird.f32 %v2525_v29  ;;  %v2535_v32 = vand.u32 2147483647, %v2525_v29 }
0x3b4b   :  { %v2538_v33 = vor.u32 1.1754944e-38, %v2537_v20  ;;  %vm2536_vm11 = vcmp.eq.f32.partialorder %v2535_v32, 8.507059e+37 }
0x3b4f   :  { %v3068_v30 = vpop.eup %3067 }
0x3b50   :  { %v2527_v49 = vmul.f32 %v3068_v30, %v2525_v29  ;;  %vm2532_vm8 = vweird.f32 %v3068_v30 }
0x3b51   :  { %vm2533_vm10 = vmor %vm2531_vm9, %vm2532_vm8 }
0x3b52   :  { %v2528_v19 = vsub.f32 1.0, %v2527_v49 }
0x3b54   :  { %v2529_v31 = vmul.f32 %v3068_v30, %v2528_v19 }
0x3b56   :  { %v2530_v48 = vadd.f32 %v3068_v30, %v2529_v31 }
0x3b58   :  { %v2534_v60 = vsel %vm2533_vm10, %v3068_v30, %v2530_v48 }
0x3b59   :  { %v2539_v35 = vsel %vm2536_vm11, %v2538_v33, %v2534_v60 }
0x3b5a   :  { %v2552_v58 = vsub.f32 1.0, %v2539_v35  ;;  %v2558_v62 = vmul.f32 %v2539_v35, %v3895_v3 }
0x3bae   :  { %v2543_v34 = vpop.permute.xlu0 %2542 }
0x3baf   :  { %v2545_v36 = vmul.f32 %v2543_v34, %v2539_v35 }
0x3bb1   :  { %2547 = vrot.lane.b32.xlu2 %v2545_v36, %s3084_s21 }
0x3bb6   :  { %v1996_v38 = vpop.permute.xlu0 %1995 }
0x3bb7   :  { %v1998_v59 = vadd.f32 %v1996_v38, %v1946_v5 }
0x3bb9   :  { %3069 = vtanh.f32 %v1998_v59 }
0x3bbf   :  { %v3070_v40 = vpop.eup %3069 }
0x3bc0   :  { %2002 = vrot.lane.b32.xlu2 %v3070_v40, %s3085_s22 }
0x3c0b   :  { %v2548_v50 = vpop.permute.xlu2 %2547 }
0x3c0c   :  { %v2550_v42 = vadd.f32 %v2548_v50, %v2090_v16 }
0x3c0e   :  { %3071 = vtanh.f32 %v2550_v42 }
0x3c14   :  { %v3072_v44 = vpop.eup %3071 }
0x3c15   :  { %2554 = vrot.lane.b32.xlu1 %v3072_v44, %s3085_s22 }
0x3c1a   :  { %v2003_v47 = vpop.permute.xlu2 %2002 }
0x3c1b   :  { %v2005_v18 = vmul.f32 %v2003_v47, %v2000_v46 }
0x3c1d   :  { %v2007_v41 = vadd.f32 %v2006_v51, %v2005_v18 }
0x3c1f   :  { %2009 = vrot.lane.b32.xlu1 %v2007_v41, %s3085_s22 }
0x3c87   :  { %v2555_v61 = vpop.permute.xlu1 %2554 }
0x3c88   :  { %v2557_v0 = vmul.f32 %v2555_v61, %v2552_v58 }
0x3c8a   :  { %v2559_v2 = vadd.f32 %v2558_v62, %v2557_v0 }
0x3c8c   :  { %2561 = vrot.lane.b32.xlu0 %v2559_v2, %s3085_s22 }
0x3c91   :  { %v2010_v56 = vpop.permute.xlu1 %2009 }
0x3c92   :  { %2012 = vst.msk [vmem:[#allocation3 + $0x38] sm:$0xff] %vm237_vm13, %v2010_v56 }
0x3c93   :  { %2720 = vst.msk [vmem:[%s3964_s13] sm:$0xff] %vm237_vm13, %v2010_v56 }
0x3c99   :  { %v2020_v55 = vld [vmem:[#allocation3 + $0x38] sm:$0xff] }
0x3c9a   :  { %2838 = vmatmul.msk.f32.gmra.mxu1 %vm237_vm13, %v2020_v55 }
0x3cfe   :  { %v2562_v4 = vpop.permute.xlu0 %2561 }
0x3cff   :  { %2564 = vst.msk [vmem:[#allocation4 + $0x30] sm:$0xff] %vm237_vm13, %v2562_v4  ;;  %2858 = vmatmul.msk.f32.vlgmr.msrb.gmra.mxu0 %vm237_vm13, %v2562_v4 }
0x3d06   :  { %v2637_v3 = vld [vmem:[#allocation4 + $0x30] sm:$0xff] }
0x3d07   :  { %2866 = vmatmul.msk.f32.gmra.mxu2 %vm237_vm13, %v2637_v3 }
0x3d17   :  { %v2092_v7 = vpop.f32.mrf.mxu1 }
0x3d18   :  { %v2093_v8 = vadd.f32 %v3770_v53, %v2092_v7 }
0x3d7c   :  { %v2584_v1 = vpop.f32.mrf.mxu0 }
0x3d7d   :  { %v2585_v37 = vadd.f32 %v3761_v12, %v2584_v1 }
0x3d7f   :  { %2608 = vrot.lane.b32.xlu2 %v2585_v37, %s3084_s21  ;;  %v2587_v9 = vadd.f32 %v2585_v37, %v2093_v8 }
0x3d81   :  { %v2859_v45 = vmul.f32 -1.442695, %v2587_v9 }
0x3d83   :  { %3073 = vpow2.f32 %v2859_v45 }
0x3d89   :  { %v3074_v11 = vpop.eup %3073 }
0x3d8a   :  { %v2706_v5 = vpop.f32.mrf.mxu2  ;;  %v2591_v54 = vadd.f32 1.0, %v3074_v11 }
0x3d8b   :  { %v2707_v6 = vadd.f32 %v3820_v10, %v2706_v5 }
0x3d8c   :  { %3075 = vrcp.f32 %v2591_v54  ;;  %v2603_v21 = vand.u32 2147483648, %v2591_v54  ;;  %vm2597_vm14 = vweird.f32 %v2591_v54  ;;  %v2601_v63 = vand.u32 2147483647, %v2591_v54 }
0x3d8d   :  { %2718 = vst [vmem:[%s3963_s12 + $0x30] sm:$0xff] %v2707_v6 }
0x3d8e   :  { %v2604_v22 = vor.u32 1.1754944e-38, %v2603_v21  ;;  %vm2602_vm1 = vcmp.eq.f32.partialorder %v2601_v63, 8.507059e+37 }
0x3d92   :  { %v3076_v43 = vpop.eup %3075 }
0x3d93   :  { %v2593_v12 = vmul.f32 %v3076_v43, %v2591_v54  ;;  %vm2598_vm12 = vweird.f32 %v3076_v43 }
0x3d94   :  { %vm2599_vm15 = vmor %vm2597_vm14, %vm2598_vm12 }
0x3d95   :  { %v2594_v13 = vsub.f32 1.0, %v2593_v12 }
0x3d97   :  { %v2595_v15 = vmul.f32 %v3076_v43, %v2594_v13 }
0x3d99   :  { %v2596_v17 = vadd.f32 %v3076_v43, %v2595_v15 }
0x3d9b   :  { %v2600_v39 = vsel %vm2599_vm15, %v3076_v43, %v2596_v17 }
0x3d9c   :  { %v2605_v23 = vsel %vm2602_vm1, %v2604_v22, %v2600_v39 }
0x3d9d   :  { %v2618_v14 = vsub.f32 1.0, %v2605_v23  ;;  %v2624_v57 = vmul.f32 %v2605_v23, %v2559_v2 }
0x3dd9   :  { %v2609_v53 = vpop.permute.xlu2 %2608 }
0x3dda   :  { %v2611_v24 = vmul.f32 %v2609_v53, %v2605_v23 }
0x3ddc   :  { %2613 = vrot.lane.b32.xlu0 %v2611_v24, %s3084_s21 }
0x3e4e   :  { %v2614_v25 = vpop.permute.xlu0 %2613 }
0x3e4f   :  { %v2616_v26 = vadd.f32 %v2614_v25, %v2093_v8 }
0x3e51   :  { %3077 = vtanh.f32 %v2616_v26 }
0x3e57   :  { %v3078_v27 = vpop.eup %3077 }
0x3e58   :  { %2620 = vrot.lane.b32.xlu1 %v3078_v27, %s3085_s22 }
0x3eca   :  { %v2621_v16 = vpop.permute.xlu1 %2620 }
0x3ecb   :  { %v2623_v28 = vmul.f32 %v2621_v16, %v2618_v14 }
0x3ecd   :  { %v2625_v52 = vadd.f32 %v2624_v57, %v2623_v28 }
0x3ecf   :  { %2627 = vrot.lane.b32.xlu2 %v2625_v52, %s3085_s22 }
0x3f29   :  { %v2628_v29 = vpop.permute.xlu2 %2627 }
0x3f2a   :  { %2630 = vst.msk [vmem:[#allocation4 + $0x38] sm:$0xff] %vm237_vm13, %v2628_v29 }
0x3f2b   :  { %2868 = vst.msk [vmem:[%s3964_s13 + $0x8] sm:$0xff] %vm237_vm13, %v2628_v29 }
0x3f31   :  { %v2638_v30 = vld [vmem:[#allocation4 + $0x38] sm:$0xff] }
0x3f32   :  { %2867 = vmatmul.msk.f32.gmra.mxu2 %vm237_vm13, %v2638_v30 }
0x3fb5   :  { %v2709_v49 = vpop.f32.mrf.mxu2 }
0x3fb6   :  { %v2710_v19 = vadd.f32 %v3820_v10, %v2709_v49 }
0x3fb8   :  { %2719 = vst [vmem:[%s3963_s12 + $0x38] sm:$0xff] %v2710_v19 }

</bundles_post_ra>
